<compile_context>
chip_gen: v7x
topology: tpu7x:2x2x1
jax: 0.10.0
libtpu: 0.0.40
codegen_flags: <defaults>
</compile_context>

<pallas_src>
import functools
import math

import jax
import jax.numpy as jnp
from jax.experimental import pallas as pl
from jax.experimental.pallas import tpu as pltpu


# ----------------------------- fused decoder-layer kernel -------------------

def _layer_kernel(trg_ref, enc_ref, tmask_ref, smask_ref,
                  wqkv_s_ref, bqkv_s_ref, wo_s_ref, bo_s_ref,
                  wq_c_ref, bq_c_ref, wkv_c_ref, bkv_c_ref, wo_c_ref, bo_c_ref,
                  w1_ref, b1_ref, w2_ref, b2_ref, ln_g_ref, ln_b_ref,
                  out_ref, *rest, n_heads, inv_scale, emit_attn):
    """One full DecoderLayer for a single batch element (grid axis = batch)."""
    if emit_attn:
        attn_ref, ctx_ref = rest
    else:
        attn_ref = None
        (ctx_ref,) = rest

    H = out_ref.shape[-1]
    hd = H // n_heads

    x = trg_ref[0]                 # (L, H)  f32
    enc = enc_ref[0]               # (S, H)  f32
    tmask = tmask_ref[0, 0]        # (L, L)  f32 (0 -> masked)
    smask = smask_ref[0, 0]        # (1, S)  f32 (broadcast over query rows)

    def mm(a, w_ref_):
        # bf16 operands on the MXU, f32 accumulation.
        return jnp.dot(a.astype(jnp.bfloat16), w_ref_[...],
                       preferred_element_type=jnp.float32)

    def layer_norm(y, idx):
        g = ln_g_ref[idx:idx + 1, :]               # (1, H)
        b = ln_b_ref[idx:idx + 1, :]               # (1, H)
        mu = jnp.mean(y, axis=-1, keepdims=True)
        var = jnp.mean(jnp.square(y - mu), axis=-1, keepdims=True)
        return (y - mu) * jax.lax.rsqrt(var + 1e-5) * g + b

    def multi_head_attention(q, k, v, mask, store_attn):
        # q: (Lq, H); k, v: (Lk, H); mask broadcastable to (Lq, Lk).
        for h in range(n_heads):                   # static loop, static slices
            lo = h * hd
            qh = (q[:, lo:lo + hd] * inv_scale).astype(jnp.bfloat16)
            kh = k[:, lo:lo + hd].astype(jnp.bfloat16)
            vh = v[:, lo:lo + hd].astype(jnp.bfloat16)
            e = jnp.dot(qh, kh.T, preferred_element_type=jnp.float32)  # (Lq, Lk)
            e = jnp.where(mask == 0.0, -1e10, e)
            e = e - jnp.max(e, axis=-1, keepdims=True)
            p = jnp.exp(e)
            p = p * pl.reciprocal(jnp.sum(p, axis=-1, keepdims=True), approx=True)
            ctx_ref[:, lo:lo + hd] = jnp.dot(p.astype(jnp.bfloat16), vh,
                                             preferred_element_type=jnp.float32)
            if store_attn:
                attn_ref[0, h, :, :] = p
        return ctx_ref[...]

    # ---- self attention + residual + LayerNorm --------------------------
    qkv = mm(x, wqkv_s_ref) + bqkv_s_ref[...]                  # (L, 3H)
    ctx = multi_head_attention(qkv[:, :H], qkv[:, H:2 * H], qkv[:, 2 * H:],
                               tmask, store_attn=False)
    sa = mm(ctx, wo_s_ref) + bo_s_ref[...]
    x = layer_norm(x + sa, 0)

    # ---- cross (encoder) attention + residual + LayerNorm ---------------
    q = mm(x, wq_c_ref) + bq_c_ref[...]                        # (L, H)
    kv = mm(enc, wkv_c_ref) + bkv_c_ref[...]                   # (S, 2H)
    ctx = multi_head_attention(q, kv[:, :H], kv[:, H:], smask,
                               store_attn=emit_attn)
    ca = mm(ctx, wo_c_ref) + bo_c_ref[...]
    x = layer_norm(x + ca, 1)

    # ---- position-wise FFN + residual + LayerNorm ------------------------
    h1 = jnp.maximum(mm(x, w1_ref) + b1_ref[...], 0.0)
    ff = mm(h1, w2_ref) + b2_ref[...]
    x = layer_norm(x + ff, 2)

    out_ref[0] = x


def _full_spec(shape):
    zeros = (0,) * len(shape)
    return pl.BlockSpec(shape, lambda b: zeros)


def decoder_layer_forward(lp, trg, enc_src, trg_mask, src_mask, n_heads,
                          want_attn):
    """trg: [B, L, H], enc_src: [B, S, H], trg_mask: [B,1,L,L], src_mask: [B,1,1,S]."""
    B, L, H = trg.shape
    S = enc_src.shape[1]
    PF = lp["w1"].shape[1]
    hd = H // n_heads
    inv_scale = 1.0 / math.sqrt(float(hd))

    kernel = functools.partial(_layer_kernel, n_heads=n_heads,
                               inv_scale=inv_scale, emit_attn=want_attn)

    out_shapes = [jax.ShapeDtypeStruct((B, L, H), jnp.float32)]
    out_specs = [pl.BlockSpec((1, L, H), lambda b: (b, 0, 0))]
    if want_attn:
        out_shapes.append(jax.ShapeDtypeStruct((B, n_heads, L, S), jnp.float32))
        out_specs.append(pl.BlockSpec((1, n_heads, L, S),
                                      lambda b: (b, 0, 0, 0)))

    in_specs = [
        pl.BlockSpec((1, L, H), lambda b: (b, 0, 0)),        # trg
        pl.BlockSpec((1, S, H), lambda b: (b, 0, 0)),        # enc_src
        pl.BlockSpec((1, 1, L, L), lambda b: (b, 0, 0, 0)),  # trg_mask
        pl.BlockSpec((1, 1, 1, S), lambda b: (b, 0, 0, 0)),  # src_mask
        _full_spec((H, 3 * H)), _full_spec((1, 3 * H)),      # self-attn QKV
        _full_spec((H, H)), _full_spec((1, H)),              # self-attn out proj
        _full_spec((H, H)), _full_spec((1, H)),              # cross-attn Q
        _full_spec((H, 2 * H)), _full_spec((1, 2 * H)),      # cross-attn KV
        _full_spec((H, H)), _full_spec((1, H)),              # cross-attn out proj
        _full_spec((H, PF)), _full_spec((1, PF)),            # FFN w1
        _full_spec((PF, H)), _full_spec((1, H)),             # FFN w2
        _full_spec((3, H)), _full_spec((3, H)),              # LayerNorm g / b
    ]

    outs = pl.pallas_call(
        kernel,
        out_shape=tuple(out_shapes),
        grid=(B,),
        in_specs=in_specs,
        out_specs=tuple(out_specs),
        scratch_shapes=[pltpu.VMEM((L, H), jnp.float32)],    # per-head context
        compiler_params=pltpu.CompilerParams(
            dimension_semantics=("parallel",)),
    )(trg, enc_src, trg_mask, src_mask,
      lp["wqkv_s"], lp["bqkv_s"], lp["wo_s"], lp["bo_s"],
      lp["wq_c"], lp["bq_c"], lp["wkv_c"], lp["bkv_c"], lp["wo_c"], lp["bo_c"],
      lp["w1"], lp["b1"], lp["w2"], lp["b2"], lp["ln_g"], lp["ln_b"])

    if want_attn:
        new_trg, attn = outs
    else:
        (new_trg,) = outs
        attn = None
    return new_trg, attn


# ----------------------------- tiled output projection -----------------------

def _out_proj_kernel(x_ref, w_ref, b_ref, o_ref):
    o_ref[...] = (jnp.dot(x_ref[...].astype(jnp.bfloat16), w_ref[...],
                          preferred_element_type=jnp.float32) + b_ref[...])


def _row_tile(m):
    for t in (256, 128, 64, 32, 16, 8):
        if m % t == 0 and m // t >= 2:
            return t
    return m


def _col_tile(n):
    if n % 128 == 0:
        for t in (2048, 1024, 512, 256, 128):
            if n % t == 0:
                return t
    return n


def output_projection(x2d, w_bf16, b_row):
    """x2d: [M, K] f32 @ w: [K, N] bf16 + b: [1, N] f32, tiled over (M, N)."""
    M, K = x2d.shape
    N = w_bf16.shape[1]
    tm = _row_tile(M)
    tn = _col_tile(N)
    # TODO(synk): add a K-axis grid with an accumulator scratch if hid_dim ever
    # grows past what a single (tm, K) / (K, tn) block pair keeps in VMEM.
    return pl.pallas_call(
        _out_proj_kernel,
        out_shape=jax.ShapeDtypeStruct((M, N), jnp.float32),
        grid=(M // tm, N // tn),
        in_specs=[
            pl.BlockSpec((tm, K), lambda i, j: (i, 0)),
            pl.BlockSpec((K, tn), lambda i, j: (0, j)),
            pl.BlockSpec((1, tn), lambda i, j: (0, j)),
        ],
        out_specs=pl.BlockSpec((tm, tn), lambda i, j: (i, j)),
        compiler_params=pltpu.CompilerParams(
            dimension_semantics=("parallel", "parallel")),
    )(x2d, w_bf16, b_row)


# ----------------------------- model glue (plain JAX) ------------------------

def decoder_forward(params, trg_tokens, enc_src, trg_mask, src_mask, n_heads):
    B, L = trg_tokens.shape
    H = params["tok_emb"].shape[1]
    # embedding lookup (gather) is glue; scale + add matches the PyTorch module
    x = (params["tok_emb"][trg_tokens] * math.sqrt(float(H))
         + params["pos_emb"][jnp.arange(L)][None, :, :])
    # dropout -> identity (inference)
    attn = None
    n_layers = len(params["layers"])
    for idx, lp in enumerate(params["layers"]):
        want_attn = (idx == n_layers - 1)   # only the last layer's attn is returned
        x, a = decoder_layer_forward(lp, x, enc_src, trg_mask, src_mask,
                                     n_heads, want_attn)
        if want_attn:
            attn = a
    out = output_projection(x.reshape(B * L, H), params["w_out"], params["b_out"])
    return out.reshape(B, L, -1), attn


# ----------------------------- parameter init --------------------------------

def _dense_init(key, fan_in, fan_out):
    kw, kb = jax.random.split(key)
    lim = 1.0 / math.sqrt(fan_in)
    w = jax.random.uniform(kw, (fan_in, fan_out), jnp.float32, -lim, lim)
    b = jax.random.uniform(kb, (fan_out,), jnp.float32, -lim, lim)
    return w, b


def init_decoder_params(key, output_dim, hid_dim, n_layers, n_heads, pf_dim,
                        max_length=400):
    keys = iter(jax.random.split(key, 3 + n_layers * 10))
    params = {
        "tok_emb": jax.random.normal(next(keys), (output_dim, hid_dim), jnp.float32),
        "pos_emb": jax.random.normal(next(keys), (max_length, hid_dim), jnp.float32),
        "layers": [],
    }
    for _ in range(n_layers):
        lp = {}
        # self-attention: fused QKV weight [H, 3H]
        wq, bq = _dense_init(next(keys), hid_dim, hid_dim)
        wk, bk = _dense_init(next(keys), hid_dim, hid_dim)
        wv, bv = _dense_init(next(keys), hid_dim, hid_dim)
        lp["wqkv_s"] = jnp.concatenate([wq, wk, wv], axis=1).astype(jnp.bfloat16)
        lp["bqkv_s"] = jnp.concatenate([bq, bk, bv]).reshape(1, 3 * hid_dim)
        wo, bo = _dense_init(next(keys), hid_dim, hid_dim)
        lp["wo_s"] = wo.astype(jnp.bfloat16)
        lp["bo_s"] = bo.reshape(1, hid_dim)
        # cross-attention: Q separate, fused KV weight [H, 2H]
        wq, bq = _dense_init(next(keys), hid_dim, hid_dim)
        wk, bk = _dense_init(next(keys), hid_dim, hid_dim)
        wv, bv = _dense_init(next(keys), hid_dim, hid_dim)
        lp["wq_c"] = wq.astype(jnp.bfloat16)
        lp["bq_c"] = bq.reshape(1, hid_dim)
        lp["wkv_c"] = jnp.concatenate([wk, wv], axis=1).astype(jnp.bfloat16)
        lp["bkv_c"] = jnp.concatenate([bk, bv]).reshape(1, 2 * hid_dim)
        wo, bo = _dense_init(next(keys), hid_dim, hid_dim)
        lp["wo_c"] = wo.astype(jnp.bfloat16)
        lp["bo_c"] = bo.reshape(1, hid_dim)
        # feed-forward
        w1, b1 = _dense_init(next(keys), hid_dim, pf_dim)
        w2, b2 = _dense_init(next(keys), pf_dim, hid_dim)
        lp["w1"] = w1.astype(jnp.bfloat16)
        lp["b1"] = b1.reshape(1, pf_dim)
        lp["w2"] = w2.astype(jnp.bfloat16)
        lp["b2"] = b2.reshape(1, hid_dim)
        # LayerNorm params packed [3, H] (self / cross / ffn)
        lp["ln_g"] = jnp.ones((3, hid_dim), jnp.float32)
        lp["ln_b"] = jnp.zeros((3, hid_dim), jnp.float32)
        params["layers"].append(lp)
    w_out, b_out = _dense_init(next(keys), hid_dim, output_dim)
    params["w_out"] = w_out.astype(jnp.bfloat16)
    params["b_out"] = b_out.reshape(1, output_dim)
    return params


# --------------------------------- main ---------------------------------------

if __name__ == "__main__":
    output_dim = 16   # target vocab
    hid_dim = 32
    n_layers = 2
    n_heads = 4
    pf_dim = 64
    B = 2
    trg_len = 8
    src_len = 8

    root = jax.random.PRNGKey(0)
    k_par, k_trg, k_enc = jax.random.split(root, 3)

    params = init_decoder_params(k_par, output_dim, hid_dim, n_layers, n_heads,
                                 pf_dim)

    trg_tokens = jax.random.randint(k_trg, (B, trg_len), 0, output_dim, jnp.int32)
    enc_src = jax.random.normal(k_enc, (B, src_len, hid_dim), jnp.float32)
    # causal target mask [B, 1, trg_len, trg_len]; full source mask [B, 1, 1, src_len]
    trg_mask = jnp.tril(jnp.ones((trg_len, trg_len), jnp.float32))[None, None, :, :]
    trg_mask = jnp.broadcast_to(trg_mask, (B, 1, trg_len, trg_len))
    src_mask = jnp.ones((B, 1, 1, src_len), jnp.float32)

    fwd = jax.jit(functools.partial(decoder_forward, n_heads=n_heads))
    out, attention_weights = fwd(params, trg_tokens, enc_src, trg_mask, src_mask)
    out = jax.block_until_ready(out)
    attention_weights = jax.block_until_ready(attention_weights)

    assert out.shape == (B, trg_len, output_dim)
    assert attention_weights.shape == (B, n_heads, trg_len, src_len)
    assert bool(jnp.all(jnp.isfinite(out)))
    assert bool(jnp.all(jnp.isfinite(attention_weights)))
    print("KERNEL_OK")
</pallas_src>

<mosaic_0001>
module attributes {stable_mosaic.version = 11 : i64} {
  func.func @_out_proj_kernel(%arg0: i32, %arg1: i32, %arg2: memref<8x32xf32, #tpu.memory_space<vmem>>, %arg3: memref<32x16xbf16, #tpu.memory_space<vmem>>, %arg4: memref<1x16xf32, #tpu.memory_space<vmem>>, %arg5: memref<8x16xf32, #tpu.memory_space<vmem>>) attributes {dimension_semantics = [#tpu.dimension_semantics<parallel>, #tpu.dimension_semantics<parallel>], iteration_bounds = array<i64: 2, 1>, scalar_prefetch = 0 : i64, scratch_operands = 0 : i64, tpu.core_type = #tpu.core_type<tc>, window_params = [{transform_indices = @transform_0, window_bounds = array<i64: 8, 32>}, {transform_indices = @transform_1, window_bounds = array<i64: 32, 16>}, {transform_indices = @transform_2, window_bounds = array<i64: 1, 16>}, {transform_indices = @transform_3, window_bounds = array<i64: 8, 16>}]} {
    %c0 = arith.constant 0 : index
    %c0_0 = arith.constant 0 : index
    %0 = vector.load %arg2[%c0, %c0_0] : memref<8x32xf32, #tpu.memory_space<vmem>>, vector<8x32xf32>
    %1 = arith.truncf %0 : vector<8x32xf32> to vector<8x32xbf16>
    %c0_1 = arith.constant 0 : index
    %c0_2 = arith.constant 0 : index
    %2 = vector.load %arg3[%c0_1, %c0_2] : memref<32x16xbf16, #tpu.memory_space<vmem>>, vector<32x16xbf16>
    %cst = arith.constant dense<0.000000e+00> : vector<8x16xf32>
    %3 = tpu.matmul %1, %2, %cst {dimension_numbers = #tpu.dot_dimension_numbers<[1], [0], [0], [1], [0, 0, 1, 1], [], []>} : vector<8x32xbf16>, vector<32x16xbf16>, vector<8x16xf32> -> vector<8x16xf32>
    %c0_3 = arith.constant 0 : index
    %c0_4 = arith.constant 0 : index
    %4 = vector.load %arg4[%c0_3, %c0_4] : memref<1x16xf32, #tpu.memory_space<vmem>>, vector<1x16xf32>
    %5 = vector.broadcast %4 : vector<1x16xf32> to vector<8x16xf32>
    %6 = arith.addf %3, %5 : vector<8x16xf32>
    %c0_5 = arith.constant 0 : index
    %c0_6 = arith.constant 0 : index
    %7 = vector.load %arg5[%c0_5, %c0_6] : memref<8x16xf32, #tpu.memory_space<vmem>>, vector<8x16xf32>
    tpu.vector_store %arg5[%c0_5, %c0_6], %6 {strides = array<i32>} : memref<8x16xf32, #tpu.memory_space<vmem>>, vector<8x16xf32>,
    return
  }
  func.func @transform_0(%arg0: i32, %arg1: i32) -> (i32, i32) {
    %c0_i32 = arith.constant 0 : i32
    %c0_i32_0 = arith.constant 0 : i32
    return %arg0, %c0_i32 : i32, i32
  }
  func.func @transform_1(%arg0: i32, %arg1: i32) -> (i32, i32) {
    %c0_i32 = arith.constant 0 : i32
    %c0_i32_0 = arith.constant 0 : i32
    return %c0_i32, %arg1 : i32, i32
  }
  func.func @transform_2(%arg0: i32, %arg1: i32) -> (i32, i32) {
    %c0_i32 = arith.constant 0 : i32
    %c0_i32_0 = arith.constant 0 : i32
    return %c0_i32, %arg1 : i32, i32
  }
  func.func @transform_3(%arg0: i32, %arg1: i32) -> (i32, i32) {
    %c0_i32 = arith.constant 0 : i32
    return %arg0, %arg1 : i32, i32
  }
}

module attributes {stable_mosaic.version = 11 : i64} {
  func.func @_layer_kernel(%arg0: i32, %arg1: memref<1x8x32xf32, #tpu.memory_space<vmem>>, %arg2: memref<1x8x32xf32, #tpu.memory_space<vmem>>, %arg3: memref<1x1x8x8xf32, #tpu.memory_space<vmem>>, %arg4: memref<1x1x1x8xf32, #tpu.memory_space<vmem>>, %arg5: memref<32x96xbf16, #tpu.memory_space<vmem>>, %arg6: memref<1x96xf32, #tpu.memory_space<vmem>>, %arg7: memref<32x32xbf16, #tpu.memory_space<vmem>>, %arg8: memref<1x32xf32, #tpu.memory_space<vmem>>, %arg9: memref<32x32xbf16, #tpu.memory_space<vmem>>, %arg10: memref<1x32xf32, #tpu.memory_space<vmem>>, %arg11: memref<32x64xbf16, #tpu.memory_space<vmem>>, %arg12: memref<1x64xf32, #tpu.memory_space<vmem>>, %arg13: memref<32x32xbf16, #tpu.memory_space<vmem>>, %arg14: memref<1x32xf32, #tpu.memory_space<vmem>>, %arg15: memref<32x64xbf16, #tpu.memory_space<vmem>>, %arg16: memref<1x64xf32, #tpu.memory_space<vmem>>, %arg17: memref<64x32xbf16, #tpu.memory_space<vmem>>, %arg18: memref<1x32xf32, #tpu.memory_space<vmem>>, %arg19: memref<3x32xf32, #tpu.memory_space<vmem>>, %arg20: memref<3x32xf32, #tpu.memory_space<vmem>>, %arg21: memref<1x8x32xf32, #tpu.memory_space<vmem>>, %arg22: memref<8x32xf32, #tpu.memory_space<vmem>>) attributes {dimension_semantics = [#tpu.dimension_semantics<parallel>], iteration_bounds = array<i64: 2>, scalar_prefetch = 0 : i64, scratch_operands = 1 : i64, tpu.core_type = #tpu.core_type<tc>, window_params = [{transform_indices = @transform_0, window_bounds = array<i64: 1, 8, 32>}, {transform_indices = @transform_1, window_bounds = array<i64: 1, 8, 32>}, {transform_indices = @transform_2, window_bounds = array<i64: 1, 1, 8, 8>}, {transform_indices = @transform_3, window_bounds = array<i64: 1, 1, 1, 8>}, {pipeline_mode = #tpu.pipeline_mode<synchronous>, transform_indices = @transform_4, window_bounds = array<i64: 32, 96>}, {pipeline_mode = #tpu.pipeline_mode<synchronous>, transform_indices = @transform_5, window_bounds = array<i64: 1, 96>}, {pipeline_mode = #tpu.pipeline_mode<synchronous>, transform_indices = @transform_6, window_bounds = array<i64: 32, 32>}, {pipeline_mode = #tpu.pipeline_mode<synchronous>, transform_indices = @transform_7, window_bounds = array<i64: 1, 32>}, {pipeline_mode = #tpu.pipeline_mode<synchronous>, transform_indices = @transform_8, window_bounds = array<i64: 32, 32>}, {pipeline_mode = #tpu.pipeline_mode<synchronous>, transform_indices = @transform_9, window_bounds = array<i64: 1, 32>}, {pipeline_mode = #tpu.pipeline_mode<synchronous>, transform_indices = @transform_10, window_bounds = array<i64: 32, 64>}, {pipeline_mode = #tpu.pipeline_mode<synchronous>, transform_indices = @transform_11, window_bounds = array<i64: 1, 64>}, {pipeline_mode = #tpu.pipeline_mode<synchronous>, transform_indices = @transform_12, window_bounds = array<i64: 32, 32>}, {pipeline_mode = #tpu.pipeline_mode<synchronous>, transform_indices = @transform_13, window_bounds = array<i64: 1, 32>}, {pipeline_mode = #tpu.pipeline_mode<synchronous>, transform_indices = @transform_14, window_bounds = array<i64: 32, 64>}, {pipeline_mode = #tpu.pipeline_mode<synchronous>, transform_indices = @transform_15, window_bounds = array<i64: 1, 64>}, {pipeline_mode = #tpu.pipeline_mode<synchronous>, transform_indices = @transform_16, window_bounds = array<i64: 64, 32>}, {pipeline_mode = #tpu.pipeline_mode<synchronous>, transform_indices = @transform_17, window_bounds = array<i64: 1, 32>}, {pipeline_mode = #tpu.pipeline_mode<synchronous>, transform_indices = @transform_18, window_bounds = array<i64: 3, 32>}, {pipeline_mode = #tpu.pipeline_mode<synchronous>, transform_indices = @transform_19, window_bounds = array<i64: 3, 32>}, {transform_indices = @transform_20, window_bounds = array<i64: 1, 8, 32>}]} {
    %c0 = arith.constant 0 : index
    %c0_0 = arith.constant 0 : index
    %c0_1 = arith.constant 0 : index
    %0 = vector.load %arg1[%c0, %c0_0, %c0_1] : memref<1x8x32xf32, #tpu.memory_space<vmem>>, vector<1x8x32xf32>
    %1 = vector.shape_cast %0 : vector<1x8x32xf32> to vector<8x32xf32>
    %c0_2 = arith.constant 0 : index
    %c0_3 = arith.constant 0 : index
    %c0_4 = arith.constant 0 : index
    %2 = vector.load %arg2[%c0_2, %c0_3, %c0_4] : memref<1x8x32xf32, #tpu.memory_space<vmem>>, vector<1x8x32xf32>
    %3 = vector.shape_cast %2 : vector<1x8x32xf32> to vector<8x32xf32>
    %c0_5 = arith.constant 0 : index
    %c0_6 = arith.constant 0 : index
    %c0_7 = arith.constant 0 : index
    %c0_8 = arith.constant 0 : index
    %4 = vector.load %arg3[%c0_5, %c0_6, %c0_7, %c0_8] : memref<1x1x8x8xf32, #tpu.memory_space<vmem>>, vector<1x1x8x8xf32>
    %5 = vector.shape_cast %4 : vector<1x1x8x8xf32> to vector<8x8xf32>
    %c0_9 = arith.constant 0 : index
    %c0_10 = arith.constant 0 : index
    %c0_11 = arith.constant 0 : index
    %c0_12 = arith.constant 0 : index
    %6 = vector.load %arg4[%c0_9, %c0_10, %c0_11, %c0_12] : memref<1x1x1x8xf32, #tpu.memory_space<vmem>>, vector<1x1x1x8xf32>
    %7 = vector.shape_cast %6 : vector<1x1x1x8xf32> to vector<1x8xf32>
    %8 = arith.truncf %1 : vector<8x32xf32> to vector<8x32xbf16>
    %c0_13 = arith.constant 0 : index
    %c0_14 = arith.constant 0 : index
    %9 = vector.load %arg5[%c0_13, %c0_14] : memref<32x96xbf16, #tpu.memory_space<vmem>>, vector<32x96xbf16>
    %cst = arith.constant dense<0.000000e+00> : vector<8x96xf32>
    %10 = tpu.matmul %8, %9, %cst {dimension_numbers = #tpu.dot_dimension_numbers<[1], [0], [0], [1], [0, 0, 1, 1], [], []>} : vector<8x32xbf16>, vector<32x96xbf16>, vector<8x96xf32> -> vector<8x96xf32>
    %c0_15 = arith.constant 0 : index
    %c0_16 = arith.constant 0 : index
    %11 = vector.load %arg6[%c0_15, %c0_16] : memref<1x96xf32, #tpu.memory_space<vmem>>, vector<1x96xf32>
    %12 = vector.broadcast %11 : vector<1x96xf32> to vector<8x96xf32>
    %13 = arith.addf %10, %12 : vector<8x96xf32>
    %14 = vector.extract_strided_slice %13 {offsets = [0, 0], sizes = [8, 32], strides = [1, 1]} : vector<8x96xf32> to vector<8x32xf32>
    %15 = vector.extract_strided_slice %13 {offsets = [0, 32], sizes = [8, 32], strides = [1, 1]} : vector<8x96xf32> to vector<8x32xf32>
    %16 = vector.extract_strided_slice %13 {offsets = [0, 64], sizes = [8, 32], strides = [1, 1]} : vector<8x96xf32> to vector<8x32xf32>
    %17 = vector.extract_strided_slice %14 {offsets = [0, 0], sizes = [8, 8], strides = [1, 1]} : vector<8x32xf32> to vector<8x8xf32>
    %cst_17 = arith.constant 0.353553385 : f32
    %18 = vector.broadcast %cst_17 : f32 to vector<8x8xf32>
    %19 = arith.mulf %17, %18 : vector<8x8xf32>
    %20 = arith.truncf %19 : vector<8x8xf32> to vector<8x8xbf16>
    %21 = vector.extract_strided_slice %15 {offsets = [0, 0], sizes = [8, 8], strides = [1, 1]} : vector<8x32xf32> to vector<8x8xf32>
    %22 = arith.truncf %21 : vector<8x8xf32> to vector<8x8xbf16>
    %23 = vector.extract_strided_slice %16 {offsets = [0, 0], sizes = [8, 8], strides = [1, 1]} : vector<8x32xf32> to vector<8x8xf32>
    %24 = arith.truncf %23 : vector<8x8xf32> to vector<8x8xbf16>
    %25 = tpu.transpose %22, [1, 0] : vector<8x8xbf16> -> vector<8x8xbf16>
    %cst_18 = arith.constant dense<0.000000e+00> : vector<8x8xf32>
    %26 = tpu.matmul %20, %25, %cst_18 {dimension_numbers = #tpu.dot_dimension_numbers<[1], [0], [0], [1], [0, 0, 1, 1], [], []>} : vector<8x8xbf16>, vector<8x8xbf16>, vector<8x8xf32> -> vector<8x8xf32>
    %cst_19 = arith.constant 0.000000e+00 : f32
    %27 = vector.broadcast %cst_19 : f32 to vector<8x8xf32>
    %28 = arith.cmpf oeq, %5, %27 : vector<8x8xf32>
    %cst_20 = arith.constant -1.000000e+10 : f32
    %29 = vector.broadcast %cst_20 : f32 to vector<8x8xf32>
    %30 = arith.select %28, %29, %26 : vector<8x8xi1>, vector<8x8xf32>
    %cst_21 = arith.constant dense<0xFF800000> : vector<8xf32>
    %31 = vector.multi_reduction <maximumf>, %30, %cst_21 [1] : vector<8x8xf32> to vector<8xf32>
    %32 = vector.shape_cast %31 : vector<8xf32> to vector<8x1xf32>
    %33 = vector.broadcast %32 : vector<8x1xf32> to vector<8x8xf32>
    %34 = arith.subf %30, %33 : vector<8x8xf32>
    %35 = math.exp %34 : vector<8x8xf32>
    %cst_22 = arith.constant dense<0.000000e+00> : vector<8xf32>
    %36 = vector.multi_reduction <add>, %35, %cst_22 [1] : vector<8x8xf32> to vector<8xf32>
    %37 = vector.shape_cast %36 : vector<8xf32> to vector<8x1xf32>
    %38 = tpu.reciprocal %37 {approx = true} : vector<8x1xf32> -> vector<8x1xf32>
    %39 = vector.broadcast %38 : vector<8x1xf32> to vector<8x8xf32>
    %40 = arith.mulf %35, %39 : vector<8x8xf32>
    %41 = arith.truncf %40 : vector<8x8xf32> to vector<8x8xbf16>
    %cst_23 = arith.constant dense<0.000000e+00> : vector<8x8xf32>
    %42 = tpu.matmul %41, %24, %cst_23 {dimension_numbers = #tpu.dot_dimension_numbers<[1], [0], [0], [1], [0, 0, 1, 1], [], []>} : vector<8x8xbf16>, vector<8x8xbf16>, vector<8x8xf32> -> vector<8x8xf32>
    %c0_24 = arith.constant 0 : index
    %c0_25 = arith.constant 0 : index
    %43 = vector.load %arg22[%c0_24, %c0_25] : memref<8x32xf32, #tpu.memory_space<vmem>>, vector<8x8xf32>
    tpu.vector_store %arg22[%c0_24, %c0_25], %42 {strides = array<i32>} : memref<8x32xf32, #tpu.memory_space<vmem>>, vector<8x8xf32>,
    %44 = vector.extract_strided_slice %14 {offsets = [0, 8], sizes = [8, 8], strides = [1, 1]} : vector<8x32xf32> to vector<8x8xf32>
    %cst_26 = arith.constant 0.353553385 : f32
    %45 = vector.broadcast %cst_26 : f32 to vector<8x8xf32>
    %46 = arith.mulf %44, %45 : vector<8x8xf32>
    %47 = arith.truncf %46 : vector<8x8xf32> to vector<8x8xbf16>
    %48 = vector.extract_strided_slice %15 {offsets = [0, 8], sizes = [8, 8], strides = [1, 1]} : vector<8x32xf32> to vector<8x8xf32>
    %49 = arith.truncf %48 : vector<8x8xf32> to vector<8x8xbf16>
    %50 = vector.extract_strided_slice %16 {offsets = [0, 8], sizes = [8, 8], strides = [1, 1]} : vector<8x32xf32> to vector<8x8xf32>
    %51 = arith.truncf %50 : vector<8x8xf32> to vector<8x8xbf16>
    %52 = tpu.transpose %49, [1, 0] : vector<8x8xbf16> -> vector<8x8xbf16>
    %cst_27 = arith.constant dense<0.000000e+00> : vector<8x8xf32>
    %53 = tpu.matmul %47, %52, %cst_27 {dimension_numbers = #tpu.dot_dimension_numbers<[1], [0], [0], [1], [0, 0, 1, 1], [], []>} : vector<8x8xbf16>, vector<8x8xbf16>, vector<8x8xf32> -> vector<8x8xf32>
    %cst_28 = arith.constant 0.000000e+00 : f32
    %54 = vector.broadcast %cst_28 : f32 to vector<8x8xf32>
    %55 = arith.cmpf oeq, %5, %54 : vector<8x8xf32>
    %cst_29 = arith.constant -1.000000e+10 : f32
    %56 = vector.broadcast %cst_29 : f32 to vector<8x8xf32>
    %57 = arith.select %55, %56, %53 : vector<8x8xi1>, vector<8x8xf32>
    %cst_30 = arith.constant dense<0xFF800000> : vector<8xf32>
    %58 = vector.multi_reduction <maximumf>, %57, %cst_30 [1] : vector<8x8xf32> to vector<8xf32>
    %59 = vector.shape_cast %58 : vector<8xf32> to vector<8x1xf32>
    %60 = vector.broadcast %59 : vector<8x1xf32> to vector<8x8xf32>
    %61 = arith.subf %57, %60 : vector<8x8xf32>
    %62 = math.exp %61 : vector<8x8xf32>
    %cst_31 = arith.constant dense<0.000000e+00> : vector<8xf32>
    %63 = vector.multi_reduction <add>, %62, %cst_31 [1] : vector<8x8xf32> to vector<8xf32>
    %64 = vector.shape_cast %63 : vector<8xf32> to vector<8x1xf32>
    %65 = tpu.reciprocal %64 {approx = true} : vector<8x1xf32> -> vector<8x1xf32>
    %66 = vector.broadcast %65 : vector<8x1xf32> to vector<8x8xf32>
    %67 = arith.mulf %62, %66 : vector<8x8xf32>
    %68 = arith.truncf %67 : vector<8x8xf32> to vector<8x8xbf16>
    %cst_32 = arith.constant dense<0.000000e+00> : vector<8x8xf32>
    %69 = tpu.matmul %68, %51, %cst_32 {dimension_numbers = #tpu.dot_dimension_numbers<[1], [0], [0], [1], [0, 0, 1, 1], [], []>} : vector<8x8xbf16>, vector<8x8xbf16>, vector<8x8xf32> -> vector<8x8xf32>
    %c0_33 = arith.constant 0 : index
    %c8 = arith.constant 8 : index
    %70 = vector.load %arg22[%c0_33, %c8] : memref<8x32xf32, #tpu.memory_space<vmem>>, vector<8x8xf32>
    tpu.vector_store %arg22[%c0_33, %c8], %69 {strides = array<i32>} : memref<8x32xf32, #tpu.memory_space<vmem>>, vector<8x8xf32>,
    %71 = vector.extract_strided_slice %14 {offsets = [0, 16], sizes = [8, 8], strides = [1, 1]} : vector<8x32xf32> to vector<8x8xf32>
    %cst_34 = arith.constant 0.353553385 : f32
    %72 = vector.broadcast %cst_34 : f32 to vector<8x8xf32>
    %73 = arith.mulf %71, %72 : vector<8x8xf32>
    %74 = arith.truncf %73 : vector<8x8xf32> to vector<8x8xbf16>
    %75 = vector.extract_strided_slice %15 {offsets = [0, 16], sizes = [8, 8], strides = [1, 1]} : vector<8x32xf32> to vector<8x8xf32>
    %76 = arith.truncf %75 : vector<8x8xf32> to vector<8x8xbf16>
    %77 = vector.extract_strided_slice %16 {offsets = [0, 16], sizes = [8, 8], strides = [1, 1]} : vector<8x32xf32> to vector<8x8xf32>
    %78 = arith.truncf %77 : vector<8x8xf32> to vector<8x8xbf16>
    %79 = tpu.transpose %76, [1, 0] : vector<8x8xbf16> -> vector<8x8xbf16>
    %cst_35 = arith.constant dense<0.000000e+00> : vector<8x8xf32>
    %80 = tpu.matmul %74, %79, %cst_35 {dimension_numbers = #tpu.dot_dimension_numbers<[1], [0], [0], [1], [0, 0, 1, 1], [], []>} : vector<8x8xbf16>, vector<8x8xbf16>, vector<8x8xf32> -> vector<8x8xf32>
    %cst_36 = arith.constant 0.000000e+00 : f32
    %81 = vector.broadcast %cst_36 : f32 to vector<8x8xf32>
    %82 = arith.cmpf oeq, %5, %81 : vector<8x8xf32>
    %cst_37 = arith.constant -1.000000e+10 : f32
    %83 = vector.broadcast %cst_37 : f32 to vector<8x8xf32>
    %84 = arith.select %82, %83, %80 : vector<8x8xi1>, vector<8x8xf32>
    %cst_38 = arith.constant dense<0xFF800000> : vector<8xf32>
    %85 = vector.multi_reduction <maximumf>, %84, %cst_38 [1] : vector<8x8xf32> to vector<8xf32>
    %86 = vector.shape_cast %85 : vector<8xf32> to vector<8x1xf32>
    %87 = vector.broadcast %86 : vector<8x1xf32> to vector<8x8xf32>
    %88 = arith.subf %84, %87 : vector<8x8xf32>
    %89 = math.exp %88 : vector<8x8xf32>
    %cst_39 = arith.constant dense<0.000000e+00> : vector<8xf32>
    %90 = vector.multi_reduction <add>, %89, %cst_39 [1] : vector<8x8xf32> to vector<8xf32>
    %91 = vector.shape_cast %90 : vector<8xf32> to vector<8x1xf32>
    %92 = tpu.reciprocal %91 {approx = true} : vector<8x1xf32> -> vector<8x1xf32>
    %93 = vector.broadcast %92 : vector<8x1xf32> to vector<8x8xf32>
    %94 = arith.mulf %89, %93 : vector<8x8xf32>
    %95 = arith.truncf %94 : vector<8x8xf32> to vector<8x8xbf16>
    %cst_40 = arith.constant dense<0.000000e+00> : vector<8x8xf32>
    %96 = tpu.matmul %95, %78, %cst_40 {dimension_numbers = #tpu.dot_dimension_numbers<[1], [0], [0], [1], [0, 0, 1, 1], [], []>} : vector<8x8xbf16>, vector<8x8xbf16>, vector<8x8xf32> -> vector<8x8xf32>
    %c0_41 = arith.constant 0 : index
    %c16 = arith.constant 16 : index
    %97 = vector.load %arg22[%c0_41, %c16] : memref<8x32xf32, #tpu.memory_space<vmem>>, vector<8x8xf32>
    tpu.vector_store %arg22[%c0_41, %c16], %96 {strides = array<i32>} : memref<8x32xf32, #tpu.memory_space<vmem>>, vector<8x8xf32>,
    %98 = vector.extract_strided_slice %14 {offsets = [0, 24], sizes = [8, 8], strides = [1, 1]} : vector<8x32xf32> to vector<8x8xf32>
    %cst_42 = arith.constant 0.353553385 : f32
    %99 = vector.broadcast %cst_42 : f32 to vector<8x8xf32>
    %100 = arith.mulf %98, %99 : vector<8x8xf32>
    %101 = arith.truncf %100 : vector<8x8xf32> to vector<8x8xbf16>
    %102 = vector.extract_strided_slice %15 {offsets = [0, 24], sizes = [8, 8], strides = [1, 1]} : vector<8x32xf32> to vector<8x8xf32>
    %103 = arith.truncf %102 : vector<8x8xf32> to vector<8x8xbf16>
    %104 = vector.extract_strided_slice %16 {offsets = [0, 24], sizes = [8, 8], strides = [1, 1]} : vector<8x32xf32> to vector<8x8xf32>
    %105 = arith.truncf %104 : vector<8x8xf32> to vector<8x8xbf16>
    %106 = tpu.transpose %103, [1, 0] : vector<8x8xbf16> -> vector<8x8xbf16>
    %cst_43 = arith.constant dense<0.000000e+00> : vector<8x8xf32>
    %107 = tpu.matmul %101, %106, %cst_43 {dimension_numbers = #tpu.dot_dimension_numbers<[1], [0], [0], [1], [0, 0, 1, 1], [], []>} : vector<8x8xbf16>, vector<8x8xbf16>, vector<8x8xf32> -> vector<8x8xf32>
    %cst_44 = arith.constant 0.000000e+00 : f32
    %108 = vector.broadcast %cst_44 : f32 to vector<8x8xf32>
    %109 = arith.cmpf oeq, %5, %108 : vector<8x8xf32>
    %cst_45 = arith.constant -1.000000e+10 : f32
    %110 = vector.broadcast %cst_45 : f32 to vector<8x8xf32>
    %111 = arith.select %109, %110, %107 : vector<8x8xi1>, vector<8x8xf32>
    %cst_46 = arith.constant dense<0xFF800000> : vector<8xf32>
    %112 = vector.multi_reduction <maximumf>, %111, %cst_46 [1] : vector<8x8xf32> to vector<8xf32>
    %113 = vector.shape_cast %112 : vector<8xf32> to vector<8x1xf32>
    %114 = vector.broadcast %113 : vector<8x1xf32> to vector<8x8xf32>
    %115 = arith.subf %111, %114 : vector<8x8xf32>
    %116 = math.exp %115 : vector<8x8xf32>
    %cst_47 = arith.constant dense<0.000000e+00> : vector<8xf32>
    %117 = vector.multi_reduction <add>, %116, %cst_47 [1] : vector<8x8xf32> to vector<8xf32>
    %118 = vector.shape_cast %117 : vector<8xf32> to vector<8x1xf32>
    %119 = tpu.reciprocal %118 {approx = true} : vector<8x1xf32> -> vector<8x1xf32>
    %120 = vector.broadcast %119 : vector<8x1xf32> to vector<8x8xf32>
    %121 = arith.mulf %116, %120 : vector<8x8xf32>
    %122 = arith.truncf %121 : vector<8x8xf32> to vector<8x8xbf16>
    %cst_48 = arith.constant dense<0.000000e+00> : vector<8x8xf32>
    %123 = tpu.matmul %122, %105, %cst_48 {dimension_numbers = #tpu.dot_dimension_numbers<[1], [0], [0], [1], [0, 0, 1, 1], [], []>} : vector<8x8xbf16>, vector<8x8xbf16>, vector<8x8xf32> -> vector<8x8xf32>
    %c0_49 = arith.constant 0 : index
    %c24 = arith.constant 24 : index
    %124 = vector.load %arg22[%c0_49, %c24] : memref<8x32xf32, #tpu.memory_space<vmem>>, vector<8x8xf32>
    tpu.vector_store %arg22[%c0_49, %c24], %123 {strides = array<i32>} : memref<8x32xf32, #tpu.memory_space<vmem>>, vector<8x8xf32>,
    %c0_50 = arith.constant 0 : index
    %c0_51 = arith.constant 0 : index
    %125 = vector.load %arg22[%c0_50, %c0_51] : memref<8x32xf32, #tpu.memory_space<vmem>>, vector<8x32xf32>
    %126 = arith.truncf %125 : vector<8x32xf32> to vector<8x32xbf16>
    %c0_52 = arith.constant 0 : index
    %c0_53 = arith.constant 0 : index
    %127 = vector.load %arg7[%c0_52, %c0_53] : memref<32x32xbf16, #tpu.memory_space<vmem>>, vector<32x32xbf16>
    %cst_54 = arith.constant dense<0.000000e+00> : vector<8x32xf32>
    %128 = tpu.matmul %126, %127, %cst_54 {dimension_numbers = #tpu.dot_dimension_numbers<[1], [0], [0], [1], [0, 0, 1, 1], [], []>} : vector<8x32xbf16>, vector<32x32xbf16>, vector<8x32xf32> -> vector<8x32xf32>
    %c0_55 = arith.constant 0 : index
    %c0_56 = arith.constant 0 : index
    %129 = vector.load %arg8[%c0_55, %c0_56] : memref<1x32xf32, #tpu.memory_space<vmem>>, vector<1x32xf32>
    %130 = vector.broadcast %129 : vector<1x32xf32> to vector<8x32xf32>
    %131 = arith.addf %128, %130 : vector<8x32xf32>
    %132 = arith.addf %1, %131 : vector<8x32xf32>
    %c0_57 = arith.constant 0 : index
    %c0_58 = arith.constant 0 : index
    %133 = vector.load %arg19[%c0_57, %c0_58] : memref<3x32xf32, #tpu.memory_space<vmem>>, vector<1x32xf32>
    %c0_59 = arith.constant 0 : index
    %c0_60 = arith.constant 0 : index
    %134 = vector.load %arg20[%c0_59, %c0_60] : memref<3x32xf32, #tpu.memory_space<vmem>>, vector<1x32xf32>
    %cst_61 = arith.constant dense<0.000000e+00> : vector<8xf32>
    %135 = vector.multi_reduction <add>, %132, %cst_61 [1] : vector<8x32xf32> to vector<8xf32>
    %136 = vector.shape_cast %135 : vector<8xf32> to vector<8x1xf32>
    %cst_62 = arith.constant 3.200000e+01 : f32
    %137 = vector.broadcast %cst_62 : f32 to vector<8x1xf32>
    %138 = arith.divf %136, %137 : vector<8x1xf32>
    %139 = vector.broadcast %138 : vector<8x1xf32> to vector<8x32xf32>
    %140 = arith.subf %132, %139 : vector<8x32xf32>
    %141 = arith.mulf %140, %140 : vector<8x32xf32>
    %cst_63 = arith.constant dense<0.000000e+00> : vector<8xf32>
    %142 = vector.multi_reduction <add>, %141, %cst_63 [1] : vector<8x32xf32> to vector<8xf32>
    %143 = vector.shape_cast %142 : vector<8xf32> to vector<8x1xf32>
    %cst_64 = arith.constant 3.200000e+01 : f32
    %144 = vector.broadcast %cst_64 : f32 to vector<8x1xf32>
    %145 = arith.divf %143, %144 : vector<8x1xf32>
    %146 = vector.broadcast %138 : vector<8x1xf32> to vector<8x32xf32>
    %147 = arith.subf %132, %146 : vector<8x32xf32>
    %cst_65 = arith.constant 9.99999974E-6 : f32
    %148 = vector.broadcast %cst_65 : f32 to vector<8x1xf32>
    %149 = arith.addf %145, %148 : vector<8x1xf32>
    %150 = math.rsqrt %149 : vector<8x1xf32>
    %151 = vector.broadcast %150 : vector<8x1xf32> to vector<8x32xf32>
    %152 = arith.mulf %147, %151 : vector<8x32xf32>
    %153 = vector.broadcast %133 : vector<1x32xf32> to vector<8x32xf32>
    %154 = arith.mulf %152, %153 : vector<8x32xf32>
    %155 = vector.broadcast %134 : vector<1x32xf32> to vector<8x32xf32>
    %156 = arith.addf %154, %155 : vector<8x32xf32>
    %157 = arith.truncf %156 : vector<8x32xf32> to vector<8x32xbf16>
    %c0_66 = arith.constant 0 : index
    %c0_67 = arith.constant 0 : index
    %158 = vector.load %arg9[%c0_66, %c0_67] : memref<32x32xbf16, #tpu.memory_space<vmem>>, vector<32x32xbf16>
    %cst_68 = arith.constant dense<0.000000e+00> : vector<8x32xf32>
    %159 = tpu.matmul %157, %158, %cst_68 {dimension_numbers = #tpu.dot_dimension_numbers<[1], [0], [0], [1], [0, 0, 1, 1], [], []>} : vector<8x32xbf16>, vector<32x32xbf16>, vector<8x32xf32> -> vector<8x32xf32>
    %c0_69 = arith.constant 0 : index
    %c0_70 = arith.constant 0 : index
    %160 = vector.load %arg10[%c0_69, %c0_70] : memref<1x32xf32, #tpu.memory_space<vmem>>, vector<1x32xf32>
    %161 = vector.broadcast %160 : vector<1x32xf32> to vector<8x32xf32>
    %162 = arith.addf %159, %161 : vector<8x32xf32>
    %163 = arith.truncf %3 : vector<8x32xf32> to vector<8x32xbf16>
    %c0_71 = arith.constant 0 : index
    %c0_72 = arith.constant 0 : index
    %164 = vector.load %arg11[%c0_71, %c0_72] : memref<32x64xbf16, #tpu.memory_space<vmem>>, vector<32x64xbf16>
    %cst_73 = arith.constant dense<0.000000e+00> : vector<8x64xf32>
    %165 = tpu.matmul %163, %164, %cst_73 {dimension_numbers = #tpu.dot_dimension_numbers<[1], [0], [0], [1], [0, 0, 1, 1], [], []>} : vector<8x32xbf16>, vector<32x64xbf16>, vector<8x64xf32> -> vector<8x64xf32>
    %c0_74 = arith.constant 0 : index
    %c0_75 = arith.constant 0 : index
    %166 = vector.load %arg12[%c0_74, %c0_75] : memref<1x64xf32, #tpu.memory_space<vmem>>, vector<1x64xf32>
    %167 = vector.broadcast %166 : vector<1x64xf32> to vector<8x64xf32>
    %168 = arith.addf %165, %167 : vector<8x64xf32>
    %169 = vector.extract_strided_slice %168 {offsets = [0, 0], sizes = [8, 32], strides = [1, 1]} : vector<8x64xf32> to vector<8x32xf32>
    %170 = vector.extract_strided_slice %168 {offsets = [0, 32], sizes = [8, 32], strides = [1, 1]} : vector<8x64xf32> to vector<8x32xf32>
    %171 = vector.extract_strided_slice %162 {offsets = [0, 0], sizes = [8, 8], strides = [1, 1]} : vector<8x32xf32> to vector<8x8xf32>
    %cst_76 = arith.constant 0.353553385 : f32
    %172 = vector.broadcast %cst_76 : f32 to vector<8x8xf32>
    %173 = arith.mulf %171, %172 : vector<8x8xf32>
    %174 = arith.truncf %173 : vector<8x8xf32> to vector<8x8xbf16>
    %175 = vector.extract_strided_slice %169 {offsets = [0, 0], sizes = [8, 8], strides = [1, 1]} : vector<8x32xf32> to vector<8x8xf32>
    %176 = arith.truncf %175 : vector<8x8xf32> to vector<8x8xbf16>
    %177 = vector.extract_strided_slice %170 {offsets = [0, 0], sizes = [8, 8], strides = [1, 1]} : vector<8x32xf32> to vector<8x8xf32>
    %178 = arith.truncf %177 : vector<8x8xf32> to vector<8x8xbf16>
    %179 = tpu.transpose %176, [1, 0] : vector<8x8xbf16> -> vector<8x8xbf16>
    %cst_77 = arith.constant dense<0.000000e+00> : vector<8x8xf32>
    %180 = tpu.matmul %174, %179, %cst_77 {dimension_numbers = #tpu.dot_dimension_numbers<[1], [0], [0], [1], [0, 0, 1, 1], [], []>} : vector<8x8xbf16>, vector<8x8xbf16>, vector<8x8xf32> -> vector<8x8xf32>
    %cst_78 = arith.constant 0.000000e+00 : f32
    %181 = vector.broadcast %cst_78 : f32 to vector<1x8xf32>
    %182 = arith.cmpf oeq, %7, %181 : vector<1x8xf32>
    %cst_79 = arith.constant -1.000000e+10 : f32
    %183 = vector.shape_cast %182 : vector<1x8xi1> to vector<1x8xi1>
    %184 = vector.broadcast %183 : vector<1x8xi1> to vector<8x8xi1>
    %185 = vector.broadcast %cst_79 : f32 to vector<8x8xf32>
    %186 = arith.select %184, %185, %180 : vector<8x8xi1>, vector<8x8xf32>
    %cst_80 = arith.constant dense<0xFF800000> : vector<8xf32>
    %187 = vector.multi_reduction <maximumf>, %186, %cst_80 [1] : vector<8x8xf32> to vector<8xf32>
    %188 = vector.shape_cast %187 : vector<8xf32> to vector<8x1xf32>
    %189 = vector.broadcast %188 : vector<8x1xf32> to vector<8x8xf32>
    %190 = arith.subf %186, %189 : vector<8x8xf32>
    %191 = math.exp %190 : vector<8x8xf32>
    %cst_81 = arith.constant dense<0.000000e+00> : vector<8xf32>
    %192 = vector.multi_reduction <add>, %191, %cst_81 [1] : vector<8x8xf32> to vector<8xf32>
    %193 = vector.shape_cast %192 : vector<8xf32> to vector<8x1xf32>
    %194 = tpu.reciprocal %193 {approx = true} : vector<8x1xf32> -> vector<8x1xf32>
    %195 = vector.broadcast %194 : vector<8x1xf32> to vector<8x8xf32>
    %196 = arith.mulf %191, %195 : vector<8x8xf32>
    %197 = arith.truncf %196 : vector<8x8xf32> to vector<8x8xbf16>
    %cst_82 = arith.constant dense<0.000000e+00> : vector<8x8xf32>
    %198 = tpu.matmul %197, %178, %cst_82 {dimension_numbers = #tpu.dot_dimension_numbers<[1], [0], [0], [1], [0, 0, 1, 1], [], []>} : vector<8x8xbf16>, vector<8x8xbf16>, vector<8x8xf32> -> vector<8x8xf32>
    %c0_83 = arith.constant 0 : index
    %c0_84 = arith.constant 0 : index
    %199 = vector.load %arg22[%c0_83, %c0_84] : memref<8x32xf32, #tpu.memory_space<vmem>>, vector<8x8xf32>
    tpu.vector_store %arg22[%c0_83, %c0_84], %198 {strides = array<i32>} : memref<8x32xf32, #tpu.memory_space<vmem>>, vector<8x8xf32>,
    %200 = vector.extract_strided_slice %162 {offsets = [0, 8], sizes = [8, 8], strides = [1, 1]} : vector<8x32xf32> to vector<8x8xf32>
    %cst_85 = arith.constant 0.353553385 : f32
    %201 = vector.broadcast %cst_85 : f32 to vector<8x8xf32>
    %202 = arith.mulf %200, %201 : vector<8x8xf32>
    %203 = arith.truncf %202 : vector<8x8xf32> to vector<8x8xbf16>
    %204 = vector.extract_strided_slice %169 {offsets = [0, 8], sizes = [8, 8], strides = [1, 1]} : vector<8x32xf32> to vector<8x8xf32>
    %205 = arith.truncf %204 : vector<8x8xf32> to vector<8x8xbf16>
    %206 = vector.extract_strided_slice %170 {offsets = [0, 8], sizes = [8, 8], strides = [1, 1]} : vector<8x32xf32> to vector<8x8xf32>
    %207 = arith.truncf %206 : vector<8x8xf32> to vector<8x8xbf16>
    %208 = tpu.transpose %205, [1, 0] : vector<8x8xbf16> -> vector<8x8xbf16>
    %cst_86 = arith.constant dense<0.000000e+00> : vector<8x8xf32>
    %209 = tpu.matmul %203, %208, %cst_86 {dimension_numbers = #tpu.dot_dimension_numbers<[1], [0], [0], [1], [0, 0, 1, 1], [], []>} : vector<8x8xbf16>, vector<8x8xbf16>, vector<8x8xf32> -> vector<8x8xf32>
    %cst_87 = arith.constant 0.000000e+00 : f32
    %210 = vector.broadcast %cst_87 : f32 to vector<1x8xf32>
    %211 = arith.cmpf oeq, %7, %210 : vector<1x8xf32>
    %cst_88 = arith.constant -1.000000e+10 : f32
    %212 = vector.shape_cast %211 : vector<1x8xi1> to vector<1x8xi1>
    %213 = vector.broadcast %212 : vector<1x8xi1> to vector<8x8xi1>
    %214 = vector.broadcast %cst_88 : f32 to vector<8x8xf32>
    %215 = arith.select %213, %214, %209 : vector<8x8xi1>, vector<8x8xf32>
    %cst_89 = arith.constant dense<0xFF800000> : vector<8xf32>
    %216 = vector.multi_reduction <maximumf>, %215, %cst_89 [1] : vector<8x8xf32> to vector<8xf32>
    %217 = vector.shape_cast %216 : vector<8xf32> to vector<8x1xf32>
    %218 = vector.broadcast %217 : vector<8x1xf32> to vector<8x8xf32>
    %219 = arith.subf %215, %218 : vector<8x8xf32>
    %220 = math.exp %219 : vector<8x8xf32>
    %cst_90 = arith.constant dense<0.000000e+00> : vector<8xf32>
    %221 = vector.multi_reduction <add>, %220, %cst_90 [1] : vector<8x8xf32> to vector<8xf32>
    %222 = vector.shape_cast %221 : vector<8xf32> to vector<8x1xf32>
    %223 = tpu.reciprocal %222 {approx = true} : vector<8x1xf32> -> vector<8x1xf32>
    %224 = vector.broadcast %223 : vector<8x1xf32> to vector<8x8xf32>
    %225 = arith.mulf %220, %224 : vector<8x8xf32>
    %226 = arith.truncf %225 : vector<8x8xf32> to vector<8x8xbf16>
    %cst_91 = arith.constant dense<0.000000e+00> : vector<8x8xf32>
    %227 = tpu.matmul %226, %207, %cst_91 {dimension_numbers = #tpu.dot_dimension_numbers<[1], [0], [0], [1], [0, 0, 1, 1], [], []>} : vector<8x8xbf16>, vector<8x8xbf16>, vector<8x8xf32> -> vector<8x8xf32>
    %c0_92 = arith.constant 0 : index
    %c8_93 = arith.constant 8 : index
    %228 = vector.load %arg22[%c0_92, %c8_93] : memref<8x32xf32, #tpu.memory_space<vmem>>, vector<8x8xf32>
    tpu.vector_store %arg22[%c0_92, %c8_93], %227 {strides = array<i32>} : memref<8x32xf32, #tpu.memory_space<vmem>>, vector<8x8xf32>,
    %229 = vector.extract_strided_slice %162 {offsets = [0, 16], sizes = [8, 8], strides = [1, 1]} : vector<8x32xf32> to vector<8x8xf32>
    %cst_94 = arith.constant 0.353553385 : f32
    %230 = vector.broadcast %cst_94 : f32 to vector<8x8xf32>
    %231 = arith.mulf %229, %230 : vector<8x8xf32>
    %232 = arith.truncf %231 : vector<8x8xf32> to vector<8x8xbf16>
    %233 = vector.extract_strided_slice %169 {offsets = [0, 16], sizes = [8, 8], strides = [1, 1]} : vector<8x32xf32> to vector<8x8xf32>
    %234 = arith.truncf %233 : vector<8x8xf32> to vector<8x8xbf16>
    %235 = vector.extract_strided_slice %170 {offsets = [0, 16], sizes = [8, 8], strides = [1, 1]} : vector<8x32xf32> to vector<8x8xf32>
    %236 = arith.truncf %235 : vector<8x8xf32> to vector<8x8xbf16>
    %237 = tpu.transpose %234, [1, 0] : vector<8x8xbf16> -> vector<8x8xbf16>
    %cst_95 = arith.constant dense<0.000000e+00> : vector<8x8xf32>
    %238 = tpu.matmul %232, %237, %cst_95 {dimension_numbers = #tpu.dot_dimension_numbers<[1], [0], [0], [1], [0, 0, 1, 1], [], []>} : vector<8x8xbf16>, vector<8x8xbf16>, vector<8x8xf32> -> vector<8x8xf32>
    %cst_96 = arith.constant 0.000000e+00 : f32
    %239 = vector.broadcast %cst_96 : f32 to vector<1x8xf32>
    %240 = arith.cmpf oeq, %7, %239 : vector<1x8xf32>
    %cst_97 = arith.constant -1.000000e+10 : f32
    %241 = vector.shape_cast %240 : vector<1x8xi1> to vector<1x8xi1>
    %242 = vector.broadcast %241 : vector<1x8xi1> to vector<8x8xi1>
    %243 = vector.broadcast %cst_97 : f32 to vector<8x8xf32>
    %244 = arith.select %242, %243, %238 : vector<8x8xi1>, vector<8x8xf32>
    %cst_98 = arith.constant dense<0xFF800000> : vector<8xf32>
    %245 = vector.multi_reduction <maximumf>, %244, %cst_98 [1] : vector<8x8xf32> to vector<8xf32>
    %246 = vector.shape_cast %245 : vector<8xf32> to vector<8x1xf32>
    %247 = vector.broadcast %246 : vector<8x1xf32> to vector<8x8xf32>
    %248 = arith.subf %244, %247 : vector<8x8xf32>
    %249 = math.exp %248 : vector<8x8xf32>
    %cst_99 = arith.constant dense<0.000000e+00> : vector<8xf32>
    %250 = vector.multi_reduction <add>, %249, %cst_99 [1] : vector<8x8xf32> to vector<8xf32>
    %251 = vector.shape_cast %250 : vector<8xf32> to vector<8x1xf32>
    %252 = tpu.reciprocal %251 {approx = true} : vector<8x1xf32> -> vector<8x1xf32>
    %253 = vector.broadcast %252 : vector<8x1xf32> to vector<8x8xf32>
    %254 = arith.mulf %249, %253 : vector<8x8xf32>
    %255 = arith.truncf %254 : vector<8x8xf32> to vector<8x8xbf16>
    %cst_100 = arith.constant dense<0.000000e+00> : vector<8x8xf32>
    %256 = tpu.matmul %255, %236, %cst_100 {dimension_numbers = #tpu.dot_dimension_numbers<[1], [0], [0], [1], [0, 0, 1, 1], [], []>} : vector<8x8xbf16>, vector<8x8xbf16>, vector<8x8xf32> -> vector<8x8xf32>
    %c0_101 = arith.constant 0 : index
    %c16_102 = arith.constant 16 : index
    %257 = vector.load %arg22[%c0_101, %c16_102] : memref<8x32xf32, #tpu.memory_space<vmem>>, vector<8x8xf32>
    tpu.vector_store %arg22[%c0_101, %c16_102], %256 {strides = array<i32>} : memref<8x32xf32, #tpu.memory_space<vmem>>, vector<8x8xf32>,
    %258 = vector.extract_strided_slice %162 {offsets = [0, 24], sizes = [8, 8], strides = [1, 1]} : vector<8x32xf32> to vector<8x8xf32>
    %cst_103 = arith.constant 0.353553385 : f32
    %259 = vector.broadcast %cst_103 : f32 to vector<8x8xf32>
    %260 = arith.mulf %258, %259 : vector<8x8xf32>
    %261 = arith.truncf %260 : vector<8x8xf32> to vector<8x8xbf16>
    %262 = vector.extract_strided_slice %169 {offsets = [0, 24], sizes = [8, 8], strides = [1, 1]} : vector<8x32xf32> to vector<8x8xf32>
    %263 = arith.truncf %262 : vector<8x8xf32> to vector<8x8xbf16>
    %264 = vector.extract_strided_slice %170 {offsets = [0, 24], sizes = [8, 8], strides = [1, 1]} : vector<8x32xf32> to vector<8x8xf32>
    %265 = arith.truncf %264 : vector<8x8xf32> to vector<8x8xbf16>
    %266 = tpu.transpose %263, [1, 0] : vector<8x8xbf16> -> vector<8x8xbf16>
    %cst_104 = arith.constant dense<0.000000e+00> : vector<8x8xf32>
    %267 = tpu.matmul %261, %266, %cst_104 {dimension_numbers = #tpu.dot_dimension_numbers<[1], [0], [0], [1], [0, 0, 1, 1], [], []>} : vector<8x8xbf16>, vector<8x8xbf16>, vector<8x8xf32> -> vector<8x8xf32>
    %cst_105 = arith.constant 0.000000e+00 : f32
    %268 = vector.broadcast %cst_105 : f32 to vector<1x8xf32>
    %269 = arith.cmpf oeq, %7, %268 : vector<1x8xf32>
    %cst_106 = arith.constant -1.000000e+10 : f32
    %270 = vector.shape_cast %269 : vector<1x8xi1> to vector<1x8xi1>
    %271 = vector.broadcast %270 : vector<1x8xi1> to vector<8x8xi1>
    %272 = vector.broadcast %cst_106 : f32 to vector<8x8xf32>
    %273 = arith.select %271, %272, %267 : vector<8x8xi1>, vector<8x8xf32>
    %cst_107 = arith.constant dense<0xFF800000> : vector<8xf32>
    %274 = vector.multi_reduction <maximumf>, %273, %cst_107 [1] : vector<8x8xf32> to vector<8xf32>
    %275 = vector.shape_cast %274 : vector<8xf32> to vector<8x1xf32>
    %276 = vector.broadcast %275 : vector<8x1xf32> to vector<8x8xf32>
    %277 = arith.subf %273, %276 : vector<8x8xf32>
    %278 = math.exp %277 : vector<8x8xf32>
    %cst_108 = arith.constant dense<0.000000e+00> : vector<8xf32>
    %279 = vector.multi_reduction <add>, %278, %cst_108 [1] : vector<8x8xf32> to vector<8xf32>
    %280 = vector.shape_cast %279 : vector<8xf32> to vector<8x1xf32>
    %281 = tpu.reciprocal %280 {approx = true} : vector<8x1xf32> -> vector<8x1xf32>
    %282 = vector.broadcast %281 : vector<8x1xf32> to vector<8x8xf32>
    %283 = arith.mulf %278, %282 : vector<8x8xf32>
    %284 = arith.truncf %283 : vector<8x8xf32> to vector<8x8xbf16>
    %cst_109 = arith.constant dense<0.000000e+00> : vector<8x8xf32>
    %285 = tpu.matmul %284, %265, %cst_109 {dimension_numbers = #tpu.dot_dimension_numbers<[1], [0], [0], [1], [0, 0, 1, 1], [], []>} : vector<8x8xbf16>, vector<8x8xbf16>, vector<8x8xf32> -> vector<8x8xf32>
    %c0_110 = arith.constant 0 : index
    %c24_111 = arith.constant 24 : index
    %286 = vector.load %arg22[%c0_110, %c24_111] : memref<8x32xf32, #tpu.memory_space<vmem>>, vector<8x8xf32>
    tpu.vector_store %arg22[%c0_110, %c24_111], %285 {strides = array<i32>} : memref<8x32xf32, #tpu.memory_space<vmem>>, vector<8x8xf32>,
    %c0_112 = arith.constant 0 : index
    %c0_113 = arith.constant 0 : index
    %287 = vector.load %arg22[%c0_112, %c0_113] : memref<8x32xf32, #tpu.memory_space<vmem>>, vector<8x32xf32>
    %288 = arith.truncf %287 : vector<8x32xf32> to vector<8x32xbf16>
    %c0_114 = arith.constant 0 : index
    %c0_115 = arith.constant 0 : index
    %289 = vector.load %arg13[%c0_114, %c0_115] : memref<32x32xbf16, #tpu.memory_space<vmem>>, vector<32x32xbf16>
    %cst_116 = arith.constant dense<0.000000e+00> : vector<8x32xf32>
    %290 = tpu.matmul %288, %289, %cst_116 {dimension_numbers = #tpu.dot_dimension_numbers<[1], [0], [0], [1], [0, 0, 1, 1], [], []>} : vector<8x32xbf16>, vector<32x32xbf16>, vector<8x32xf32> -> vector<8x32xf32>
    %c0_117 = arith.constant 0 : index
    %c0_118 = arith.constant 0 : index
    %291 = vector.load %arg14[%c0_117, %c0_118] : memref<1x32xf32, #tpu.memory_space<vmem>>, vector<1x32xf32>
    %292 = vector.broadcast %291 : vector<1x32xf32> to vector<8x32xf32>
    %293 = arith.addf %290, %292 : vector<8x32xf32>
    %294 = arith.addf %156, %293 : vector<8x32xf32>
    %c1 = arith.constant 1 : index
    %c0_119 = arith.constant 0 : index
    %295 = vector.load %arg19[%c1, %c0_119] : memref<3x32xf32, #tpu.memory_space<vmem>>, vector<1x32xf32>
    %c1_120 = arith.constant 1 : index
    %c0_121 = arith.constant 0 : index
    %296 = vector.load %arg20[%c1_120, %c0_121] : memref<3x32xf32, #tpu.memory_space<vmem>>, vector<1x32xf32>
    %cst_122 = arith.constant dense<0.000000e+00> : vector<8xf32>
    %297 = vector.multi_reduction <add>, %294, %cst_122 [1] : vector<8x32xf32> to vector<8xf32>
    %298 = vector.shape_cast %297 : vector<8xf32> to vector<8x1xf32>
    %cst_123 = arith.constant 3.200000e+01 : f32
    %299 = vector.broadcast %cst_123 : f32 to vector<8x1xf32>
    %300 = arith.divf %298, %299 : vector<8x1xf32>
    %301 = vector.broadcast %300 : vector<8x1xf32> to vector<8x32xf32>
    %302 = arith.subf %294, %301 : vector<8x32xf32>
    %303 = arith.mulf %302, %302 : vector<8x32xf32>
    %cst_124 = arith.constant dense<0.000000e+00> : vector<8xf32>
    %304 = vector.multi_reduction <add>, %303, %cst_124 [1] : vector<8x32xf32> to vector<8xf32>
    %305 = vector.shape_cast %304 : vector<8xf32> to vector<8x1xf32>
    %cst_125 = arith.constant 3.200000e+01 : f32
    %306 = vector.broadcast %cst_125 : f32 to vector<8x1xf32>
    %307 = arith.divf %305, %306 : vector<8x1xf32>
    %308 = vector.broadcast %300 : vector<8x1xf32> to vector<8x32xf32>
    %309 = arith.subf %294, %308 : vector<8x32xf32>
    %cst_126 = arith.constant 9.99999974E-6 : f32
    %310 = vector.broadcast %cst_126 : f32 to vector<8x1xf32>
    %311 = arith.addf %307, %310 : vector<8x1xf32>
    %312 = math.rsqrt %311 : vector<8x1xf32>
    %313 = vector.broadcast %312 : vector<8x1xf32> to vector<8x32xf32>
    %314 = arith.mulf %309, %313 : vector<8x32xf32>
    %315 = vector.broadcast %295 : vector<1x32xf32> to vector<8x32xf32>
    %316 = arith.mulf %314, %315 : vector<8x32xf32>
    %317 = vector.broadcast %296 : vector<1x32xf32> to vector<8x32xf32>
    %318 = arith.addf %316, %317 : vector<8x32xf32>
    %319 = arith.truncf %318 : vector<8x32xf32> to vector<8x32xbf16>
    %c0_127 = arith.constant 0 : index
    %c0_128 = arith.constant 0 : index
    %320 = vector.load %arg15[%c0_127, %c0_128] : memref<32x64xbf16, #tpu.memory_space<vmem>>, vector<32x64xbf16>
    %cst_129 = arith.constant dense<0.000000e+00> : vector<8x64xf32>
    %321 = tpu.matmul %319, %320, %cst_129 {dimension_numbers = #tpu.dot_dimension_numbers<[1], [0], [0], [1], [0, 0, 1, 1], [], []>} : vector<8x32xbf16>, vector<32x64xbf16>, vector<8x64xf32> -> vector<8x64xf32>
    %c0_130 = arith.constant 0 : index
    %c0_131 = arith.constant 0 : index
    %322 = vector.load %arg16[%c0_130, %c0_131] : memref<1x64xf32, #tpu.memory_space<vmem>>, vector<1x64xf32>
    %323 = vector.broadcast %322 : vector<1x64xf32> to vector<8x64xf32>
    %324 = arith.addf %321, %323 : vector<8x64xf32>
    %cst_132 = arith.constant 0.000000e+00 : f32
    %325 = vector.broadcast %cst_132 : f32 to vector<8x64xf32>
    %326 = arith.maximumf %324, %325 : vector<8x64xf32>
    %327 = arith.truncf %326 : vector<8x64xf32> to vector<8x64xbf16>
    %c0_133 = arith.constant 0 : index
    %c0_134 = arith.constant 0 : index
    %328 = vector.load %arg17[%c0_133, %c0_134] : memref<64x32xbf16, #tpu.memory_space<vmem>>, vector<64x32xbf16>
    %cst_135 = arith.constant dense<0.000000e+00> : vector<8x32xf32>
    %329 = tpu.matmul %327, %328, %cst_135 {dimension_numbers = #tpu.dot_dimension_numbers<[1], [0], [0], [1], [0, 0, 1, 1], [], []>} : vector<8x64xbf16>, vector<64x32xbf16>, vector<8x32xf32> -> vector<8x32xf32>
    %c0_136 = arith.constant 0 : index
    %c0_137 = arith.constant 0 : index
    %330 = vector.load %arg18[%c0_136, %c0_137] : memref<1x32xf32, #tpu.memory_space<vmem>>, vector<1x32xf32>
    %331 = vector.broadcast %330 : vector<1x32xf32> to vector<8x32xf32>
    %332 = arith.addf %329, %331 : vector<8x32xf32>
    %333 = arith.addf %318, %332 : vector<8x32xf32>
    %c2 = arith.constant 2 : index
    %c0_138 = arith.constant 0 : index
    %334 = vector.load %arg19[%c2, %c0_138] : memref<3x32xf32, #tpu.memory_space<vmem>>, vector<1x32xf32>
    %c2_139 = arith.constant 2 : index
    %c0_140 = arith.constant 0 : index
    %335 = vector.load %arg20[%c2_139, %c0_140] : memref<3x32xf32, #tpu.memory_space<vmem>>, vector<1x32xf32>
    %cst_141 = arith.constant dense<0.000000e+00> : vector<8xf32>
    %336 = vector.multi_reduction <add>, %333, %cst_141 [1] : vector<8x32xf32> to vector<8xf32>
    %337 = vector.shape_cast %336 : vector<8xf32> to vector<8x1xf32>
    %cst_142 = arith.constant 3.200000e+01 : f32
    %338 = vector.broadcast %cst_142 : f32 to vector<8x1xf32>
    %339 = arith.divf %337, %338 : vector<8x1xf32>
    %340 = vector.broadcast %339 : vector<8x1xf32> to vector<8x32xf32>
    %341 = arith.subf %333, %340 : vector<8x32xf32>
    %342 = arith.mulf %341, %341 : vector<8x32xf32>
    %cst_143 = arith.constant dense<0.000000e+00> : vector<8xf32>
    %343 = vector.multi_reduction <add>, %342, %cst_143 [1] : vector<8x32xf32> to vector<8xf32>
    %344 = vector.shape_cast %343 : vector<8xf32> to vector<8x1xf32>
    %cst_144 = arith.constant 3.200000e+01 : f32
    %345 = vector.broadcast %cst_144 : f32 to vector<8x1xf32>
    %346 = arith.divf %344, %345 : vector<8x1xf32>
    %347 = vector.broadcast %339 : vector<8x1xf32> to vector<8x32xf32>
    %348 = arith.subf %333, %347 : vector<8x32xf32>
    %cst_145 = arith.constant 9.99999974E-6 : f32
    %349 = vector.broadcast %cst_145 : f32 to vector<8x1xf32>
    %350 = arith.addf %346, %349 : vector<8x1xf32>
    %351 = math.rsqrt %350 : vector<8x1xf32>
    %352 = vector.broadcast %351 : vector<8x1xf32> to vector<8x32xf32>
    %353 = arith.mulf %348, %352 : vector<8x32xf32>
    %354 = vector.broadcast %334 : vector<1x32xf32> to vector<8x32xf32>
    %355 = arith.mulf %353, %354 : vector<8x32xf32>
    %356 = vector.broadcast %335 : vector<1x32xf32> to vector<8x32xf32>
    %357 = arith.addf %355, %356 : vector<8x32xf32>
    %c0_146 = arith.constant 0 : index
    %c0_147 = arith.constant 0 : index
    %c0_148 = arith.constant 0 : index
    %358 = vector.load %arg21[%c0_146, %c0_147, %c0_148] : memref<1x8x32xf32, #tpu.memory_space<vmem>>, vector<1x8x32xf32>
    %359 = vector.shape_cast %358 : vector<1x8x32xf32> to vector<8x32xf32>
    %360 = vector.shape_cast %357 : vector<8x32xf32> to vector<1x8x32xf32>
    tpu.vector_store %arg21[%c0_146, %c0_147, %c0_148], %360 {strides = array<i32>} : memref<1x8x32xf32, #tpu.memory_space<vmem>>, vector<1x8x32xf32>,
    return
  }
  func.func @transform_0(%arg0: i32) -> (i32, i32, i32) {
    %c0_i32 = arith.constant 0 : i32
    %c0_i32_0 = arith.constant 0 : i32
    %c0_i32_1 = arith.constant 0 : i32
    return %arg0, %c0_i32, %c0_i32_0 : i32, i32, i32
  }
  func.func @transform_1(%arg0: i32) -> (i32, i32, i32) {
    %c0_i32 = arith.constant 0 : i32
    %c0_i32_0 = arith.constant 0 : i32
    %c0_i32_1 = arith.constant 0 : i32
    return %arg0, %c0_i32, %c0_i32_0 : i32, i32, i32
  }
  func.func @transform_2(%arg0: i32) -> (i32, i32, i32, i32) {
    %c0_i32 = arith.constant 0 : i32
    %c0_i32_0 = arith.constant 0 : i32
    %c0_i32_1 = arith.constant 0 : i32
    %c0_i32_2 = arith.constant 0 : i32
    return %arg0, %c0_i32, %c0_i32_0, %c0_i32_1 : i32, i32, i32, i32
  }
  func.func @transform_3(%arg0: i32) -> (i32, i32, i32, i32) {
    %c0_i32 = arith.constant 0 : i32
    %c0_i32_0 = arith.constant 0 : i32
    %c0_i32_1 = arith.constant 0 : i32
    %c0_i32_2 = arith.constant 0 : i32
    return %arg0, %c0_i32, %c0_i32_0, %c0_i32_1 : i32, i32, i32, i32
  }
  func.func @transform_4(%arg0: i32) -> (i32, i32) {
    %c0_i32 = arith.constant 0 : i32
    %c0_i32_0 = arith.constant 0 : i32
    %c0_i32_1 = arith.constant 0 : i32
    return %c0_i32, %c0_i32_0 : i32, i32
  }
  func.func @transform_5(%arg0: i32) -> (i32, i32) {
    %c0_i32 = arith.constant 0 : i32
    %c0_i32_0 = arith.constant 0 : i32
    %c0_i32_1 = arith.constant 0 : i32
    return %c0_i32, %c0_i32_0 : i32, i32
  }
  func.func @transform_6(%arg0: i32) -> (i32, i32) {
    %c0_i32 = arith.constant 0 : i32
    %c0_i32_0 = arith.constant 0 : i32
    %c0_i32_1 = arith.constant 0 : i32
    return %c0_i32, %c0_i32_0 : i32, i32
  }
  func.func @transform_7(%arg0: i32) -> (i32, i32) {
    %c0_i32 = arith.constant 0 : i32
    %c0_i32_0 = arith.constant 0 : i32
    %c0_i32_1 = arith.constant 0 : i32
    return %c0_i32, %c0_i32_0 : i32, i32
  }
  func.func @transform_8(%arg0: i32) -> (i32, i32) {
    %c0_i32 = arith.constant 0 : i32
    %c0_i32_0 = arith.constant 0 : i32
    %c0_i32_1 = arith.constant 0 : i32
    return %c0_i32, %c0_i32_0 : i32, i32
  }
  func.func @transform_9(%arg0: i32) -> (i32, i32) {
    %c0_i32 = arith.constant 0 : i32
    %c0_i32_0 = arith.constant 0 : i32
    %c0_i32_1 = arith.constant 0 : i32
    return %c0_i32, %c0_i32_0 : i32, i32
  }
  func.func @transform_10(%arg0: i32) -> (i32, i32) {
    %c0_i32 = arith.constant 0 : i32
    %c0_i32_0 = arith.constant 0 : i32
    %c0_i32_1 = arith.constant 0 : i32
    return %c0_i32, %c0_i32_0 : i32, i32
  }
  func.func @transform_11(%arg0: i32) -> (i32, i32) {
    %c0_i32 = arith.constant 0 : i32
    %c0_i32_0 = arith.constant 0 : i32
    %c0_i32_1 = arith.constant 0 : i32
    return %c0_i32, %c0_i32_0 : i32, i32
  }
  func.func @transform_12(%arg0: i32) -> (i32, i32) {
    %c0_i32 = arith.constant 0 : i32
    %c0_i32_0 = arith.constant 0 : i32
    %c0_i32_1 = arith.constant 0 : i32
    return %c0_i32, %c0_i32_0 : i32, i32
  }
  func.func @transform_13(%arg0: i32) -> (i32, i32) {
    %c0_i32 = arith.constant 0 : i32
    %c0_i32_0 = arith.constant 0 : i32
    %c0_i32_1 = arith.constant 0 : i32
    return %c0_i32, %c0_i32_0 : i32, i32
  }
  func.func @transform_14(%arg0: i32) -> (i32, i32) {
    %c0_i32 = arith.constant 0 : i32
    %c0_i32_0 = arith.constant 0 : i32
    %c0_i32_1 = arith.constant 0 : i32
    return %c0_i32, %c0_i32_0 : i32, i32
  }
  func.func @transform_15(%arg0: i32) -> (i32, i32) {
    %c0_i32 = arith.constant 0 : i32
    %c0_i32_0 = arith.constant 0 : i32
    %c0_i32_1 = arith.constant 0 : i32
    return %c0_i32, %c0_i32_0 : i32, i32
  }
  func.func @transform_16(%arg0: i32) -> (i32, i32) {
    %c0_i32 = arith.constant 0 : i32
    %c0_i32_0 = arith.constant 0 : i32
    %c0_i32_1 = arith.constant 0 : i32
    return %c0_i32, %c0_i32_0 : i32, i32
  }
  func.func @transform_17(%arg0: i32) -> (i32, i32) {
    %c0_i32 = arith.constant 0 : i32
    %c0_i32_0 = arith.constant 0 : i32
    %c0_i32_1 = arith.constant 0 : i32
    return %c0_i32, %c0_i32_0 : i32, i32
  }
  func.func @transform_18(%arg0: i32) -> (i32, i32) {
    %c0_i32 = arith.constant 0 : i32
    %c0_i32_0 = arith.constant 0 : i32
    %c0_i32_1 = arith.constant 0 : i32
    return %c0_i32, %c0_i32_0 : i32, i32
  }
  func.func @transform_19(%arg0: i32) -> (i32, i32) {
    %c0_i32 = arith.constant 0 : i32
    %c0_i32_0 = arith.constant 0 : i32
    %c0_i32_1 = arith.constant 0 : i32
    return %c0_i32, %c0_i32_0 : i32, i32
  }
  func.func @transform_20(%arg0: i32) -> (i32, i32, i32) {
    %c0_i32 = arith.constant 0 : i32
    %c0_i32_0 = arith.constant 0 : i32
    %c0_i32_1 = arith.constant 0 : i32
    return %arg0, %c0_i32, %c0_i32_0 : i32, i32, i32
  }
}

module attributes {stable_mosaic.version = 11 : i64} {
  func.func @_layer_kernel(%arg0: i32, %arg1: memref<1x8x32xf32, #tpu.memory_space<vmem>>, %arg2: memref<1x8x32xf32, #tpu.memory_space<vmem>>, %arg3: memref<1x1x8x8xf32, #tpu.memory_space<vmem>>, %arg4: memref<1x1x1x8xf32, #tpu.memory_space<vmem>>, %arg5: memref<32x96xbf16, #tpu.memory_space<vmem>>, %arg6: memref<1x96xf32, #tpu.memory_space<vmem>>, %arg7: memref<32x32xbf16, #tpu.memory_space<vmem>>, %arg8: memref<1x32xf32, #tpu.memory_space<vmem>>, %arg9: memref<32x32xbf16, #tpu.memory_space<vmem>>, %arg10: memref<1x32xf32, #tpu.memory_space<vmem>>, %arg11: memref<32x64xbf16, #tpu.memory_space<vmem>>, %arg12: memref<1x64xf32, #tpu.memory_space<vmem>>, %arg13: memref<32x32xbf16, #tpu.memory_space<vmem>>, %arg14: memref<1x32xf32, #tpu.memory_space<vmem>>, %arg15: memref<32x64xbf16, #tpu.memory_space<vmem>>, %arg16: memref<1x64xf32, #tpu.memory_space<vmem>>, %arg17: memref<64x32xbf16, #tpu.memory_space<vmem>>, %arg18: memref<1x32xf32, #tpu.memory_space<vmem>>, %arg19: memref<3x32xf32, #tpu.memory_space<vmem>>, %arg20: memref<3x32xf32, #tpu.memory_space<vmem>>, %arg21: memref<1x8x32xf32, #tpu.memory_space<vmem>>, %arg22: memref<1x4x8x8xf32, #tpu.memory_space<vmem>>, %arg23: memref<8x32xf32, #tpu.memory_space<vmem>>) attributes {dimension_semantics = [#tpu.dimension_semantics<parallel>], iteration_bounds = array<i64: 2>, scalar_prefetch = 0 : i64, scratch_operands = 1 : i64, tpu.core_type = #tpu.core_type<tc>, window_params = [{transform_indices = @transform_0, window_bounds = array<i64: 1, 8, 32>}, {transform_indices = @transform_1, window_bounds = array<i64: 1, 8, 32>}, {transform_indices = @transform_2, window_bounds = array<i64: 1, 1, 8, 8>}, {transform_indices = @transform_3, window_bounds = array<i64: 1, 1, 1, 8>}, {pipeline_mode = #tpu.pipeline_mode<synchronous>, transform_indices = @transform_4, window_bounds = array<i64: 32, 96>}, {pipeline_mode = #tpu.pipeline_mode<synchronous>, transform_indices = @transform_5, window_bounds = array<i64: 1, 96>}, {pipeline_mode = #tpu.pipeline_mode<synchronous>, transform_indices = @transform_6, window_bounds = array<i64: 32, 32>}, {pipeline_mode = #tpu.pipeline_mode<synchronous>, transform_indices = @transform_7, window_bounds = array<i64: 1, 32>}, {pipeline_mode = #tpu.pipeline_mode<synchronous>, transform_indices = @transform_8, window_bounds = array<i64: 32, 32>}, {pipeline_mode = #tpu.pipeline_mode<synchronous>, transform_indices = @transform_9, window_bounds = array<i64: 1, 32>}, {pipeline_mode = #tpu.pipeline_mode<synchronous>, transform_indices = @transform_10, window_bounds = array<i64: 32, 64>}, {pipeline_mode = #tpu.pipeline_mode<synchronous>, transform_indices = @transform_11, window_bounds = array<i64: 1, 64>}, {pipeline_mode = #tpu.pipeline_mode<synchronous>, transform_indices = @transform_12, window_bounds = array<i64: 32, 32>}, {pipeline_mode = #tpu.pipeline_mode<synchronous>, transform_indices = @transform_13, window_bounds = array<i64: 1, 32>}, {pipeline_mode = #tpu.pipeline_mode<synchronous>, transform_indices = @transform_14, window_bounds = array<i64: 32, 64>}, {pipeline_mode = #tpu.pipeline_mode<synchronous>, transform_indices = @transform_15, window_bounds = array<i64: 1, 64>}, {pipeline_mode = #tpu.pipeline_mode<synchronous>, transform_indices = @transform_16, window_bounds = array<i64: 64, 32>}, {pipeline_mode = #tpu.pipeline_mode<synchronous>, transform_indices = @transform_17, window_bounds = array<i64: 1, 32>}, {pipeline_mode = #tpu.pipeline_mode<synchronous>, transform_indices = @transform_18, window_bounds = array<i64: 3, 32>}, {pipeline_mode = #tpu.pipeline_mode<synchronous>, transform_indices = @transform_19, window_bounds = array<i64: 3, 32>}, {transform_indices = @transform_20, window_bounds = array<i64: 1, 8, 32>}, {transform_indices = @transform_21, window_bounds = array<i64: 1, 4, 8, 8>}]} {
    %c0 = arith.constant 0 : index
    %c0_0 = arith.constant 0 : index
    %c0_1 = arith.constant 0 : index
    %0 = vector.load %arg1[%c0, %c0_0, %c0_1] : memref<1x8x32xf32, #tpu.memory_space<vmem>>, vector<1x8x32xf32>
    %1 = vector.shape_cast %0 : vector<1x8x32xf32> to vector<8x32xf32>
    %c0_2 = arith.constant 0 : index
    %c0_3 = arith.constant 0 : index
    %c0_4 = arith.constant 0 : index
    %2 = vector.load %arg2[%c0_2, %c0_3, %c0_4] : memref<1x8x32xf32, #tpu.memory_space<vmem>>, vector<1x8x32xf32>
    %3 = vector.shape_cast %2 : vector<1x8x32xf32> to vector<8x32xf32>
    %c0_5 = arith.constant 0 : index
    %c0_6 = arith.constant 0 : index
    %c0_7 = arith.constant 0 : index
    %c0_8 = arith.constant 0 : index
    %4 = vector.load %arg3[%c0_5, %c0_6, %c0_7, %c0_8] : memref<1x1x8x8xf32, #tpu.memory_space<vmem>>, vector<1x1x8x8xf32>
    %5 = vector.shape_cast %4 : vector<1x1x8x8xf32> to vector<8x8xf32>
    %c0_9 = arith.constant 0 : index
    %c0_10 = arith.constant 0 : index
    %c0_11 = arith.constant 0 : index
    %c0_12 = arith.constant 0 : index
    %6 = vector.load %arg4[%c0_9, %c0_10, %c0_11, %c0_12] : memref<1x1x1x8xf32, #tpu.memory_space<vmem>>, vector<1x1x1x8xf32>
    %7 = vector.shape_cast %6 : vector<1x1x1x8xf32> to vector<1x8xf32>
    %8 = arith.truncf %1 : vector<8x32xf32> to vector<8x32xbf16>
    %c0_13 = arith.constant 0 : index
    %c0_14 = arith.constant 0 : index
    %9 = vector.load %arg5[%c0_13, %c0_14] : memref<32x96xbf16, #tpu.memory_space<vmem>>, vector<32x96xbf16>
    %cst = arith.constant dense<0.000000e+00> : vector<8x96xf32>
    %10 = tpu.matmul %8, %9, %cst {dimension_numbers = #tpu.dot_dimension_numbers<[1], [0], [0], [1], [0, 0, 1, 1], [], []>} : vector<8x32xbf16>, vector<32x96xbf16>, vector<8x96xf32> -> vector<8x96xf32>
    %c0_15 = arith.constant 0 : index
    %c0_16 = arith.constant 0 : index
    %11 = vector.load %arg6[%c0_15, %c0_16] : memref<1x96xf32, #tpu.memory_space<vmem>>, vector<1x96xf32>
    %12 = vector.broadcast %11 : vector<1x96xf32> to vector<8x96xf32>
    %13 = arith.addf %10, %12 : vector<8x96xf32>
    %14 = vector.extract_strided_slice %13 {offsets = [0, 0], sizes = [8, 32], strides = [1, 1]} : vector<8x96xf32> to vector<8x32xf32>
    %15 = vector.extract_strided_slice %13 {offsets = [0, 32], sizes = [8, 32], strides = [1, 1]} : vector<8x96xf32> to vector<8x32xf32>
    %16 = vector.extract_strided_slice %13 {offsets = [0, 64], sizes = [8, 32], strides = [1, 1]} : vector<8x96xf32> to vector<8x32xf32>
    %17 = vector.extract_strided_slice %14 {offsets = [0, 0], sizes = [8, 8], strides = [1, 1]} : vector<8x32xf32> to vector<8x8xf32>
    %cst_17 = arith.constant 0.353553385 : f32
    %18 = vector.broadcast %cst_17 : f32 to vector<8x8xf32>
    %19 = arith.mulf %17, %18 : vector<8x8xf32>
    %20 = arith.truncf %19 : vector<8x8xf32> to vector<8x8xbf16>
    %21 = vector.extract_strided_slice %15 {offsets = [0, 0], sizes = [8, 8], strides = [1, 1]} : vector<8x32xf32> to vector<8x8xf32>
    %22 = arith.truncf %21 : vector<8x8xf32> to vector<8x8xbf16>
    %23 = vector.extract_strided_slice %16 {offsets = [0, 0], sizes = [8, 8], strides = [1, 1]} : vector<8x32xf32> to vector<8x8xf32>
    %24 = arith.truncf %23 : vector<8x8xf32> to vector<8x8xbf16>
    %25 = tpu.transpose %22, [1, 0] : vector<8x8xbf16> -> vector<8x8xbf16>
    %cst_18 = arith.constant dense<0.000000e+00> : vector<8x8xf32>
    %26 = tpu.matmul %20, %25, %cst_18 {dimension_numbers = #tpu.dot_dimension_numbers<[1], [0], [0], [1], [0, 0, 1, 1], [], []>} : vector<8x8xbf16>, vector<8x8xbf16>, vector<8x8xf32> -> vector<8x8xf32>
    %cst_19 = arith.constant 0.000000e+00 : f32
    %27 = vector.broadcast %cst_19 : f32 to vector<8x8xf32>
    %28 = arith.cmpf oeq, %5, %27 : vector<8x8xf32>
    %cst_20 = arith.constant -1.000000e+10 : f32
    %29 = vector.broadcast %cst_20 : f32 to vector<8x8xf32>
    %30 = arith.select %28, %29, %26 : vector<8x8xi1>, vector<8x8xf32>
    %cst_21 = arith.constant dense<0xFF800000> : vector<8xf32>
    %31 = vector.multi_reduction <maximumf>, %30, %cst_21 [1] : vector<8x8xf32> to vector<8xf32>
    %32 = vector.shape_cast %31 : vector<8xf32> to vector<8x1xf32>
    %33 = vector.broadcast %32 : vector<8x1xf32> to vector<8x8xf32>
    %34 = arith.subf %30, %33 : vector<8x8xf32>
    %35 = math.exp %34 : vector<8x8xf32>
    %cst_22 = arith.constant dense<0.000000e+00> : vector<8xf32>
    %36 = vector.multi_reduction <add>, %35, %cst_22 [1] : vector<8x8xf32> to vector<8xf32>
    %37 = vector.shape_cast %36 : vector<8xf32> to vector<8x1xf32>
    %38 = tpu.reciprocal %37 {approx = true} : vector<8x1xf32> -> vector<8x1xf32>
    %39 = vector.broadcast %38 : vector<8x1xf32> to vector<8x8xf32>
    %40 = arith.mulf %35, %39 : vector<8x8xf32>
    %41 = arith.truncf %40 : vector<8x8xf32> to vector<8x8xbf16>
    %cst_23 = arith.constant dense<0.000000e+00> : vector<8x8xf32>
    %42 = tpu.matmul %41, %24, %cst_23 {dimension_numbers = #tpu.dot_dimension_numbers<[1], [0], [0], [1], [0, 0, 1, 1], [], []>} : vector<8x8xbf16>, vector<8x8xbf16>, vector<8x8xf32> -> vector<8x8xf32>
    %c0_24 = arith.constant 0 : index
    %c0_25 = arith.constant 0 : index
    %43 = vector.load %arg23[%c0_24, %c0_25] : memref<8x32xf32, #tpu.memory_space<vmem>>, vector<8x8xf32>
    tpu.vector_store %arg23[%c0_24, %c0_25], %42 {strides = array<i32>} : memref<8x32xf32, #tpu.memory_space<vmem>>, vector<8x8xf32>,
    %44 = vector.extract_strided_slice %14 {offsets = [0, 8], sizes = [8, 8], strides = [1, 1]} : vector<8x32xf32> to vector<8x8xf32>
    %cst_26 = arith.constant 0.353553385 : f32
    %45 = vector.broadcast %cst_26 : f32 to vector<8x8xf32>
    %46 = arith.mulf %44, %45 : vector<8x8xf32>
    %47 = arith.truncf %46 : vector<8x8xf32> to vector<8x8xbf16>
    %48 = vector.extract_strided_slice %15 {offsets = [0, 8], sizes = [8, 8], strides = [1, 1]} : vector<8x32xf32> to vector<8x8xf32>
    %49 = arith.truncf %48 : vector<8x8xf32> to vector<8x8xbf16>
    %50 = vector.extract_strided_slice %16 {offsets = [0, 8], sizes = [8, 8], strides = [1, 1]} : vector<8x32xf32> to vector<8x8xf32>
    %51 = arith.truncf %50 : vector<8x8xf32> to vector<8x8xbf16>
    %52 = tpu.transpose %49, [1, 0] : vector<8x8xbf16> -> vector<8x8xbf16>
    %cst_27 = arith.constant dense<0.000000e+00> : vector<8x8xf32>
    %53 = tpu.matmul %47, %52, %cst_27 {dimension_numbers = #tpu.dot_dimension_numbers<[1], [0], [0], [1], [0, 0, 1, 1], [], []>} : vector<8x8xbf16>, vector<8x8xbf16>, vector<8x8xf32> -> vector<8x8xf32>
    %cst_28 = arith.constant 0.000000e+00 : f32
    %54 = vector.broadcast %cst_28 : f32 to vector<8x8xf32>
    %55 = arith.cmpf oeq, %5, %54 : vector<8x8xf32>
    %cst_29 = arith.constant -1.000000e+10 : f32
    %56 = vector.broadcast %cst_29 : f32 to vector<8x8xf32>
    %57 = arith.select %55, %56, %53 : vector<8x8xi1>, vector<8x8xf32>
    %cst_30 = arith.constant dense<0xFF800000> : vector<8xf32>
    %58 = vector.multi_reduction <maximumf>, %57, %cst_30 [1] : vector<8x8xf32> to vector<8xf32>
    %59 = vector.shape_cast %58 : vector<8xf32> to vector<8x1xf32>
    %60 = vector.broadcast %59 : vector<8x1xf32> to vector<8x8xf32>
    %61 = arith.subf %57, %60 : vector<8x8xf32>
    %62 = math.exp %61 : vector<8x8xf32>
    %cst_31 = arith.constant dense<0.000000e+00> : vector<8xf32>
    %63 = vector.multi_reduction <add>, %62, %cst_31 [1] : vector<8x8xf32> to vector<8xf32>
    %64 = vector.shape_cast %63 : vector<8xf32> to vector<8x1xf32>
    %65 = tpu.reciprocal %64 {approx = true} : vector<8x1xf32> -> vector<8x1xf32>
    %66 = vector.broadcast %65 : vector<8x1xf32> to vector<8x8xf32>
    %67 = arith.mulf %62, %66 : vector<8x8xf32>
    %68 = arith.truncf %67 : vector<8x8xf32> to vector<8x8xbf16>
    %cst_32 = arith.constant dense<0.000000e+00> : vector<8x8xf32>
    %69 = tpu.matmul %68, %51, %cst_32 {dimension_numbers = #tpu.dot_dimension_numbers<[1], [0], [0], [1], [0, 0, 1, 1], [], []>} : vector<8x8xbf16>, vector<8x8xbf16>, vector<8x8xf32> -> vector<8x8xf32>
    %c0_33 = arith.constant 0 : index
    %c8 = arith.constant 8 : index
    %70 = vector.load %arg23[%c0_33, %c8] : memref<8x32xf32, #tpu.memory_space<vmem>>, vector<8x8xf32>
    tpu.vector_store %arg23[%c0_33, %c8], %69 {strides = array<i32>} : memref<8x32xf32, #tpu.memory_space<vmem>>, vector<8x8xf32>,
    %71 = vector.extract_strided_slice %14 {offsets = [0, 16], sizes = [8, 8], strides = [1, 1]} : vector<8x32xf32> to vector<8x8xf32>
    %cst_34 = arith.constant 0.353553385 : f32
    %72 = vector.broadcast %cst_34 : f32 to vector<8x8xf32>
    %73 = arith.mulf %71, %72 : vector<8x8xf32>
    %74 = arith.truncf %73 : vector<8x8xf32> to vector<8x8xbf16>
    %75 = vector.extract_strided_slice %15 {offsets = [0, 16], sizes = [8, 8], strides = [1, 1]} : vector<8x32xf32> to vector<8x8xf32>
    %76 = arith.truncf %75 : vector<8x8xf32> to vector<8x8xbf16>
    %77 = vector.extract_strided_slice %16 {offsets = [0, 16], sizes = [8, 8], strides = [1, 1]} : vector<8x32xf32> to vector<8x8xf32>
    %78 = arith.truncf %77 : vector<8x8xf32> to vector<8x8xbf16>
    %79 = tpu.transpose %76, [1, 0] : vector<8x8xbf16> -> vector<8x8xbf16>
    %cst_35 = arith.constant dense<0.000000e+00> : vector<8x8xf32>
    %80 = tpu.matmul %74, %79, %cst_35 {dimension_numbers = #tpu.dot_dimension_numbers<[1], [0], [0], [1], [0, 0, 1, 1], [], []>} : vector<8x8xbf16>, vector<8x8xbf16>, vector<8x8xf32> -> vector<8x8xf32>
    %cst_36 = arith.constant 0.000000e+00 : f32
    %81 = vector.broadcast %cst_36 : f32 to vector<8x8xf32>
    %82 = arith.cmpf oeq, %5, %81 : vector<8x8xf32>
    %cst_37 = arith.constant -1.000000e+10 : f32
    %83 = vector.broadcast %cst_37 : f32 to vector<8x8xf32>
    %84 = arith.select %82, %83, %80 : vector<8x8xi1>, vector<8x8xf32>
    %cst_38 = arith.constant dense<0xFF800000> : vector<8xf32>
    %85 = vector.multi_reduction <maximumf>, %84, %cst_38 [1] : vector<8x8xf32> to vector<8xf32>
    %86 = vector.shape_cast %85 : vector<8xf32> to vector<8x1xf32>
    %87 = vector.broadcast %86 : vector<8x1xf32> to vector<8x8xf32>
    %88 = arith.subf %84, %87 : vector<8x8xf32>
    %89 = math.exp %88 : vector<8x8xf32>
    %cst_39 = arith.constant dense<0.000000e+00> : vector<8xf32>
    %90 = vector.multi_reduction <add>, %89, %cst_39 [1] : vector<8x8xf32> to vector<8xf32>
    %91 = vector.shape_cast %90 : vector<8xf32> to vector<8x1xf32>
    %92 = tpu.reciprocal %91 {approx = true} : vector<8x1xf32> -> vector<8x1xf32>
    %93 = vector.broadcast %92 : vector<8x1xf32> to vector<8x8xf32>
    %94 = arith.mulf %89, %93 : vector<8x8xf32>
    %95 = arith.truncf %94 : vector<8x8xf32> to vector<8x8xbf16>
    %cst_40 = arith.constant dense<0.000000e+00> : vector<8x8xf32>
    %96 = tpu.matmul %95, %78, %cst_40 {dimension_numbers = #tpu.dot_dimension_numbers<[1], [0], [0], [1], [0, 0, 1, 1], [], []>} : vector<8x8xbf16>, vector<8x8xbf16>, vector<8x8xf32> -> vector<8x8xf32>
    %c0_41 = arith.constant 0 : index
    %c16 = arith.constant 16 : index
    %97 = vector.load %arg23[%c0_41, %c16] : memref<8x32xf32, #tpu.memory_space<vmem>>, vector<8x8xf32>
    tpu.vector_store %arg23[%c0_41, %c16], %96 {strides = array<i32>} : memref<8x32xf32, #tpu.memory_space<vmem>>, vector<8x8xf32>,
    %98 = vector.extract_strided_slice %14 {offsets = [0, 24], sizes = [8, 8], strides = [1, 1]} : vector<8x32xf32> to vector<8x8xf32>
    %cst_42 = arith.constant 0.353553385 : f32
    %99 = vector.broadcast %cst_42 : f32 to vector<8x8xf32>
    %100 = arith.mulf %98, %99 : vector<8x8xf32>
    %101 = arith.truncf %100 : vector<8x8xf32> to vector<8x8xbf16>
    %102 = vector.extract_strided_slice %15 {offsets = [0, 24], sizes = [8, 8], strides = [1, 1]} : vector<8x32xf32> to vector<8x8xf32>
    %103 = arith.truncf %102 : vector<8x8xf32> to vector<8x8xbf16>
    %104 = vector.extract_strided_slice %16 {offsets = [0, 24], sizes = [8, 8], strides = [1, 1]} : vector<8x32xf32> to vector<8x8xf32>
    %105 = arith.truncf %104 : vector<8x8xf32> to vector<8x8xbf16>
    %106 = tpu.transpose %103, [1, 0] : vector<8x8xbf16> -> vector<8x8xbf16>
    %cst_43 = arith.constant dense<0.000000e+00> : vector<8x8xf32>
    %107 = tpu.matmul %101, %106, %cst_43 {dimension_numbers = #tpu.dot_dimension_numbers<[1], [0], [0], [1], [0, 0, 1, 1], [], []>} : vector<8x8xbf16>, vector<8x8xbf16>, vector<8x8xf32> -> vector<8x8xf32>
    %cst_44 = arith.constant 0.000000e+00 : f32
    %108 = vector.broadcast %cst_44 : f32 to vector<8x8xf32>
    %109 = arith.cmpf oeq, %5, %108 : vector<8x8xf32>
    %cst_45 = arith.constant -1.000000e+10 : f32
    %110 = vector.broadcast %cst_45 : f32 to vector<8x8xf32>
    %111 = arith.select %109, %110, %107 : vector<8x8xi1>, vector<8x8xf32>
    %cst_46 = arith.constant dense<0xFF800000> : vector<8xf32>
    %112 = vector.multi_reduction <maximumf>, %111, %cst_46 [1] : vector<8x8xf32> to vector<8xf32>
    %113 = vector.shape_cast %112 : vector<8xf32> to vector<8x1xf32>
    %114 = vector.broadcast %113 : vector<8x1xf32> to vector<8x8xf32>
    %115 = arith.subf %111, %114 : vector<8x8xf32>
    %116 = math.exp %115 : vector<8x8xf32>
    %cst_47 = arith.constant dense<0.000000e+00> : vector<8xf32>
    %117 = vector.multi_reduction <add>, %116, %cst_47 [1] : vector<8x8xf32> to vector<8xf32>
    %118 = vector.shape_cast %117 : vector<8xf32> to vector<8x1xf32>
    %119 = tpu.reciprocal %118 {approx = true} : vector<8x1xf32> -> vector<8x1xf32>
    %120 = vector.broadcast %119 : vector<8x1xf32> to vector<8x8xf32>
    %121 = arith.mulf %116, %120 : vector<8x8xf32>
    %122 = arith.truncf %121 : vector<8x8xf32> to vector<8x8xbf16>
    %cst_48 = arith.constant dense<0.000000e+00> : vector<8x8xf32>
    %123 = tpu.matmul %122, %105, %cst_48 {dimension_numbers = #tpu.dot_dimension_numbers<[1], [0], [0], [1], [0, 0, 1, 1], [], []>} : vector<8x8xbf16>, vector<8x8xbf16>, vector<8x8xf32> -> vector<8x8xf32>
    %c0_49 = arith.constant 0 : index
    %c24 = arith.constant 24 : index
    %124 = vector.load %arg23[%c0_49, %c24] : memref<8x32xf32, #tpu.memory_space<vmem>>, vector<8x8xf32>
    tpu.vector_store %arg23[%c0_49, %c24], %123 {strides = array<i32>} : memref<8x32xf32, #tpu.memory_space<vmem>>, vector<8x8xf32>,
    %c0_50 = arith.constant 0 : index
    %c0_51 = arith.constant 0 : index
    %125 = vector.load %arg23[%c0_50, %c0_51] : memref<8x32xf32, #tpu.memory_space<vmem>>, vector<8x32xf32>
    %126 = arith.truncf %125 : vector<8x32xf32> to vector<8x32xbf16>
    %c0_52 = arith.constant 0 : index
    %c0_53 = arith.constant 0 : index
    %127 = vector.load %arg7[%c0_52, %c0_53] : memref<32x32xbf16, #tpu.memory_space<vmem>>, vector<32x32xbf16>
    %cst_54 = arith.constant dense<0.000000e+00> : vector<8x32xf32>
    %128 = tpu.matmul %126, %127, %cst_54 {dimension_numbers = #tpu.dot_dimension_numbers<[1], [0], [0], [1], [0, 0, 1, 1], [], []>} : vector<8x32xbf16>, vector<32x32xbf16>, vector<8x32xf32> -> vector<8x32xf32>
    %c0_55 = arith.constant 0 : index
    %c0_56 = arith.constant 0 : index
    %129 = vector.load %arg8[%c0_55, %c0_56] : memref<1x32xf32, #tpu.memory_space<vmem>>, vector<1x32xf32>
    %130 = vector.broadcast %129 : vector<1x32xf32> to vector<8x32xf32>
    %131 = arith.addf %128, %130 : vector<8x32xf32>
    %132 = arith.addf %1, %131 : vector<8x32xf32>
    %c0_57 = arith.constant 0 : index
    %c0_58 = arith.constant 0 : index
    %133 = vector.load %arg19[%c0_57, %c0_58] : memref<3x32xf32, #tpu.memory_space<vmem>>, vector<1x32xf32>
    %c0_59 = arith.constant 0 : index
    %c0_60 = arith.constant 0 : index
    %134 = vector.load %arg20[%c0_59, %c0_60] : memref<3x32xf32, #tpu.memory_space<vmem>>, vector<1x32xf32>
    %cst_61 = arith.constant dense<0.000000e+00> : vector<8xf32>
    %135 = vector.multi_reduction <add>, %132, %cst_61 [1] : vector<8x32xf32> to vector<8xf32>
    %136 = vector.shape_cast %135 : vector<8xf32> to vector<8x1xf32>
    %cst_62 = arith.constant 3.200000e+01 : f32
    %137 = vector.broadcast %cst_62 : f32 to vector<8x1xf32>
    %138 = arith.divf %136, %137 : vector<8x1xf32>
    %139 = vector.broadcast %138 : vector<8x1xf32> to vector<8x32xf32>
    %140 = arith.subf %132, %139 : vector<8x32xf32>
    %141 = arith.mulf %140, %140 : vector<8x32xf32>
    %cst_63 = arith.constant dense<0.000000e+00> : vector<8xf32>
    %142 = vector.multi_reduction <add>, %141, %cst_63 [1] : vector<8x32xf32> to vector<8xf32>
    %143 = vector.shape_cast %142 : vector<8xf32> to vector<8x1xf32>
    %cst_64 = arith.constant 3.200000e+01 : f32
    %144 = vector.broadcast %cst_64 : f32 to vector<8x1xf32>
    %145 = arith.divf %143, %144 : vector<8x1xf32>
    %146 = vector.broadcast %138 : vector<8x1xf32> to vector<8x32xf32>
    %147 = arith.subf %132, %146 : vector<8x32xf32>
    %cst_65 = arith.constant 9.99999974E-6 : f32
    %148 = vector.broadcast %cst_65 : f32 to vector<8x1xf32>
    %149 = arith.addf %145, %148 : vector<8x1xf32>
    %150 = math.rsqrt %149 : vector<8x1xf32>
    %151 = vector.broadcast %150 : vector<8x1xf32> to vector<8x32xf32>
    %152 = arith.mulf %147, %151 : vector<8x32xf32>
    %153 = vector.broadcast %133 : vector<1x32xf32> to vector<8x32xf32>
    %154 = arith.mulf %152, %153 : vector<8x32xf32>
    %155 = vector.broadcast %134 : vector<1x32xf32> to vector<8x32xf32>
    %156 = arith.addf %154, %155 : vector<8x32xf32>
    %157 = arith.truncf %156 : vector<8x32xf32> to vector<8x32xbf16>
    %c0_66 = arith.constant 0 : index
    %c0_67 = arith.constant 0 : index
    %158 = vector.load %arg9[%c0_66, %c0_67] : memref<32x32xbf16, #tpu.memory_space<vmem>>, vector<32x32xbf16>
    %cst_68 = arith.constant dense<0.000000e+00> : vector<8x32xf32>
    %159 = tpu.matmul %157, %158, %cst_68 {dimension_numbers = #tpu.dot_dimension_numbers<[1], [0], [0], [1], [0, 0, 1, 1], [], []>} : vector<8x32xbf16>, vector<32x32xbf16>, vector<8x32xf32> -> vector<8x32xf32>
    %c0_69 = arith.constant 0 : index
    %c0_70 = arith.constant 0 : index
    %160 = vector.load %arg10[%c0_69, %c0_70] : memref<1x32xf32, #tpu.memory_space<vmem>>, vector<1x32xf32>
    %161 = vector.broadcast %160 : vector<1x32xf32> to vector<8x32xf32>
    %162 = arith.addf %159, %161 : vector<8x32xf32>
    %163 = arith.truncf %3 : vector<8x32xf32> to vector<8x32xbf16>
    %c0_71 = arith.constant 0 : index
    %c0_72 = arith.constant 0 : index
    %164 = vector.load %arg11[%c0_71, %c0_72] : memref<32x64xbf16, #tpu.memory_space<vmem>>, vector<32x64xbf16>
    %cst_73 = arith.constant dense<0.000000e+00> : vector<8x64xf32>
    %165 = tpu.matmul %163, %164, %cst_73 {dimension_numbers = #tpu.dot_dimension_numbers<[1], [0], [0], [1], [0, 0, 1, 1], [], []>} : vector<8x32xbf16>, vector<32x64xbf16>, vector<8x64xf32> -> vector<8x64xf32>
    %c0_74 = arith.constant 0 : index
    %c0_75 = arith.constant 0 : index
    %166 = vector.load %arg12[%c0_74, %c0_75] : memref<1x64xf32, #tpu.memory_space<vmem>>, vector<1x64xf32>
    %167 = vector.broadcast %166 : vector<1x64xf32> to vector<8x64xf32>
    %168 = arith.addf %165, %167 : vector<8x64xf32>
    %169 = vector.extract_strided_slice %168 {offsets = [0, 0], sizes = [8, 32], strides = [1, 1]} : vector<8x64xf32> to vector<8x32xf32>
    %170 = vector.extract_strided_slice %168 {offsets = [0, 32], sizes = [8, 32], strides = [1, 1]} : vector<8x64xf32> to vector<8x32xf32>
    %171 = vector.extract_strided_slice %162 {offsets = [0, 0], sizes = [8, 8], strides = [1, 1]} : vector<8x32xf32> to vector<8x8xf32>
    %cst_76 = arith.constant 0.353553385 : f32
    %172 = vector.broadcast %cst_76 : f32 to vector<8x8xf32>
    %173 = arith.mulf %171, %172 : vector<8x8xf32>
    %174 = arith.truncf %173 : vector<8x8xf32> to vector<8x8xbf16>
    %175 = vector.extract_strided_slice %169 {offsets = [0, 0], sizes = [8, 8], strides = [1, 1]} : vector<8x32xf32> to vector<8x8xf32>
    %176 = arith.truncf %175 : vector<8x8xf32> to vector<8x8xbf16>
    %177 = vector.extract_strided_slice %170 {offsets = [0, 0], sizes = [8, 8], strides = [1, 1]} : vector<8x32xf32> to vector<8x8xf32>
    %178 = arith.truncf %177 : vector<8x8xf32> to vector<8x8xbf16>
    %179 = tpu.transpose %176, [1, 0] : vector<8x8xbf16> -> vector<8x8xbf16>
    %cst_77 = arith.constant dense<0.000000e+00> : vector<8x8xf32>
    %180 = tpu.matmul %174, %179, %cst_77 {dimension_numbers = #tpu.dot_dimension_numbers<[1], [0], [0], [1], [0, 0, 1, 1], [], []>} : vector<8x8xbf16>, vector<8x8xbf16>, vector<8x8xf32> -> vector<8x8xf32>
    %cst_78 = arith.constant 0.000000e+00 : f32
    %181 = vector.broadcast %cst_78 : f32 to vector<1x8xf32>
    %182 = arith.cmpf oeq, %7, %181 : vector<1x8xf32>
    %cst_79 = arith.constant -1.000000e+10 : f32
    %183 = vector.shape_cast %182 : vector<1x8xi1> to vector<1x8xi1>
    %184 = vector.broadcast %183 : vector<1x8xi1> to vector<8x8xi1>
    %185 = vector.broadcast %cst_79 : f32 to vector<8x8xf32>
    %186 = arith.select %184, %185, %180 : vector<8x8xi1>, vector<8x8xf32>
    %cst_80 = arith.constant dense<0xFF800000> : vector<8xf32>
    %187 = vector.multi_reduction <maximumf>, %186, %cst_80 [1] : vector<8x8xf32> to vector<8xf32>
    %188 = vector.shape_cast %187 : vector<8xf32> to vector<8x1xf32>
    %189 = vector.broadcast %188 : vector<8x1xf32> to vector<8x8xf32>
    %190 = arith.subf %186, %189 : vector<8x8xf32>
    %191 = math.exp %190 : vector<8x8xf32>
    %cst_81 = arith.constant dense<0.000000e+00> : vector<8xf32>
    %192 = vector.multi_reduction <add>, %191, %cst_81 [1] : vector<8x8xf32> to vector<8xf32>
    %193 = vector.shape_cast %192 : vector<8xf32> to vector<8x1xf32>
    %194 = tpu.reciprocal %193 {approx = true} : vector<8x1xf32> -> vector<8x1xf32>
    %195 = vector.broadcast %194 : vector<8x1xf32> to vector<8x8xf32>
    %196 = arith.mulf %191, %195 : vector<8x8xf32>
    %197 = arith.truncf %196 : vector<8x8xf32> to vector<8x8xbf16>
    %cst_82 = arith.constant dense<0.000000e+00> : vector<8x8xf32>
    %198 = tpu.matmul %197, %178, %cst_82 {dimension_numbers = #tpu.dot_dimension_numbers<[1], [0], [0], [1], [0, 0, 1, 1], [], []>} : vector<8x8xbf16>, vector<8x8xbf16>, vector<8x8xf32> -> vector<8x8xf32>
    %c0_83 = arith.constant 0 : index
    %c0_84 = arith.constant 0 : index
    %199 = vector.load %arg23[%c0_83, %c0_84] : memref<8x32xf32, #tpu.memory_space<vmem>>, vector<8x8xf32>
    tpu.vector_store %arg23[%c0_83, %c0_84], %198 {strides = array<i32>} : memref<8x32xf32, #tpu.memory_space<vmem>>, vector<8x8xf32>,
    %c0_85 = arith.constant 0 : index
    %c0_86 = arith.constant 0 : index
    %c0_87 = arith.constant 0 : index
    %c0_88 = arith.constant 0 : index
    %200 = vector.load %arg22[%c0_85, %c0_86, %c0_87, %c0_88] : memref<1x4x8x8xf32, #tpu.memory_space<vmem>>, vector<1x1x8x8xf32>
    %201 = vector.shape_cast %200 : vector<1x1x8x8xf32> to vector<8x8xf32>
    %202 = vector.shape_cast %196 : vector<8x8xf32> to vector<1x1x8x8xf32>
    tpu.vector_store %arg22[%c0_85, %c0_86, %c0_87, %c0_88], %202 {strides = array<i32>} : memref<1x4x8x8xf32, #tpu.memory_space<vmem>>, vector<1x1x8x8xf32>,
    %203 = vector.extract_strided_slice %162 {offsets = [0, 8], sizes = [8, 8], strides = [1, 1]} : vector<8x32xf32> to vector<8x8xf32>
    %cst_89 = arith.constant 0.353553385 : f32
    %204 = vector.broadcast %cst_89 : f32 to vector<8x8xf32>
    %205 = arith.mulf %203, %204 : vector<8x8xf32>
    %206 = arith.truncf %205 : vector<8x8xf32> to vector<8x8xbf16>
    %207 = vector.extract_strided_slice %169 {offsets = [0, 8], sizes = [8, 8], strides = [1, 1]} : vector<8x32xf32> to vector<8x8xf32>
    %208 = arith.truncf %207 : vector<8x8xf32> to vector<8x8xbf16>
    %209 = vector.extract_strided_slice %170 {offsets = [0, 8], sizes = [8, 8], strides = [1, 1]} : vector<8x32xf32> to vector<8x8xf32>
    %210 = arith.truncf %209 : vector<8x8xf32> to vector<8x8xbf16>
    %211 = tpu.transpose %208, [1, 0] : vector<8x8xbf16> -> vector<8x8xbf16>
    %cst_90 = arith.constant dense<0.000000e+00> : vector<8x8xf32>
    %212 = tpu.matmul %206, %211, %cst_90 {dimension_numbers = #tpu.dot_dimension_numbers<[1], [0], [0], [1], [0, 0, 1, 1], [], []>} : vector<8x8xbf16>, vector<8x8xbf16>, vector<8x8xf32> -> vector<8x8xf32>
    %cst_91 = arith.constant 0.000000e+00 : f32
    %213 = vector.broadcast %cst_91 : f32 to vector<1x8xf32>
    %214 = arith.cmpf oeq, %7, %213 : vector<1x8xf32>
    %cst_92 = arith.constant -1.000000e+10 : f32
    %215 = vector.shape_cast %214 : vector<1x8xi1> to vector<1x8xi1>
    %216 = vector.broadcast %215 : vector<1x8xi1> to vector<8x8xi1>
    %217 = vector.broadcast %cst_92 : f32 to vector<8x8xf32>
    %218 = arith.select %216, %217, %212 : vector<8x8xi1>, vector<8x8xf32>
    %cst_93 = arith.constant dense<0xFF800000> : vector<8xf32>
    %219 = vector.multi_reduction <maximumf>, %218, %cst_93 [1] : vector<8x8xf32> to vector<8xf32>
    %220 = vector.shape_cast %219 : vector<8xf32> to vector<8x1xf32>
    %221 = vector.broadcast %220 : vector<8x1xf32> to vector<8x8xf32>
    %222 = arith.subf %218, %221 : vector<8x8xf32>
    %223 = math.exp %222 : vector<8x8xf32>
    %cst_94 = arith.constant dense<0.000000e+00> : vector<8xf32>
    %224 = vector.multi_reduction <add>, %223, %cst_94 [1] : vector<8x8xf32> to vector<8xf32>
    %225 = vector.shape_cast %224 : vector<8xf32> to vector<8x1xf32>
    %226 = tpu.reciprocal %225 {approx = true} : vector<8x1xf32> -> vector<8x1xf32>
    %227 = vector.broadcast %226 : vector<8x1xf32> to vector<8x8xf32>
    %228 = arith.mulf %223, %227 : vector<8x8xf32>
    %229 = arith.truncf %228 : vector<8x8xf32> to vector<8x8xbf16>
    %cst_95 = arith.constant dense<0.000000e+00> : vector<8x8xf32>
    %230 = tpu.matmul %229, %210, %cst_95 {dimension_numbers = #tpu.dot_dimension_numbers<[1], [0], [0], [1], [0, 0, 1, 1], [], []>} : vector<8x8xbf16>, vector<8x8xbf16>, vector<8x8xf32> -> vector<8x8xf32>
    %c0_96 = arith.constant 0 : index
    %c8_97 = arith.constant 8 : index
    %231 = vector.load %arg23[%c0_96, %c8_97] : memref<8x32xf32, #tpu.memory_space<vmem>>, vector<8x8xf32>
    tpu.vector_store %arg23[%c0_96, %c8_97], %230 {strides = array<i32>} : memref<8x32xf32, #tpu.memory_space<vmem>>, vector<8x8xf32>,
    %c0_98 = arith.constant 0 : index
    %c1 = arith.constant 1 : index
    %c0_99 = arith.constant 0 : index
    %c0_100 = arith.constant 0 : index
    %232 = vector.load %arg22[%c0_98, %c1, %c0_99, %c0_100] : memref<1x4x8x8xf32, #tpu.memory_space<vmem>>, vector<1x1x8x8xf32>
    %233 = vector.shape_cast %232 : vector<1x1x8x8xf32> to vector<8x8xf32>
    %234 = vector.shape_cast %228 : vector<8x8xf32> to vector<1x1x8x8xf32>
    tpu.vector_store %arg22[%c0_98, %c1, %c0_99, %c0_100], %234 {strides = array<i32>} : memref<1x4x8x8xf32, #tpu.memory_space<vmem>>, vector<1x1x8x8xf32>,
    %235 = vector.extract_strided_slice %162 {offsets = [0, 16], sizes = [8, 8], strides = [1, 1]} : vector<8x32xf32> to vector<8x8xf32>
    %cst_101 = arith.constant 0.353553385 : f32
    %236 = vector.broadcast %cst_101 : f32 to vector<8x8xf32>
    %237 = arith.mulf %235, %236 : vector<8x8xf32>
    %238 = arith.truncf %237 : vector<8x8xf32> to vector<8x8xbf16>
    %239 = vector.extract_strided_slice %169 {offsets = [0, 16], sizes = [8, 8], strides = [1, 1]} : vector<8x32xf32> to vector<8x8xf32>
    %240 = arith.truncf %239 : vector<8x8xf32> to vector<8x8xbf16>
    %241 = vector.extract_strided_slice %170 {offsets = [0, 16], sizes = [8, 8], strides = [1, 1]} : vector<8x32xf32> to vector<8x8xf32>
    %242 = arith.truncf %241 : vector<8x8xf32> to vector<8x8xbf16>
    %243 = tpu.transpose %240, [1, 0] : vector<8x8xbf16> -> vector<8x8xbf16>
    %cst_102 = arith.constant dense<0.000000e+00> : vector<8x8xf32>
    %244 = tpu.matmul %238, %243, %cst_102 {dimension_numbers = #tpu.dot_dimension_numbers<[1], [0], [0], [1], [0, 0, 1, 1], [], []>} : vector<8x8xbf16>, vector<8x8xbf16>, vector<8x8xf32> -> vector<8x8xf32>
    %cst_103 = arith.constant 0.000000e+00 : f32
    %245 = vector.broadcast %cst_103 : f32 to vector<1x8xf32>
    %246 = arith.cmpf oeq, %7, %245 : vector<1x8xf32>
    %cst_104 = arith.constant -1.000000e+10 : f32
    %247 = vector.shape_cast %246 : vector<1x8xi1> to vector<1x8xi1>
    %248 = vector.broadcast %247 : vector<1x8xi1> to vector<8x8xi1>
    %249 = vector.broadcast %cst_104 : f32 to vector<8x8xf32>
    %250 = arith.select %248, %249, %244 : vector<8x8xi1>, vector<8x8xf32>
    %cst_105 = arith.constant dense<0xFF800000> : vector<8xf32>
    %251 = vector.multi_reduction <maximumf>, %250, %cst_105 [1] : vector<8x8xf32> to vector<8xf32>
    %252 = vector.shape_cast %251 : vector<8xf32> to vector<8x1xf32>
    %253 = vector.broadcast %252 : vector<8x1xf32> to vector<8x8xf32>
    %254 = arith.subf %250, %253 : vector<8x8xf32>
    %255 = math.exp %254 : vector<8x8xf32>
    %cst_106 = arith.constant dense<0.000000e+00> : vector<8xf32>
    %256 = vector.multi_reduction <add>, %255, %cst_106 [1] : vector<8x8xf32> to vector<8xf32>
    %257 = vector.shape_cast %256 : vector<8xf32> to vector<8x1xf32>
    %258 = tpu.reciprocal %257 {approx = true} : vector<8x1xf32> -> vector<8x1xf32>
    %259 = vector.broadcast %258 : vector<8x1xf32> to vector<8x8xf32>
    %260 = arith.mulf %255, %259 : vector<8x8xf32>
    %261 = arith.truncf %260 : vector<8x8xf32> to vector<8x8xbf16>
    %cst_107 = arith.constant dense<0.000000e+00> : vector<8x8xf32>
    %262 = tpu.matmul %261, %242, %cst_107 {dimension_numbers = #tpu.dot_dimension_numbers<[1], [0], [0], [1], [0, 0, 1, 1], [], []>} : vector<8x8xbf16>, vector<8x8xbf16>, vector<8x8xf32> -> vector<8x8xf32>
    %c0_108 = arith.constant 0 : index
    %c16_109 = arith.constant 16 : index
    %263 = vector.load %arg23[%c0_108, %c16_109] : memref<8x32xf32, #tpu.memory_space<vmem>>, vector<8x8xf32>
    tpu.vector_store %arg23[%c0_108, %c16_109], %262 {strides = array<i32>} : memref<8x32xf32, #tpu.memory_space<vmem>>, vector<8x8xf32>,
    %c0_110 = arith.constant 0 : index
    %c2 = arith.constant 2 : index
    %c0_111 = arith.constant 0 : index
    %c0_112 = arith.constant 0 : index
    %264 = vector.load %arg22[%c0_110, %c2, %c0_111, %c0_112] : memref<1x4x8x8xf32, #tpu.memory_space<vmem>>, vector<1x1x8x8xf32>
    %265 = vector.shape_cast %264 : vector<1x1x8x8xf32> to vector<8x8xf32>
    %266 = vector.shape_cast %260 : vector<8x8xf32> to vector<1x1x8x8xf32>
    tpu.vector_store %arg22[%c0_110, %c2, %c0_111, %c0_112], %266 {strides = array<i32>} : memref<1x4x8x8xf32, #tpu.memory_space<vmem>>, vector<1x1x8x8xf32>,
    %267 = vector.extract_strided_slice %162 {offsets = [0, 24], sizes = [8, 8], strides = [1, 1]} : vector<8x32xf32> to vector<8x8xf32>
    %cst_113 = arith.constant 0.353553385 : f32
    %268 = vector.broadcast %cst_113 : f32 to vector<8x8xf32>
    %269 = arith.mulf %267, %268 : vector<8x8xf32>
    %270 = arith.truncf %269 : vector<8x8xf32> to vector<8x8xbf16>
    %271 = vector.extract_strided_slice %169 {offsets = [0, 24], sizes = [8, 8], strides = [1, 1]} : vector<8x32xf32> to vector<8x8xf32>
    %272 = arith.truncf %271 : vector<8x8xf32> to vector<8x8xbf16>
    %273 = vector.extract_strided_slice %170 {offsets = [0, 24], sizes = [8, 8], strides = [1, 1]} : vector<8x32xf32> to vector<8x8xf32>
    %274 = arith.truncf %273 : vector<8x8xf32> to vector<8x8xbf16>
    %275 = tpu.transpose %272, [1, 0] : vector<8x8xbf16> -> vector<8x8xbf16>
    %cst_114 = arith.constant dense<0.000000e+00> : vector<8x8xf32>
    %276 = tpu.matmul %270, %275, %cst_114 {dimension_numbers = #tpu.dot_dimension_numbers<[1], [0], [0], [1], [0, 0, 1, 1], [], []>} : vector<8x8xbf16>, vector<8x8xbf16>, vector<8x8xf32> -> vector<8x8xf32>
    %cst_115 = arith.constant 0.000000e+00 : f32
    %277 = vector.broadcast %cst_115 : f32 to vector<1x8xf32>
    %278 = arith.cmpf oeq, %7, %277 : vector<1x8xf32>
    %cst_116 = arith.constant -1.000000e+10 : f32
    %279 = vector.shape_cast %278 : vector<1x8xi1> to vector<1x8xi1>
    %280 = vector.broadcast %279 : vector<1x8xi1> to vector<8x8xi1>
    %281 = vector.broadcast %cst_116 : f32 to vector<8x8xf32>
    %282 = arith.select %280, %281, %276 : vector<8x8xi1>, vector<8x8xf32>
    %cst_117 = arith.constant dense<0xFF800000> : vector<8xf32>
    %283 = vector.multi_reduction <maximumf>, %282, %cst_117 [1] : vector<8x8xf32> to vector<8xf32>
    %284 = vector.shape_cast %283 : vector<8xf32> to vector<8x1xf32>
    %285 = vector.broadcast %284 : vector<8x1xf32> to vector<8x8xf32>
    %286 = arith.subf %282, %285 : vector<8x8xf32>
    %287 = math.exp %286 : vector<8x8xf32>
    %cst_118 = arith.constant dense<0.000000e+00> : vector<8xf32>
    %288 = vector.multi_reduction <add>, %287, %cst_118 [1] : vector<8x8xf32> to vector<8xf32>
    %289 = vector.shape_cast %288 : vector<8xf32> to vector<8x1xf32>
    %290 = tpu.reciprocal %289 {approx = true} : vector<8x1xf32> -> vector<8x1xf32>
    %291 = vector.broadcast %290 : vector<8x1xf32> to vector<8x8xf32>
    %292 = arith.mulf %287, %291 : vector<8x8xf32>
    %293 = arith.truncf %292 : vector<8x8xf32> to vector<8x8xbf16>
    %cst_119 = arith.constant dense<0.000000e+00> : vector<8x8xf32>
    %294 = tpu.matmul %293, %274, %cst_119 {dimension_numbers = #tpu.dot_dimension_numbers<[1], [0], [0], [1], [0, 0, 1, 1], [], []>} : vector<8x8xbf16>, vector<8x8xbf16>, vector<8x8xf32> -> vector<8x8xf32>
    %c0_120 = arith.constant 0 : index
    %c24_121 = arith.constant 24 : index
    %295 = vector.load %arg23[%c0_120, %c24_121] : memref<8x32xf32, #tpu.memory_space<vmem>>, vector<8x8xf32>
    tpu.vector_store %arg23[%c0_120, %c24_121], %294 {strides = array<i32>} : memref<8x32xf32, #tpu.memory_space<vmem>>, vector<8x8xf32>,
    %c0_122 = arith.constant 0 : index
    %c3 = arith.constant 3 : index
    %c0_123 = arith.constant 0 : index
    %c0_124 = arith.constant 0 : index
    %296 = vector.load %arg22[%c0_122, %c3, %c0_123, %c0_124] : memref<1x4x8x8xf32, #tpu.memory_space<vmem>>, vector<1x1x8x8xf32>
    %297 = vector.shape_cast %296 : vector<1x1x8x8xf32> to vector<8x8xf32>
    %298 = vector.shape_cast %292 : vector<8x8xf32> to vector<1x1x8x8xf32>
    tpu.vector_store %arg22[%c0_122, %c3, %c0_123, %c0_124], %298 {strides = array<i32>} : memref<1x4x8x8xf32, #tpu.memory_space<vmem>>, vector<1x1x8x8xf32>,
    %c0_125 = arith.constant 0 : index
    %c0_126 = arith.constant 0 : index
    %299 = vector.load %arg23[%c0_125, %c0_126] : memref<8x32xf32, #tpu.memory_space<vmem>>, vector<8x32xf32>
    %300 = arith.truncf %299 : vector<8x32xf32> to vector<8x32xbf16>
    %c0_127 = arith.constant 0 : index
    %c0_128 = arith.constant 0 : index
    %301 = vector.load %arg13[%c0_127, %c0_128] : memref<32x32xbf16, #tpu.memory_space<vmem>>, vector<32x32xbf16>
    %cst_129 = arith.constant dense<0.000000e+00> : vector<8x32xf32>
    %302 = tpu.matmul %300, %301, %cst_129 {dimension_numbers = #tpu.dot_dimension_numbers<[1], [0], [0], [1], [0, 0, 1, 1], [], []>} : vector<8x32xbf16>, vector<32x32xbf16>, vector<8x32xf32> -> vector<8x32xf32>
    %c0_130 = arith.constant 0 : index
    %c0_131 = arith.constant 0 : index
    %303 = vector.load %arg14[%c0_130, %c0_131] : memref<1x32xf32, #tpu.memory_space<vmem>>, vector<1x32xf32>
    %304 = vector.broadcast %303 : vector<1x32xf32> to vector<8x32xf32>
    %305 = arith.addf %302, %304 : vector<8x32xf32>
    %306 = arith.addf %156, %305 : vector<8x32xf32>
    %c1_132 = arith.constant 1 : index
    %c0_133 = arith.constant 0 : index
    %307 = vector.load %arg19[%c1_132, %c0_133] : memref<3x32xf32, #tpu.memory_space<vmem>>, vector<1x32xf32>
    %c1_134 = arith.constant 1 : index
    %c0_135 = arith.constant 0 : index
    %308 = vector.load %arg20[%c1_134, %c0_135] : memref<3x32xf32, #tpu.memory_space<vmem>>, vector<1x32xf32>
    %cst_136 = arith.constant dense<0.000000e+00> : vector<8xf32>
    %309 = vector.multi_reduction <add>, %306, %cst_136 [1] : vector<8x32xf32> to vector<8xf32>
    %310 = vector.shape_cast %309 : vector<8xf32> to vector<8x1xf32>
    %cst_137 = arith.constant 3.200000e+01 : f32
    %311 = vector.broadcast %cst_137 : f32 to vector<8x1xf32>
    %312 = arith.divf %310, %311 : vector<8x1xf32>
    %313 = vector.broadcast %312 : vector<8x1xf32> to vector<8x32xf32>
    %314 = arith.subf %306, %313 : vector<8x32xf32>
    %315 = arith.mulf %314, %314 : vector<8x32xf32>
    %cst_138 = arith.constant dense<0.000000e+00> : vector<8xf32>
    %316 = vector.multi_reduction <add>, %315, %cst_138 [1] : vector<8x32xf32> to vector<8xf32>
    %317 = vector.shape_cast %316 : vector<8xf32> to vector<8x1xf32>
    %cst_139 = arith.constant 3.200000e+01 : f32
    %318 = vector.broadcast %cst_139 : f32 to vector<8x1xf32>
    %319 = arith.divf %317, %318 : vector<8x1xf32>
    %320 = vector.broadcast %312 : vector<8x1xf32> to vector<8x32xf32>
    %321 = arith.subf %306, %320 : vector<8x32xf32>
    %cst_140 = arith.constant 9.99999974E-6 : f32
    %322 = vector.broadcast %cst_140 : f32 to vector<8x1xf32>
    %323 = arith.addf %319, %322 : vector<8x1xf32>
    %324 = math.rsqrt %323 : vector<8x1xf32>
    %325 = vector.broadcast %324 : vector<8x1xf32> to vector<8x32xf32>
    %326 = arith.mulf %321, %325 : vector<8x32xf32>
    %327 = vector.broadcast %307 : vector<1x32xf32> to vector<8x32xf32>
    %328 = arith.mulf %326, %327 : vector<8x32xf32>
    %329 = vector.broadcast %308 : vector<1x32xf32> to vector<8x32xf32>
    %330 = arith.addf %328, %329 : vector<8x32xf32>
    %331 = arith.truncf %330 : vector<8x32xf32> to vector<8x32xbf16>
    %c0_141 = arith.constant 0 : index
    %c0_142 = arith.constant 0 : index
    %332 = vector.load %arg15[%c0_141, %c0_142] : memref<32x64xbf16, #tpu.memory_space<vmem>>, vector<32x64xbf16>
    %cst_143 = arith.constant dense<0.000000e+00> : vector<8x64xf32>
    %333 = tpu.matmul %331, %332, %cst_143 {dimension_numbers = #tpu.dot_dimension_numbers<[1], [0], [0], [1], [0, 0, 1, 1], [], []>} : vector<8x32xbf16>, vector<32x64xbf16>, vector<8x64xf32> -> vector<8x64xf32>
    %c0_144 = arith.constant 0 : index
    %c0_145 = arith.constant 0 : index
    %334 = vector.load %arg16[%c0_144, %c0_145] : memref<1x64xf32, #tpu.memory_space<vmem>>, vector<1x64xf32>
    %335 = vector.broadcast %334 : vector<1x64xf32> to vector<8x64xf32>
    %336 = arith.addf %333, %335 : vector<8x64xf32>
    %cst_146 = arith.constant 0.000000e+00 : f32
    %337 = vector.broadcast %cst_146 : f32 to vector<8x64xf32>
    %338 = arith.maximumf %336, %337 : vector<8x64xf32>
    %339 = arith.truncf %338 : vector<8x64xf32> to vector<8x64xbf16>
    %c0_147 = arith.constant 0 : index
    %c0_148 = arith.constant 0 : index
    %340 = vector.load %arg17[%c0_147, %c0_148] : memref<64x32xbf16, #tpu.memory_space<vmem>>, vector<64x32xbf16>
    %cst_149 = arith.constant dense<0.000000e+00> : vector<8x32xf32>
    %341 = tpu.matmul %339, %340, %cst_149 {dimension_numbers = #tpu.dot_dimension_numbers<[1], [0], [0], [1], [0, 0, 1, 1], [], []>} : vector<8x64xbf16>, vector<64x32xbf16>, vector<8x32xf32> -> vector<8x32xf32>
    %c0_150 = arith.constant 0 : index
    %c0_151 = arith.constant 0 : index
    %342 = vector.load %arg18[%c0_150, %c0_151] : memref<1x32xf32, #tpu.memory_space<vmem>>, vector<1x32xf32>
    %343 = vector.broadcast %342 : vector<1x32xf32> to vector<8x32xf32>
    %344 = arith.addf %341, %343 : vector<8x32xf32>
    %345 = arith.addf %330, %344 : vector<8x32xf32>
    %c2_152 = arith.constant 2 : index
    %c0_153 = arith.constant 0 : index
    %346 = vector.load %arg19[%c2_152, %c0_153] : memref<3x32xf32, #tpu.memory_space<vmem>>, vector<1x32xf32>
    %c2_154 = arith.constant 2 : index
    %c0_155 = arith.constant 0 : index
    %347 = vector.load %arg20[%c2_154, %c0_155] : memref<3x32xf32, #tpu.memory_space<vmem>>, vector<1x32xf32>
    %cst_156 = arith.constant dense<0.000000e+00> : vector<8xf32>
    %348 = vector.multi_reduction <add>, %345, %cst_156 [1] : vector<8x32xf32> to vector<8xf32>
    %349 = vector.shape_cast %348 : vector<8xf32> to vector<8x1xf32>
    %cst_157 = arith.constant 3.200000e+01 : f32
    %350 = vector.broadcast %cst_157 : f32 to vector<8x1xf32>
    %351 = arith.divf %349, %350 : vector<8x1xf32>
    %352 = vector.broadcast %351 : vector<8x1xf32> to vector<8x32xf32>
    %353 = arith.subf %345, %352 : vector<8x32xf32>
    %354 = arith.mulf %353, %353 : vector<8x32xf32>
    %cst_158 = arith.constant dense<0.000000e+00> : vector<8xf32>
    %355 = vector.multi_reduction <add>, %354, %cst_158 [1] : vector<8x32xf32> to vector<8xf32>
    %356 = vector.shape_cast %355 : vector<8xf32> to vector<8x1xf32>
    %cst_159 = arith.constant 3.200000e+01 : f32
    %357 = vector.broadcast %cst_159 : f32 to vector<8x1xf32>
    %358 = arith.divf %356, %357 : vector<8x1xf32>
    %359 = vector.broadcast %351 : vector<8x1xf32> to vector<8x32xf32>
    %360 = arith.subf %345, %359 : vector<8x32xf32>
    %cst_160 = arith.constant 9.99999974E-6 : f32
    %361 = vector.broadcast %cst_160 : f32 to vector<8x1xf32>
    %362 = arith.addf %358, %361 : vector<8x1xf32>
    %363 = math.rsqrt %362 : vector<8x1xf32>
    %364 = vector.broadcast %363 : vector<8x1xf32> to vector<8x32xf32>
    %365 = arith.mulf %360, %364 : vector<8x32xf32>
    %366 = vector.broadcast %346 : vector<1x32xf32> to vector<8x32xf32>
    %367 = arith.mulf %365, %366 : vector<8x32xf32>
    %368 = vector.broadcast %347 : vector<1x32xf32> to vector<8x32xf32>
    %369 = arith.addf %367, %368 : vector<8x32xf32>
    %c0_161 = arith.constant 0 : index
    %c0_162 = arith.constant 0 : index
    %c0_163 = arith.constant 0 : index
    %370 = vector.load %arg21[%c0_161, %c0_162, %c0_163] : memref<1x8x32xf32, #tpu.memory_space<vmem>>, vector<1x8x32xf32>
    %371 = vector.shape_cast %370 : vector<1x8x32xf32> to vector<8x32xf32>
    %372 = vector.shape_cast %369 : vector<8x32xf32> to vector<1x8x32xf32>
    tpu.vector_store %arg21[%c0_161, %c0_162, %c0_163], %372 {strides = array<i32>} : memref<1x8x32xf32, #tpu.memory_space<vmem>>, vector<1x8x32xf32>,
    return
  }
  func.func @transform_0(%arg0: i32) -> (i32, i32, i32) {
    %c0_i32 = arith.constant 0 : i32
    %c0_i32_0 = arith.constant 0 : i32
    %c0_i32_1 = arith.constant 0 : i32
    return %arg0, %c0_i32, %c0_i32_0 : i32, i32, i32
  }
  func.func @transform_1(%arg0: i32) -> (i32, i32, i32) {
    %c0_i32 = arith.constant 0 : i32
    %c0_i32_0 = arith.constant 0 : i32
    %c0_i32_1 = arith.constant 0 : i32
    return %arg0, %c0_i32, %c0_i32_0 : i32, i32, i32
  }
  func.func @transform_2(%arg0: i32) -> (i32, i32, i32, i32) {
    %c0_i32 = arith.constant 0 : i32
    %c0_i32_0 = arith.constant 0 : i32
    %c0_i32_1 = arith.constant 0 : i32
    %c0_i32_2 = arith.constant 0 : i32
    return %arg0, %c0_i32, %c0_i32_0, %c0_i32_1 : i32, i32, i32, i32
  }
  func.func @transform_3(%arg0: i32) -> (i32, i32, i32, i32) {
    %c0_i32 = arith.constant 0 : i32
    %c0_i32_0 = arith.constant 0 : i32
    %c0_i32_1 = arith.constant 0 : i32
    %c0_i32_2 = arith.constant 0 : i32
    return %arg0, %c0_i32, %c0_i32_0, %c0_i32_1 : i32, i32, i32, i32
  }
  func.func @transform_4(%arg0: i32) -> (i32, i32) {
    %c0_i32 = arith.constant 0 : i32
    %c0_i32_0 = arith.constant 0 : i32
    %c0_i32_1 = arith.constant 0 : i32
    return %c0_i32, %c0_i32_0 : i32, i32
  }
  func.func @transform_5(%arg0: i32) -> (i32, i32) {
    %c0_i32 = arith.constant 0 : i32
    %c0_i32_0 = arith.constant 0 : i32
    %c0_i32_1 = arith.constant 0 : i32
    return %c0_i32, %c0_i32_0 : i32, i32
  }
  func.func @transform_6(%arg0: i32) -> (i32, i32) {
    %c0_i32 = arith.constant 0 : i32
    %c0_i32_0 = arith.constant 0 : i32
    %c0_i32_1 = arith.constant 0 : i32
    return %c0_i32, %c0_i32_0 : i32, i32
  }
  func.func @transform_7(%arg0: i32) -> (i32, i32) {
    %c0_i32 = arith.constant 0 : i32
    %c0_i32_0 = arith.constant 0 : i32
    %c0_i32_1 = arith.constant 0 : i32
    return %c0_i32, %c0_i32_0 : i32, i32
  }
  func.func @transform_8(%arg0: i32) -> (i32, i32) {
    %c0_i32 = arith.constant 0 : i32
    %c0_i32_0 = arith.constant 0 : i32
    %c0_i32_1 = arith.constant 0 : i32
    return %c0_i32, %c0_i32_0 : i32, i32
  }
  func.func @transform_9(%arg0: i32) -> (i32, i32) {
    %c0_i32 = arith.constant 0 : i32
    %c0_i32_0 = arith.constant 0 : i32
    %c0_i32_1 = arith.constant 0 : i32
    return %c0_i32, %c0_i32_0 : i32, i32
  }
  func.func @transform_10(%arg0: i32) -> (i32, i32) {
    %c0_i32 = arith.constant 0 : i32
    %c0_i32_0 = arith.constant 0 : i32
    %c0_i32_1 = arith.constant 0 : i32
    return %c0_i32, %c0_i32_0 : i32, i32
  }
  func.func @transform_11(%arg0: i32) -> (i32, i32) {
    %c0_i32 = arith.constant 0 : i32
    %c0_i32_0 = arith.constant 0 : i32
    %c0_i32_1 = arith.constant 0 : i32
    return %c0_i32, %c0_i32_0 : i32, i32
  }
  func.func @transform_12(%arg0: i32) -> (i32, i32) {
    %c0_i32 = arith.constant 0 : i32
    %c0_i32_0 = arith.constant 0 : i32
    %c0_i32_1 = arith.constant 0 : i32
    return %c0_i32, %c0_i32_0 : i32, i32
  }
  func.func @transform_13(%arg0: i32) -> (i32, i32) {
    %c0_i32 = arith.constant 0 : i32
    %c0_i32_0 = arith.constant 0 : i32
    %c0_i32_1 = arith.constant 0 : i32
    return %c0_i32, %c0_i32_0 : i32, i32
  }
  func.func @transform_14(%arg0: i32) -> (i32, i32) {
    %c0_i32 = arith.constant 0 : i32
    %c0_i32_0 = arith.constant 0 : i32
    %c0_i32_1 = arith.constant 0 : i32
    return %c0_i32, %c0_i32_0 : i32, i32
  }
  func.func @transform_15(%arg0: i32) -> (i32, i32) {
    %c0_i32 = arith.constant 0 : i32
    %c0_i32_0 = arith.constant 0 : i32
    %c0_i32_1 = arith.constant 0 : i32
    return %c0_i32, %c0_i32_0 : i32, i32
  }
  func.func @transform_16(%arg0: i32) -> (i32, i32) {
    %c0_i32 = arith.constant 0 : i32
    %c0_i32_0 = arith.constant 0 : i32
    %c0_i32_1 = arith.constant 0 : i32
    return %c0_i32, %c0_i32_0 : i32, i32
  }
  func.func @transform_17(%arg0: i32) -> (i32, i32) {
    %c0_i32 = arith.constant 0 : i32
    %c0_i32_0 = arith.constant 0 : i32
    %c0_i32_1 = arith.constant 0 : i32
    return %c0_i32, %c0_i32_0 : i32, i32
  }
  func.func @transform_18(%arg0: i32) -> (i32, i32) {
    %c0_i32 = arith.constant 0 : i32
    %c0_i32_0 = arith.constant 0 : i32
    %c0_i32_1 = arith.constant 0 : i32
    return %c0_i32, %c0_i32_0 : i32, i32
  }
  func.func @transform_19(%arg0: i32) -> (i32, i32) {
    %c0_i32 = arith.constant 0 : i32
    %c0_i32_0 = arith.constant 0 : i32
    %c0_i32_1 = arith.constant 0 : i32
    return %c0_i32, %c0_i32_0 : i32, i32
  }
  func.func @transform_20(%arg0: i32) -> (i32, i32, i32) {
    %c0_i32 = arith.constant 0 : i32
    %c0_i32_0 = arith.constant 0 : i32
    %c0_i32_1 = arith.constant 0 : i32
    return %arg0, %c0_i32, %c0_i32_0 : i32, i32, i32
  }
  func.func @transform_21(%arg0: i32) -> (i32, i32, i32, i32) {
    %c0_i32 = arith.constant 0 : i32
    %c0_i32_0 = arith.constant 0 : i32
    %c0_i32_1 = arith.constant 0 : i32
    %c0_i32_2 = arith.constant 0 : i32
    return %arg0, %c0_i32, %c0_i32_0, %c0_i32_1 : i32, i32, i32, i32
  }
}

</mosaic_0001>

<bundles_post_ra>
// kernel: decoder_forward.5
= control target key start
LH: loop header
LB: loop body
LE: loop exit
PB: predicated region body
PF: predicated region fallthrough
CT: control target
= control target key end

     0   :  { %8 = vsyncpa [#allocation3], 0  ;;  %s704_s0 = inlined_call_operand.vmem [shape: f32[16,32], index: 0, kind: input, shape index: {}]   ;;  %s705_s1 = inlined_call_operand.vmem [shape: bf16[32,16], index: 1, kind: input, shape index: {}]   ;;  %s706_s2 = inlined_call_operand.vmem [shape: f32[1,16], index: 2, kind: input, shape index: {}]   ;;  %s707_s3 = inlined_call_operand.hbm [shape: f32[16,16], index: 3, kind: output, shape index: {}]  }
   0x1   :  { %10 = vsyncpa [#allocation3 + $0x1], 0  ;;  %s583_s12 = smov 0   ;;  %s585_s13 = smov 0  }
   0x2   :  { %s587_s14 = smov 0   ;;  %s589_s15 = smov 0  }
   0x3   :  { %s591_s16 = smov 0   ;;  %s593_s17 = smov 0  }
   0x4 LB: > { %s393_s18 = sadd.s32 4294967295, %s558_s17   ;;  %s394_s19 = sadd.s32 4294967294, %s558_s17   ;;  %s558_s17 = sphi %s593_s17, %s16_s17   ;;  %s554_s16 = sphi %s591_s16, %s714_s16   ;;  %s550_s15 = sphi %s589_s15, %s713_s15   ;;  %s546_s14 = sphi %s587_s14, %s712_s14   ;;  %s542_s13 = sphi %s585_s13, %s711_s13   ;;  %s538_s12 = sphi %s583_s12, %s710_s12  }
   0x5   : > { %s28_s20 = sadd.s32 1, %s554_s16  ;;  %s115_s21 = sadd.s32 1, %s546_s14 }
   0x6   : > { %p30_p0 = scmp.ge.s32.totalorder %s28_s20, 2  ;;  %p125_p1 = scmp.ne.s32.totalorder %s546_s14, %s542_s13 }
   0x7   : > { %p126_p2 = scmp.eq.s32.totalorder %s393_s18, 1  ;;  %p131_p3 = scmp.ne.s32.totalorder %s542_s13, %s538_s12 }
   0x8   : > { %s716_s20 = smov (%p30_p0, %s28_s20), 0  ;;  %p132_p5 = scmp.eq.s32.totalorder %s394_s19, 1 }
   0x9   : > { %p623_p4 = por %p126_p2, %p125_p1  ;;  %s110_s23 = ssub.s32 %s554_s16, %s716_s20 }
   0xa   : > { %p399_p6 = scmp.ge.s32.totalorder %s558_s17, 1  ;;  %p113_p7 = scmp.eq.s32.totalorder %s110_s23, 0 }
   0xb   : > { %p630_p8 = por %p132_p5, %p131_p3  ;;  %p170_p9 = scmp.lt.s32.totalorder %s558_s17, 3 }
   0xc   : > { %s636_s25 = scalar_select %p113_p7, %s546_s14, %s115_s21  }
   0xd   : > { %p171_p10 = pnand %p399_p6, %p170_p9 }
   0xe   : > { %v478_v0 = vld [vmem:[%s705_s1] sm:$0xff] (!%p171_p10)   ;;  %v560_v1 = vmov (!%p171_p10), 0.0   ;;  %v479_v2 = vld [vmem:[%s705_s1 + $0x8] sm:$0xff] (!%p171_p10)   ;;  %vm561_vm0 = vmmov (!%p171_p10), 0   ;;  %p200_p11 = scmp.lt.s32.totalorder (!%p171_p10), %s550_s15, 1  ;;  %vm237_vm1 = vcmask (!%p171_p10), 261120  }
   0xf   : > { %174 = sbr.rel (%p171_p10) target bundleno = 257 (0x101), region = 32  ;;  %413 = vmatprep.subr.bf16.mxu0 (!%p171_p10), %v560_v1  ;;  %417 = vmatprep.mubr.msk.bf16.mxu0 (!%p171_p10), %vm561_vm0, %v560_v1  ;;  %s197_s8 = sand.u32 (!%p171_p10), 1, %s542_s13   ;;  %v402_v5 = vld [vmem:[%s706_s2] ss:$0 sm:$0xff] (!%p171_p10)  ;;  %vm281_vm2 = vcmask (!%p171_p10), 130048  }
  0x10   : > { %414 = vmatpush3.bf16.msra.mxu0 (!%p171_p10), %v478_v0  ;;  %s400_s9 = sshll.u32 (!%p171_p10), %s197_s8, 3  ;;  %s407_s18 = sshll.u32 (!%p171_p10), %s550_s15, 7 }
  0x11   : > { %415 = vmatprep.subr.bf16.mxu0 (!%p171_p10), %v560_v1  ;;  %s199_s19 = scalar_lea.vmem (!%p171_p10), [#allocation2], %s400_s9  ;;  %s657_s27 = scalar_lea.hbm (!%p171_p10), %s707_s3, %s407_s18 }
  0x12   : > { %s298_s21 = sshll.u32 (!%p171_p10), %s199_s19, 4  ;;  %s562_s29 = smov (!%p171_p10), [#allocation2]   ;;  %s659_s21 = int_to_ptr.vmem [resolvable:$true] %s298_s21 }
  0x13   : > { %s480_s28 = scalar_lea.vmem (!%p171_p10), %s659_s21, 128 }
  0x14   : > { %416 = vmatpush3.bf16.msra.mxu0 (!%p171_p10), %v479_v2  ;;  %p481_p12 = scmp.ne.s32.totalorder (!%p171_p10), %s659_s21, %s480_s28 }
  0x16   : > { %s201_s30 = scalar_select %p200_p11, %s550_s15, 1 }
  0x17   : > { %s284_s15 = scalar_lea.sflag [#allocation3], %s197_s8  ;;  %p482_p13 = pnand %p481_p12, %p623_p4 }
  0x18   : > { %s401_s4 = sshll.u32 %s201_s30, 3  ;;  %s484_s30 = sshll.u32 %s562_s29, 4  ;;  %s485_s30 = int_to_ptr.vmem [resolvable:$false] %s484_s30 }
  0x19   : > { %s203_s7 = scalar_lea.vmem %s704_s0, %s401_s4  ;;  %p483_p0 = pneg %p482_p13 }
  0x1a   : > { %v212_v3 = vld [vmem:[%s203_s7] sm:$0xff]  ;;  %s486_s4 = scalar_lea.vmem %s485_s30, 256  ;;  %p487_p1 = scmp.lt.s32.totalorder %s659_s21, %s485_s30 }
  0x1b   : > { %v213_v4 = vpack.c.bf16 %v212_v3, %v212_v3  ;;  %p488_p2 = scmp.lt.s32.totalorder %s486_s4, %s480_s28 }
  0x1d   : > { %418 = vmatmul.mubr.msk.bf16.vlgmr.msra.gmra.mrb[0].mxu0 %vm237_vm1, %v213_v4  ;;  %p489_p3 = por %p488_p2, %p487_p1 }
  0x1f   : > { %p490_p5 = pnand %p489_p3, %p483_p0 }
  0xf0   : > { %v275_v6 = vpop.f32.mrb[0].mxu0 }
  0xf1   : > { %v276_v7 = vadd.f32 %v402_v5, %v275_v6  ;;  %v419_v8 = vpop.f32.mrb[1].mxu0 }
  0xf2   : > { %v278_v9 = vpop.f32.mrb[2].mxu0 }
  0xf3   : > { %v420_v10 = vpop.f32.mrb[3].mxu0  ;;  %282 = vst.msk [vmem:[%s199_s19] sm:$0xff] %vm281_vm2, %v276_v7 }
  0xf4   : > { %493 = shalt.err (!%p490_p5)
}
  0xf5   : > { %s494_s5 = scalar_lea.hbm %s657_s27, 128  ;;  %s498_s8 = scalar_lea.hbm %s707_s3, 256 }
  0xf6   : > { %p495_p6 = scmp.ne.s32.totalorder %s657_s27, %s494_s5  ;;  %p499_p10 = scmp.lt.u32.totalorder %s657_s27, %s707_s3 }
  0xf7   : > { %p500_p11 = scmp.lt.u32.totalorder %s498_s8, %s494_s5  ;;  %p502_p13 = scmp.lt.u32.totalorder %s494_s5, %s657_s27 }
  0xf8   : > { %p496_p7 = pnand %p495_p6, %p623_p4 }
  0xf9   : > { %p501_p12 = por %p500_p11, %p499_p10 }
  0xfa   : > { %p497_p9 = pneg %p496_p7 }
  0xfb   : > { %p503_p0 = por %p502_p13, %p501_p12 }
  0xfd   : > { %p504_p1 = pnand %p503_p0, %p497_p9 }
  0xff   : > { %507 = shalt.err (!%p504_p1)
}
 0x100   : > { %421 = dma.vmem_to_hbm [thread:$0]  (%p623_p4), %s659_s21, 128, %s657_s27, %s284_s15  }
 0x101 PF: > { %p427_p2 = scmp.ge.s32.totalorder %s558_s17, 2  ;;  %s310_s11 = sand.u32 1, %s538_s12  }
 0x102   : > { %s311_s18 = scalar_lea.sflag [#allocation3], %s310_s11 }
 0x103   : > { %p424_p3 = pnand %p427_p2, %p630_p8 }
 0x105   : > { %533 = dma.done.wait (!%p424_p3), %s311_s18, 128  }
 0x106   : > { %535 = vsyncadd (!%p424_p3), %s311_s18, 4294967168  ;;  %s16_s17 = sadd.s32 1, %s558_s17   ;;  %s710_s12 = smov %s542_s13 }
 0x107   : > { %p13_p5 = scmp.ge.s32.totalorder %s16_s17, 4   ;;  %s711_s13 = smov %s546_s14 }
 0x108   : > { %s712_s14 = smov %s636_s25  ;;  %s713_s15 = smov %s554_s16 }
 0x109   : > { %s714_s16 = smov %s716_s20  ;;  %15 = sbr.rel (!%p13_p5) target bundleno = 4 (0x4), region = 73 }
 0x110   :  { %316 = vsyncpa [#allocation3], 1 }
 0x111   :  { %318 = vsyncpa [#allocation3 + $0x1], 1 }

// kernel: decoder_forward.3
= control target key start
LH: loop header
LB: loop body
LE: loop exit
PB: predicated region body
PF: predicated region fallthrough
CT: control target
= control target key end

     0   :  { %s3085_s0 = inlined_call_operand.vmem [shape: f32[2,8,32], index: 0, kind: input, shape index: {}]   ;;  %s3086_s1 = inlined_call_operand.vmem [shape: f32[2,8,32], index: 1, kind: input, shape index: {}]   ;;  %s3087_s2 = inlined_call_operand.vmem [shape: f32[2,1,8,8], index: 2, kind: input, shape index: {}]   ;;  %s3088_s3 = inlined_call_operand.vmem [shape: f32[2,1,1,8], index: 3, kind: input, shape index: {}]   ;;  %s3089_s4 = inlined_call_operand.vmem [shape: bf16[32,96], index: 4, kind: input, shape index: {}]   ;;  %s3090_s5 = inlined_call_operand.vmem [shape: f32[1,96], index: 5, kind: input, shape index: {}]   ;;  %s3091_s6 = inlined_call_operand.vmem [shape: bf16[32,32], index: 6, kind: input, shape index: {}]   ;;  %s3092_s7 = inlined_call_operand.vmem [shape: f32[1,32], index: 7, kind: input, shape index: {}]   ;;  %s3093_s8 = inlined_call_operand.vmem [shape: bf16[32,32], index: 8, kind: input, shape index: {}]   ;;  %s3094_s9 = inlined_call_operand.vmem [shape: f32[1,32], index: 9, kind: input, shape index: {}]   ;;  %s3095_s10 = inlined_call_operand.vmem [shape: bf16[32,64], index: 10, kind: input, shape index: {}]   ;;  %s3096_s11 = inlined_call_operand.vmem [shape: f32[1,64], index: 11, kind: input, shape index: {}]   ;;  %s3097_s12 = inlined_call_operand.vmem [shape: bf16[32,32], index: 12, kind: input, shape index: {}]   ;;  %s3098_s13 = inlined_call_operand.vmem [shape: f32[1,32], index: 13, kind: input, shape index: {}]   ;;  %s3099_s14 = inlined_call_operand.vmem [shape: bf16[32,64], index: 14, kind: input, shape index: {}]   ;;  %s3100_s15 = inlined_call_operand.vmem [shape: f32[1,64], index: 15, kind: input, shape index: {}]   ;;  %s3101_s16 = inlined_call_operand.vmem [shape: bf16[64,32], index: 16, kind: input, shape index: {}]   ;;  %s3102_s17 = inlined_call_operand.vmem [shape: f32[1,32], index: 17, kind: input, shape index: {}]   ;;  %s3103_s18 = inlined_call_operand.vmem [shape: f32[3,32], index: 18, kind: input, shape index: {}]   ;;  %s3104_s19 = inlined_call_operand.vmem [shape: f32[3,32], index: 19, kind: input, shape index: {}]   ;;  %s3105_s20 = inlined_call_operand.vmem [shape: f32[2,8,32], index: 20, kind: output, shape index: {}]  }
   0x1   :  { %3114 = sst [smem:[#allocation3_spill]] %s3085_s0 }
   0x2   :  { %3115 = sst [smem:[#allocation4_spill]] %s3086_s1  ;;  %s2754_s1 = smov 0  }
   0x3   :  { %3116 = sst [smem:[#allocation5_spill]] %s3087_s2 }
   0x4   :  { %3117 = sst [smem:[#allocation6_spill]] %s3088_s3 }
   0x5   :  { %3118 = sst [smem:[#allocation7_spill]] %s3089_s4 }
   0x6 LB: > { %s2271_s22 = sadd.s32 4294967295, %s2630_s1   ;;  %p2275_p0 = scmp.ge.s32.totalorder %s2630_s1, 1  ;;  %s2630_s1 = sphi %s2754_s1, %s30_s1  }
   0x7   : > { %p587_p1 = scmp.lt.s32.totalorder %s2630_s1, 3 }
   0x9   : > { %p588_p2 = pnand %p2275_p0, %p587_p1 }
   0xa   : > { %s3119_s2 = sld [smem:[#allocation7_spill]] (!%p588_p2)  ;;  %v2632_v1 = vmov (!%p588_p2), 0.0   ;;  %vm2633_vm0 = vmmov (!%p588_p2), 0   ;;  %p654_p3 = scmp.lt.s32.totalorder (!%p588_p2), %s2271_s22, 1  ;;  %vm702_vm1 = vcmask (!%p588_p2), 261120   ;;  %vm752_vm2 = vcmask (!%p588_p2), 64512  }
   0xb   : > { %591 = sbr.rel (%p588_p2) target bundleno = 4325 (0x10e5), region = 100  ;;  %2389 = vmatprep.subr.bf16.mxu1 (!%p588_p2), %v2632_v1  ;;  %2403 = vmatprep.subr.bf16.mxu0 (!%p588_p2), %v2632_v1  ;;  %s3120_s4 = sld [smem:[#allocation3_spill]] (!%p588_p2)  ;;  %v2280_v5 = vld [vmem:[%s3090_s5] ss:$0 sm:$0xff] (!%p588_p2)  ;;  %vm818_vm4 = vcmask (!%p588_p2), 1043456   ;;  %vm979_vm5 = vcmask (!%p588_p2), 130112  }
   0xc   : > { %2393 = vmatprep.mubr.msk.bf16.mxu1 (!%p588_p2), %vm2633_vm0, %v2632_v1  ;;  %2405 = vmatprep.mubr.msk.bf16.mxu0 (!%p588_p2), %vm2633_vm0, %v2632_v1  ;;  %s3113_s21 = smov (!%p588_p2), 96   ;;  %s2635_s23 = smov (!%p588_p2), 120   ;;  %vm1096_vm6 = vcmask (!%p588_p2), 195712   ;;  %vm1213_vm7 = vcmask (!%p588_p2), 261312   ;;  %vm2114_vm10 = vcmask (!%p588_p2), 523264  }
   0xd   : > { %s3107_s24 = smov (!%p588_p2), 88   ;;  %s3112_s25 = smov (!%p588_p2), 80  }
   0xe   : > { %s2638_s3 = smov (!%p588_p2), 112   ;;  %s3108_s27 = smov (!%p588_p2), 72  }
   0xf   : > { %s2640_s28 = smov (!%p588_p2), 104   ;;  %s3121_s30 = sld [smem:[#allocation5_spill]] (!%p588_p2) }
  0x10   : > { %v2570_v0 = vld [vmem:[%s3119_s2] sm:$0xff] (!%p588_p2)   ;;  %v2571_v2 = vld [vmem:[%s3119_s2 + $0x8] sm:$0xff] (!%p588_p2)  }
  0x11   : > { %2390 = vmatpush3.bf16.msra.mxu1 (!%p588_p2), %v2570_v0 }
  0x12   : > { %2391 = vmatprep.subr.bf16.mxu1 %v2632_v1  ;;  %s3132_s22 = smov (!%p654_p3, %s2271_s22), 1 }
  0x13   : > { %s2778_s26 = sshll.u32 %s3132_s22, 3 }
  0x14   : > { %s657_s29 = scalar_lea.vmem %s3120_s4, %s2778_s26  ;;  %s2641_s4 = smov 56  }
  0x15   : > { %2392 = vmatpush3.bf16.msra.mxu1 %v2571_v2  ;;  %v2785_v3 = vld [vmem:[%s657_s29] sm:$0xff]  ;;  %s665_s0 = scalar_lea.vmem %s3121_s30, %s2778_s26  ;;  %s2642_s29 = smov 64  }
  0x16   : > { %2397 = vmatprep.subr.bf16.mxu1 %v2632_v1  ;;  %v678_v4 = vpack.c.bf16 %v2785_v3, %v2785_v3  ;;  %v676_v25 = vld [vmem:[%s665_s0] sm:$0xff]  ;;  %s2643_s30 = smov 40   ;;  %s2644_s0 = smov 48  }
  0x17   : > { %vm799_vm3 = vcmp.eq.f32.partialorder %v676_v25, 0.0 }
  0x18   : > { %2394 = vmatmul.mubr.msk.bf16.vlgmr.msra.gmra.mrb[0].mxu1 %vm702_vm1, %v678_v4 }
  0x19   : > { %2399 = vmatprep.mubr.msk.bf16.mxu1 %vm2633_vm0, %v2632_v1 }
  0xeb   : > { %v740_v6 = vpop.f32.mrb[0].mxu1 }
  0xec   : > { %v741_v7 = vadd.f32 %v2280_v5, %v740_v6  ;;  %v2395_v8 = vpop.f32.mrb[1].mxu1 }
  0xed   : > { %v743_v9 = vpop.f32.mrb[2].mxu1 }
  0xee   : > { %v746_v10 = vmul.f32 0.35355338, %v741_v7  ;;  %v2795_v11 = vpack.c.bf16 %v741_v7, %v741_v7  ;;  %v2396_v12 = vpop.f32.mrb[3].mxu1 }
  0xf0   : > { %v747_v13 = vpack.c.bf16 %v746_v10, %v746_v10  ;;  %750 = vrot.lane.b32.xlu0 %v2795_v11, %s3113_s21 }
  0xf2   : > { %864 = vrot.lane.b32.xlu1 %v747_v13, %s2635_s23 }
  0xf4   : > { %866 = vrot.lane.b32.xlu0 %v2795_v11, %s3107_s24 }
  0xf6   : > { %983 = vrot.lane.b32.xlu1 %v2795_v11, %s3112_s25  ;;  %s3122_s25 = sld [smem:[#allocation4_spill]] }
  0xf8   : > { %981 = vrot.lane.b32.xlu0 %v747_v13, %s2638_s3 }
  0xfa   : > { %1100 = vrot.lane.b32.xlu1 %v2795_v11, %s3108_s27  ;;  %s3110_s27 = smov 16  }
  0xfc   : > { %1098 = vrot.lane.b32.xlu0 %v747_v13, %s2640_s28  ;;  %s661_s21 = scalar_lea.vmem %s3122_s25, %s2778_s26  ;;  %s3125_s25 = smov 80  }
 0x162   : > { %v751_v14 = vpop.permute.xlu0 %750 }
 0x163   : > { %v757_v15 = vsel %vm752_vm2, %v751_v14, 0 }
 0x164   : > { %2398 = vmatpush3.bf16.xpose.msra.mxu1 %v757_v15  ;;  %v865_v17 = vpop.permute.xlu1 %864 }
 0x165   : > { %2409 = vmatprep.subr.bf16.mxu1 %v2632_v1 }
 0x166   : > { %v867_v16 = vpop.permute.xlu0 %866 }
 0x167   : > { %v872_v18 = vsel %vm752_vm2, %v867_v16, 0 }
 0x168   : > { %v984_v19 = vpop.permute.xlu1 %983 }
 0x169   : > { %v989_v20 = vsel %vm752_vm2, %v984_v19, 0 }
 0x16a   : > { %v982_v22 = vpop.permute.xlu0 %981 }
 0x16b   : > { %2400 = vmatmul.mubr.msk.bf16.vlgmr.msra.gmra.mrb[4].mxu1 %vm752_vm2, %v747_v13 }
 0x16c   : > { %2410 = vmatpush3.bf16.xpose.msra.mxu1 %v872_v18  ;;  %2411 = vmatprep.mubr.msk.bf16.mxu1 %vm2633_vm0, %v2632_v1  ;;  %v1101_v21 = vpop.permute.xlu1 %1100 }
 0x16d   : > { %2421 = vmatprep.subr.bf16.mxu1 %v2632_v1  ;;  %v1106_v23 = vsel %vm752_vm2, %v1101_v21, 0 }
 0x16e   : > { %v1099_v24 = vpop.permute.xlu0 %1098 }
 0x173   : > { %2412 = vmatmul.mubr.msk.bf16.vlgmr.msra.gmra.mrb[8].mxu1 %vm752_vm2, %v865_v17 }
 0x174   : > { %2422 = vmatpush3.bf16.xpose.msra.mxu1 %v989_v20  ;;  %2423 = vmatprep.mubr.msk.bf16.mxu1 %vm2633_vm0, %v2632_v1 }
 0x175   : > { %2433 = vmatprep.subr.bf16.mxu1 %v2632_v1 }
 0x17b   : > { %2424 = vmatmul.mubr.msk.bf16.vlgmr.msra.gmra.mrb[12].mxu1 %vm752_vm2, %v982_v22 }
 0x17c   : > { %2434 = vmatpush3.bf16.xpose.msra.mxu1 %v1106_v23  ;;  %2435 = vmatprep.mubr.msk.bf16.mxu1 %vm2633_vm0, %v2632_v1 }
 0x17d   : > { %2445 = vmatprep.subr.bf16.mxu1 %v2632_v1 }
 0x183   : > { %2436 = vmatmul.mubr.msk.bf16.vlgmr.msra.gmra.mrb[16].mxu1 %vm752_vm2, %v1099_v24 }
 0x184   : > { %2449 = vmatprep.mubr.msk.bf16.mxu1 %vm2633_vm0, %v2632_v1 }
 0x23e   : > { %v793_v26 = vpop.f32.mrb[4].mxu1 }
 0x23f   : > { %v800_v27 = vsel %vm799_vm3, -1e+10, %v793_v26  ;;  %v2401_v28 = vpop.f32.mrb[5].mxu1 }
 0x240   : > { %v796_v29 = vpop.f32.mrb[6].mxu1  ;;  %v801_v30 = vsel %vm752_vm2, %v800_v27, -inf }
 0x241   : > { %802 = vmax.xlane.f32.xlu1 %v801_v30  ;;  %v2402_v31 = vpop.f32.mrb[7].mxu1 }
 0x246   : > { %v908_v32 = vpop.f32.mrb[8].mxu1 }
 0x247   : > { %v914_v33 = vsel %vm799_vm3, -1e+10, %v908_v32  ;;  %v2413_v34 = vpop.f32.mrb[9].mxu1 }
 0x248   : > { %v911_v35 = vpop.f32.mrb[10].mxu1  ;;  %v915_v36 = vsel %vm752_vm2, %v914_v33, -inf }
 0x249   : > { %916 = vmax.xlane.f32.xlu0 %v915_v36  ;;  %v2414_v37 = vpop.f32.mrb[11].mxu1 }
 0x24e   : > { %v1025_v38 = vpop.f32.mrb[12].mxu1 }
 0x24f   : > { %v1031_v39 = vsel %vm799_vm3, -1e+10, %v1025_v38  ;;  %v2425_v40 = vpop.f32.mrb[13].mxu1 }
 0x250   : > { %v1028_v41 = vpop.f32.mrb[14].mxu1  ;;  %v1032_v42 = vsel %vm752_vm2, %v1031_v39, -inf  ;;  %v2572_v40 = vld [vmem:[%s3091_s6] sm:$0xff]  }
 0x251   : > { %1033 = vmax.xlane.f32.xlu0 %v1032_v42  ;;  %v2426_v43 = vpop.f32.mrb[15].mxu1  ;;  %2446 = vmatpush3.bf16.msra.mxu1 %v2572_v40  ;;  %v2573_v41 = vld [vmem:[%s3091_s6 + $0x8] sm:$0xff]  }
 0x252   : > { %2447 = vmatprep.subr.bf16.mxu1 %v2632_v1 }
 0x255   : > { %2448 = vmatpush3.bf16.msra.mxu1 %v2573_v41 }
 0x256   : > { %v1142_v44 = vpop.f32.mrb[16].mxu1  ;;  %2461 = vmatprep.subr.bf16.mxu1 %v2632_v1 }
 0x257   : > { %v1148_v45 = vsel %vm799_vm3, -1e+10, %v1142_v44  ;;  %v2437_v46 = vpop.f32.mrb[17].mxu1 }
 0x258   : > { %v1145_v47 = vpop.f32.mrb[18].mxu1  ;;  %v1149_v48 = vsel %vm752_vm2, %v1148_v45, -inf }
 0x259   : > { %1150 = vmax.xlane.f32.xlu1 %v1149_v48  ;;  %v2438_v49 = vpop.f32.mrb[19].mxu1 }
 0x2ce   : > { %v803_v50 = vpop.xlane.xlu1 %802 }
 0x2cf   : > { %v804_v51 = vsub.f32 %v800_v27, %v803_v50 }
 0x2d1   : > { %v805_v52 = vmul.f32 1.442695, %v804_v51 }
 0x2d3   : > { %2586 = vpow2.f32 %v805_v52 }
 0x2d6   : > { %v917_v53 = vpop.xlane.xlu0 %916 }
 0x2d7   : > { %v918_v54 = vsub.f32 %v914_v33, %v917_v53 }
 0x2d9   : > { %v919_v55 = vmul.f32 1.442695, %v918_v54 }
 0x2db   : > { %2588 = vpow2.f32 %v919_v55  ;;  %v2292_v55 = vld [vmem:[%s3092_s7] ss:$0 sm:$0xff] }
 0x2dd   : > { %v2587_v56 = vpop.eup %2586 }
 0x2de   : > { %v1034_v57 = vpop.xlane.xlu0 %1033  ;;  %v807_v58 = vsel %vm752_vm2, %v2587_v56, 0.0 }
 0x2df   : > { %v1035_v59 = vsub.f32 %v1031_v39, %v1034_v57  ;;  %808 = vadd.xlane.f32.xlu0 %v807_v58 }
 0x2e1   : > { %v1036_v60 = vmul.f32 1.442695, %v1035_v59 }
 0x2e3   : > { %2590 = vpow2.f32 %v1036_v60 }
 0x2e5   : > { %v2589_v61 = vpop.eup %2588 }
 0x2e6   : > { %v921_v62 = vsel %vm752_vm2, %v2589_v61, 0.0  ;;  %v1151_v2 = vpop.xlane.xlu1 %1150 }
 0x2e7   : > { %922 = vadd.xlane.f32.xlu1 %v921_v62  ;;  %v1152_v4 = vsub.f32 %v1148_v45, %v1151_v2 }
 0x2e9   : > { %v1153_v5 = vmul.f32 1.442695, %v1152_v4 }
 0x2eb   : > { %2592 = vpow2.f32 %v1153_v5 }
 0x2ed   : > { %v2591_v63 = vpop.eup %2590 }
 0x2ee   : > { %v1038_v0 = vsel %vm752_vm2, %v2591_v63, 0.0 }
 0x2ef   : > { %1039 = vadd.xlane.f32.xlu0 %v1038_v0 }
 0x2f5   : > { %v2593_v6 = vpop.eup %2592 }
 0x2f6   : > { %v1155_v7 = vsel %vm752_vm2, %v2593_v6, 0.0 }
 0x2f8   : > { %927 = vrot.lane.b32.xlu1 %v2795_v11, %s2641_s4  ;;  %s3111_s4 = smov 8  }
 0x305   : > { %813 = vrot.lane.b32.xlu0 %v2795_v11, %s2642_s29  ;;  %s3109_s29 = smov 24  }
 0x309   : > { %1161 = vrot.lane.b32.xlu0 %v2795_v11, %s2643_s30  ;;  %s3127_s30 = smov 88  }
 0x31c   : > { %1156 = vadd.xlane.f32.xlu1 %v1155_v7  ;;  %v675_v7 = vld [vmem:[%s661_s21] sm:$0xff] }
 0x32d   : > { %1044 = vrot.lane.b32.xlu1 %v2795_v11, %s2644_s0  ;;  %s3128_s0 = smov 8  }
 0x36c   : > { %v809_v8 = vpop.xlane.xlu0 %808 }
 0x36d   : > { %2594 = vrcp.f32 %v809_v8  ;;  %v1377_v8 = vpack.c.bf16 %v675_v7, %v675_v7 }
 0x374   : > { %v923_v9 = vpop.xlane.xlu1 %922 }
 0x375   : > { %2596 = vrcp.f32 %v923_v9  ;;  %v2576_v9 = vld [vmem:[%s3093_s8] sm:$0xff]  }
 0x377   : > { %v2595_v10 = vpop.eup %2594 }
 0x378   : > { %v811_v13 = vmul.f32 %v2595_v10, %v2587_v56  ;;  %v928_v16 = vpop.permute.xlu1 %927  ;;  %v2577_v10 = vld [vmem:[%s3093_s8 + $0x8] sm:$0xff]  }
 0x379   : > { %v933_v19 = vsel %vm818_vm4, %v928_v16, 0  ;;  %v2296_v16 = vld [vmem:[%s3103_s18] ss:$0 sm:$0xff] }
 0x37a   : > { %v812_v17 = vpack.c.bf16 %v811_v13, %v811_v13 }
 0x37c   : > { %v1040_v12 = vpop.xlane.xlu0 %1039 }
 0x37d   : > { %2598 = vrcp.f32 %v1040_v12 }
 0x37f   : > { %v2597_v18 = vpop.eup %2596 }
 0x380   : > { %v814_v14 = vpop.permute.xlu0 %813  ;;  %v925_v11 = vmul.f32 %v2597_v18, %v2589_v61  ;;  %v2297_v18 = vld [vmem:[%s3104_s19] ss:$0 sm:$0xff] }
 0x381   : > { %v820_v15 = vsel %vm818_vm4, %v814_v14, 0 }
 0x382   : > { %2404 = vmatpush3.bf16.msra.mxu0 %v820_v15  ;;  %v926_v20 = vpack.c.bf16 %v925_v11, %v925_v11 }
 0x383   : > { %2415 = vmatprep.subr.bf16.mxu0 %v2632_v1 }
 0x384   : > { %v1162_v26 = vpop.permute.xlu0 %1161 }
 0x385   : > { %2406 = vmatmul.mubr.msk.bf16.vlgmr.msra.gmra.mrb[0].mxu0 %vm752_vm2, %v812_v17  ;;  %v1167_v28 = vsel %vm818_vm4, %v1162_v26, 0 }
 0x386   : > { %2416 = vmatpush3.bf16.msra.mxu0 %v933_v19  ;;  %2417 = vmatprep.mubr.msk.bf16.mxu0 %vm2633_vm0, %v2632_v1 }
 0x387   : > { %2427 = vmatprep.subr.bf16.mxu0 %v2632_v1  ;;  %v2599_v21 = vpop.eup %2598 }
 0x388   : > { %v1042_v23 = vmul.f32 %v2599_v21, %v2591_v63  ;;  %v2302_v21 = vld [vmem:[%s3096_s11] ss:$0 sm:$0xff] }
 0x38a   : > { %v1043_v27 = vpack.c.bf16 %v1042_v23, %v1042_v23 }
 0x38d   : > { %2418 = vmatmul.mubr.msk.bf16.vlgmr.msra.gmra.mrb[4].mxu0 %vm752_vm2, %v926_v20 }
 0x38e   : > { %2429 = vmatprep.mubr.msk.bf16.mxu0 %vm2633_vm0, %v2632_v1 }
 0x3a9   : > { %v1157_v22 = vpop.xlane.xlu1 %1156 }
 0x3aa   : > { %2600 = vrcp.f32 %v1157_v22 }
 0x3ad   : > { %v1045_v24 = vpop.permute.xlu1 %1044 }
 0x3ae   : > { %v1050_v25 = vsel %vm818_vm4, %v1045_v24, 0 }
 0x3af   : > { %2428 = vmatpush3.bf16.msra.mxu0 %v1050_v25 }
 0x3b0   : > { %2439 = vmatprep.subr.bf16.mxu0 %v2632_v1 }
 0x3b2   : > { %2430 = vmatmul.mubr.msk.bf16.vlgmr.msra.gmra.mrb[8].mxu0 %vm752_vm2, %v1043_v27 }
 0x3b3   : > { %2440 = vmatpush3.bf16.msra.mxu0 %v1167_v28  ;;  %2441 = vmatprep.mubr.msk.bf16.mxu0 %vm2633_vm0, %v2632_v1 }
 0x3b4   : > { %v2601_v29 = vpop.eup %2600  ;;  %2453 = vmatprep.subr.bf16.mxu0 %v2632_v1 }
 0x3b5   : > { %v1159_v30 = vmul.f32 %v2601_v29, %v2593_v6  ;;  %v2574_v6 = vld [vmem:[%s3095_s10] sm:$0xff]  }
 0x3b6   : > { %v2298_v29 = vld [vmem:[%s3094_s9] ss:$0 sm:$0xff] }
 0x3b7   : > { %v1160_v31 = vpack.c.bf16 %v1159_v30, %v1159_v30 }
 0x3ba   : > { %2442 = vmatmul.mubr.msk.bf16.vlgmr.msra.gmra.mrb[12].mxu0 %vm752_vm2, %v1160_v31 }
 0x3bb   : > { %2457 = vmatprep.mubr.msk.bf16.mxu0 %vm2633_vm0, %v2632_v1  ;;  %2454 = vmatpush3.bf16.msra.mxu0 %v2576_v9 }
 0x3bc   : > { %2455 = vmatprep.subr.bf16.mxu0 %v2632_v1 }
 0x3bf   : > { %2456 = vmatpush3.bf16.msra.mxu0 %v2577_v10 }
 0x3c0   : > { %2469 = vmatprep.subr.bf16.mxu0 %v2632_v1 }
 0x458   : > { %v856_v32 = vpop.f32.mrb[0].mxu0 }
 0x459   : > { %862 = vst.msk [vmem:[#allocation2] sm:$0xff] %vm752_vm2, %v856_v32  ;;  %v2407_v33 = vpop.f32.mrb[1].mxu0 }
 0x45a   : > { %v859_v34 = vpop.f32.mrb[2].mxu0 }
 0x45b   : > { %v2408_v35 = vpop.f32.mrb[3].mxu0 }
 0x460   : > { %v969_v36 = vpop.f32.mrb[4].mxu0 }
 0x461   : > { %976 = vrot.lane.b32.xlu1 %v969_v36, %s3111_s4  ;;  %v2419_v37 = vpop.f32.mrb[5].mxu0  ;;  %s3126_s4 = smov 72  }
 0x462   : > { %v972_v38 = vpop.f32.mrb[6].mxu0 }
 0x463   : > { %v2420_v39 = vpop.f32.mrb[7].mxu0 }
 0x485   : > { %v1086_v42 = vpop.f32.mrb[8].mxu0 }
 0x486   : > { %1093 = vrot.lane.b32.xlu0 %v1086_v42, %s3110_s27  ;;  %v2431_v43 = vpop.f32.mrb[9].mxu0 }
 0x487   : > { %v1089_v44 = vpop.f32.mrb[10].mxu0 }
 0x488   : > { %v2432_v45 = vpop.f32.mrb[11].mxu0 }
 0x48d   : > { %v1203_v46 = vpop.f32.mrb[12].mxu0 }
 0x48e   : > { %1210 = vrot.lane.b32.xlu1 %v1203_v46, %s3109_s29  ;;  %v2443_v47 = vpop.f32.mrb[13].mxu0  ;;  %v1495_v46 = vlaneseq }
 0x48f   : > { %v1206_v48 = vpop.f32.mrb[14].mxu0 }
 0x490   : > { %v2444_v49 = vpop.f32.mrb[15].mxu0  ;;  %v1496_v48 = vshrl.u32 %v1495_v46, 7 }
 0x492   : > { %v1497_v49 = vsub.s32 0, %v1496_v48 }
 0x4d3   : > { %v977_v50 = vpop.permute.xlu1 %976 }
 0x4d4   : > { %980 = vst.msk [vmem:[#allocation2] sm:$0xff] %vm979_vm5, %v977_v50  ;;  %v2648_v50 = vmov 0  }
 0x4f8   : > { %v1094_v51 = vpop.permute.xlu0 %1093 }
 0x4f9   : > { %1097 = vst.msk [vmem:[#allocation2] sm:$0xff] %vm1096_vm6, %v1094_v51 }
 0x500   : > { %v1211_v52 = vpop.permute.xlu1 %1210 }
 0x501   : > { %1214 = vst.msk [vmem:[#allocation2] sm:$0xff] %vm1213_vm7, %v1211_v52 }
 0x508   : > { %v1215_v53 = vld [vmem:[#allocation2] sm:$0xff] }
 0x509   : > { %v1216_v54 = vpack.c.bf16 %v1215_v53, %v1215_v53 }
 0x50b   : > { %2450 = vmatmul.mubr.msk.bf16.vlgmr.msra.gmra.mrb[20].mxu1 %vm702_vm1, %v1216_v54 }
 0x50c   : > { %2465 = vmatprep.mubr.msk.bf16.mxu1 %vm2633_vm0, %v2632_v1  ;;  %2462 = vmatpush3.bf16.msra.mxu1 %v2574_v6 }
 0x50d   : > { %2463 = vmatprep.subr.bf16.mxu1 %v2632_v1 }
 0x5de   : > { %v1277_v56 = vpop.f32.mrb[20].mxu1 }
 0x5df   : > { %v1278_v57 = vadd.f32 %v2292_v55, %v1277_v56  ;;  %v2451_v58 = vpop.f32.mrb[21].mxu1 }
 0x5e0   : > { %v1280_v59 = vpop.f32.mrb[22].mxu1 }
 0x5e1   : > { %v2452_v60 = vpop.f32.mrb[23].mxu1  ;;  %v1283_v61 = vadd.f32 %v1278_v57, %v2785_v3  ;;  %v2575_v3 = vld [vmem:[%s3095_s10 + $0x8] sm:$0xff]  }
 0x5e2   : > { %2464 = vmatpush3.bf16.msra.mxu1 %v2575_v3 }
 0x5e3   : > { %v1286_v62 = vsel %vm702_vm1, %v1283_v61, 0.0  ;;  %2475 = vmatprep.subr.bf16.mxu1 %v2632_v1 }
 0x5e4   : > { %1287 = vadd.xlane.f32.xlu0 %v1286_v62 }
 0x5e5   : > { %2466 = vmatmul.mubr.msk.bf16.vlgmr.msra.gmra.mrb[24].mxu1 %vm702_vm1, %v1377_v8 }
 0x5e6   : > { %2477 = vmatprep.mubr.msk.bf16.mxu1 %vm2633_vm0, %v2632_v1 }
 0x671   : > { %v1288_v63 = vpop.xlane.xlu0 %1287 }
 0x672   : > { %v1290_v0 = vmul.f32 0.03125, %v1288_v63 }
 0x674   : > { %v1291_v2 = vsub.f32 %v1283_v61, %v1290_v0 }
 0x676   : > { %v1292_v4 = vmul.f32 %v1291_v2, %v1291_v2 }
 0x678   : > { %v1293_v5 = vsel %vm702_vm1, %v1292_v4, 0.0 }
 0x679   : > { %1294 = vadd.xlane.f32.xlu1 %v1293_v5 }
 0x6b8   : > { %v1438_v22 = vpop.f32.mrb[24].mxu1 }
 0x6b9   : > { %v1439_v23 = vadd.f32 %v2302_v21, %v1438_v22  ;;  %v2467_v24 = vpop.f32.mrb[25].mxu1 }
 0x6ba   : > { %v1441_v25 = vpop.f32.mrb[26].mxu1 }
 0x6bb   : > { %v2931_v26 = vpack.c.bf16 %v1439_v23, %v1439_v23  ;;  %v2468_v27 = vpop.f32.mrb[27].mxu1 }
 0x6bd   : > { %1566 = vrot.lane.b32.xlu0 %v2931_v26, %s2635_s23  ;;  %v1451_v28 = vsel %vm752_vm2, %v2931_v26, 0 }
 0x6c1   : > { %1682 = vrot.lane.b32.xlu0 %v2931_v26, %s2638_s3 }
 0x6c5   : > { %1798 = vrot.lane.b32.xlu0 %v2931_v26, %s2640_s28 }
 0x706   : > { %v1295_v12 = vpop.xlane.xlu1 %1294 }
 0x707   : > { %v1296_v13 = vmul.f32 0.03125, %v1295_v12 }
 0x709   : > { %v1297_v14 = vadd.f32 1e-05, %v1296_v13 }
 0x70b   : > { %2602 = vrsqrt.f32 %v1297_v14 }
 0x715   : > { %v2603_v15 = vpop.eup %2602 }
 0x716   : > { %v1299_v17 = vmul.f32 %v2603_v15, %v1291_v2 }
 0x718   : > { %v1304_v19 = vmul.f32 %v2296_v16, %v1299_v17 }
 0x71a   : > { %v2921_v11 = vadd.f32 %v2297_v18, %v1304_v19 }
 0x71c   : > { %v1310_v20 = vpack.c.bf16 %v2921_v11, %v2921_v11 }
 0x71e   : > { %2458 = vmatmul.mubr.msk.bf16.vlgmr.msra.gmra.mrb[16].mxu0 %vm702_vm1, %v1310_v20 }
 0x71f   : > { %2471 = vmatprep.mubr.msk.bf16.mxu0 %vm2633_vm0, %v2632_v1  ;;  %2470 = vmatpush3.bf16.xpose.msra.mxu0 %v1451_v28 }
 0x720   : > { %2481 = vmatprep.subr.bf16.mxu0 %v2632_v1 }
 0x72f   : > { %v1567_v36 = vpop.permute.xlu0 %1566 }
 0x730   : > { %v1572_v38 = vsel %vm752_vm2, %v1567_v36, 0 }
 0x733   : > { %v1683_v39 = vpop.permute.xlu0 %1682 }
 0x734   : > { %v1688_v41 = vsel %vm752_vm2, %v1683_v39, 0 }
 0x737   : > { %v1799_v42 = vpop.permute.xlu0 %1798 }
 0x738   : > { %v1804_v44 = vsel %vm752_vm2, %v1799_v42, 0 }
 0x7f1   : > { %v1371_v30 = vpop.f32.mrb[16].mxu0 }
 0x7f2   : > { %v1372_v31 = vadd.f32 %v2298_v29, %v1371_v30  ;;  %v2459_v32 = vpop.f32.mrb[17].mxu0 }
 0x7f3   : > { %v1374_v33 = vpop.f32.mrb[18].mxu0 }
 0x7f4   : > { %v1444_v34 = vmul.f32 0.35355338, %v1372_v31  ;;  %v2460_v35 = vpop.f32.mrb[19].mxu0 }
 0x7f6   : > { %v1445_v37 = vpack.c.bf16 %v1444_v34, %v1444_v34 }
 0x7f8   : > { %1564 = vrot.lane.b32.xlu1 %v1445_v37, %s2635_s23  ;;  %2472 = vmatmul.mubr.msk.bf16.vlgmr.msra.gmra.mrb[20].mxu0 %vm752_vm2, %v1445_v37 }
 0x7f9   : > { %2482 = vmatpush3.bf16.xpose.msra.mxu0 %v1572_v38  ;;  %2483 = vmatprep.mubr.msk.bf16.mxu0 %vm2633_vm0, %v2632_v1 }
 0x7fa   : > { %2493 = vmatprep.subr.bf16.mxu0 %v2632_v1 }
 0x7fc   : > { %1680 = vrot.lane.b32.xlu1 %v1445_v37, %s2638_s3  ;;  %s3129_s3 = smov 16  }
 0x800   : > { %1796 = vrot.lane.b32.xlu1 %v1445_v37, %s2640_s28  ;;  %s3123_s28 = sld [smem:[#allocation6_spill]] }
 0x806   : > { %s668_s21 = scalar_lea.vmem %s3123_s28, %s3132_s22  ;;  %s3124_s22 = smov 96  }
 0x807   : > { %v677_v47 = vld [vmem:[%s668_s21] sm:$0x1]  ;;  %s3130_s28 = smov 24  }
 0x808   : > { %vm1493_vm8 = vcmp.eq.f32.partialorder %v677_v47, 0.0 }
 0x809   : > { %v1494_v51 = vsel %vm1493_vm8, 1, %v2648_v50 }
 0x80a   : > { %v1498_v52 = vrot.slane %v1494_v51, %v1497_v49 }
 0x80c   : > { %vm1499_vm9 = vcmp.eq.s32.totalorder %v1498_v52, 1 }
 0x86a   : > { %v1565_v40 = vpop.permute.xlu1 %1564 }
 0x86b   : > { %2484 = vmatmul.mubr.msk.bf16.vlgmr.msra.gmra.mrb[24].mxu0 %vm752_vm2, %v1565_v40 }
 0x86c   : > { %2494 = vmatpush3.bf16.xpose.msra.mxu0 %v1688_v41  ;;  %2495 = vmatprep.mubr.msk.bf16.mxu0 %vm2633_vm0, %v2632_v1 }
 0x86d   : > { %2505 = vmatprep.subr.bf16.mxu0 %v2632_v1 }
 0x86e   : > { %v1681_v43 = vpop.permute.xlu1 %1680 }
 0x872   : > { %v1797_v45 = vpop.permute.xlu1 %1796 }
 0x873   : > { %2496 = vmatmul.mubr.msk.bf16.vlgmr.msra.gmra.mrb[28].mxu0 %vm752_vm2, %v1681_v43 }
 0x874   : > { %2506 = vmatpush3.bf16.xpose.msra.mxu0 %v1804_v44  ;;  %2507 = vmatprep.mubr.msk.bf16.mxu0 %vm2633_vm0, %v2632_v1 }
 0x875   : > { %2517 = vmatprep.subr.bf16.mxu0 %v2632_v1 }
 0x87b   : > { %2508 = vmatmul.mubr.msk.bf16.vlgmr.msra.gmra.mrb[32].mxu0 %vm752_vm2, %v1797_v45 }
 0x87c   : > { %2521 = vmatprep.mubr.msk.bf16.mxu0 %vm2633_vm0, %v2632_v1 }
 0x8cb   : > { %v1487_v53 = vpop.f32.mrb[20].mxu0 }
 0x8cc   : > { %v1500_v54 = vsel %vm1499_vm9, -1e+10, %v1487_v53  ;;  %v2473_v55 = vpop.f32.mrb[21].mxu0 }
 0x8cd   : > { %v1490_v56 = vpop.f32.mrb[22].mxu0  ;;  %v1501_v57 = vsel %vm752_vm2, %v1500_v54, -inf }
 0x8ce   : > { %1502 = vmax.xlane.f32.xlu0 %v1501_v57  ;;  %v2474_v58 = vpop.f32.mrb[23].mxu0 }
 0x93e   : > { %v1608_v59 = vpop.f32.mrb[24].mxu0 }
 0x93f   : > { %v1614_v60 = vsel %vm1499_vm9, -1e+10, %v1608_v59  ;;  %v2485_v61 = vpop.f32.mrb[25].mxu0 }
 0x940   : > { %v1611_v62 = vpop.f32.mrb[26].mxu0  ;;  %v1615_v63 = vsel %vm752_vm2, %v1614_v60, -inf }
 0x941   : > { %1616 = vmax.xlane.f32.xlu1 %v1615_v63  ;;  %v2486_v0 = vpop.f32.mrb[27].mxu0 }
 0x946   : > { %v1724_v2 = vpop.f32.mrb[28].mxu0 }
 0x947   : > { %v1730_v4 = vsel %vm1499_vm9, -1e+10, %v1724_v2  ;;  %v2497_v5 = vpop.f32.mrb[29].mxu0 }
 0x948   : > { %v1727_v6 = vpop.f32.mrb[30].mxu0  ;;  %v1731_v3 = vsel %vm752_vm2, %v1730_v4, -inf  ;;  %v2578_v5 = vld [vmem:[%s3097_s12] sm:$0xff]  }
 0x949   : > { %1732 = vmax.xlane.f32.xlu0 %v1731_v3  ;;  %v2498_v7 = vpop.f32.mrb[31].mxu0  ;;  %2518 = vmatpush3.bf16.msra.mxu0 %v2578_v5  ;;  %v2579_v6 = vld [vmem:[%s3097_s12 + $0x8] sm:$0xff]  }
 0x94a   : > { %2519 = vmatprep.subr.bf16.mxu0 %v2632_v1 }
 0x94d   : > { %2520 = vmatpush3.bf16.msra.mxu0 %v2579_v6 }
 0x94e   : > { %v1840_v8 = vpop.f32.mrb[32].mxu0  ;;  %2533 = vmatprep.subr.bf16.mxu0 %v2632_v1 }
 0x94f   : > { %v1846_v9 = vsel %vm1499_vm9, -1e+10, %v1840_v8  ;;  %v2509_v10 = vpop.f32.mrb[33].mxu0 }
 0x950   : > { %v1843_v12 = vpop.f32.mrb[34].mxu0  ;;  %v1847_v13 = vsel %vm752_vm2, %v1846_v9, -inf }
 0x951   : > { %1848 = vmax.xlane.f32.xlu0 %v1847_v13  ;;  %v2510_v14 = vpop.f32.mrb[35].mxu0 }
 0x95b   : > { %v1503_v15 = vpop.xlane.xlu0 %1502 }
 0x95c   : > { %v1504_v16 = vsub.f32 %v1500_v54, %v1503_v15 }
 0x95e   : > { %v1505_v17 = vmul.f32 1.442695, %v1504_v16 }
 0x960   : > { %2604 = vpow2.f32 %v1505_v17 }
 0x96a   : > { %v2605_v18 = vpop.eup %2604 }
 0x96b   : > { %v1507_v19 = vsel %vm752_vm2, %v2605_v18, 0.0 }
 0x96c   : > { %1508 = vadd.xlane.f32.xlu1 %v1507_v19 }
 0x97d   : > { %1514 = vrot.lane.b32.xlu1 %v2931_v26, %s3124_s22 }
 0x9ce   : > { %v1617_v20 = vpop.xlane.xlu1 %1616 }
 0x9cf   : > { %v1618_v21 = vsub.f32 %v1614_v60, %v1617_v20  ;;  %v2314_v20 = vld [vmem:[%s3098_s13] ss:$0 sm:$0xff] }
 0x9d1   : > { %v1619_v22 = vmul.f32 1.442695, %v1618_v21 }
 0x9d3   : > { %2606 = vpow2.f32 %v1619_v22 }
 0x9d6   : > { %v1733_v23 = vpop.xlane.xlu0 %1732 }
 0x9d7   : > { %v1734_v24 = vsub.f32 %v1730_v4, %v1733_v23 }
 0x9d9   : > { %v1735_v25 = vmul.f32 1.442695, %v1734_v24 }
 0x9db   : > { %2608 = vpow2.f32 %v1735_v25 }
 0x9dd   : > { %v2607_v27 = vpop.eup %2606 }
 0x9de   : > { %v1849_v28 = vpop.xlane.xlu0 %1848  ;;  %v1621_v29 = vsel %vm752_vm2, %v2607_v27, 0.0 }
 0x9df   : > { %v1850_v30 = vsub.f32 %v1846_v9, %v1849_v28  ;;  %1622 = vadd.xlane.f32.xlu0 %v1621_v29 }
 0x9e1   : > { %v1851_v31 = vmul.f32 1.442695, %v1850_v30 }
 0x9e3   : > { %2610 = vpow2.f32 %v1851_v31 }
 0x9e5   : > { %v2609_v32 = vpop.eup %2608 }
 0x9e6   : > { %v1737_v33 = vsel %vm752_vm2, %v2609_v32, 0.0 }
 0x9e7   : > { %1738 = vadd.xlane.f32.xlu1 %v1737_v33 }
 0x9ed   : > { %v2611_v34 = vpop.eup %2610 }
 0x9ee   : > { %v1853_v35 = vsel %vm752_vm2, %v2611_v34, 0.0 }
 0x9ef   : > { %1854 = vadd.xlane.f32.xlu0 %v1853_v35  ;;  %v2581_v35 = vld [vmem:[%s3099_s14 + $0x8] sm:$0xff]  }
 0x9f8   : > { %1743 = vrot.lane.b32.xlu1 %v2931_v26, %s3125_s25 }
 0x9f9   : > { %v1509_v36 = vpop.xlane.xlu1 %1508 }
 0x9fa   : > { %2612 = vrcp.f32 %v1509_v36  ;;  %v2583_v36 = vld [vmem:[%s3101_s16 + $0x8] sm:$0xff]  }
 0x9fc   : > { %1859 = vrot.lane.b32.xlu1 %v2931_v26, %s3126_s4 }
 0x9fd   : > { %v1515_v37 = vpop.permute.xlu1 %1514 }
 0x9fe   : > { %v1520_v38 = vsel %vm818_vm4, %v1515_v37, 0 }
 0x9ff   : > { %2476 = vmatpush3.bf16.msra.mxu1 %v1520_v38 }
 0xa00   : > { %2487 = vmatprep.subr.bf16.mxu1 %v2632_v1 }
 0xa04   : > { %v2613_v39 = vpop.eup %2612 }
 0xa05   : > { %v1511_v40 = vmul.f32 %v2613_v39, %v2605_v18  ;;  %1627 = vrot.lane.b32.xlu0 %v2931_v26, %s3127_s30  ;;  %s672_s30 = scalar_lea.vmem %s3105_s20, %s2778_s26 }
 0xa07   : > { %v1512_v41 = vpack.c.bf16 %v1511_v40, %v1511_v40 }
 0xa09   : > { %2478 = vmatmul.mubr.msk.bf16.vlgmr.msra.gmra.mrb[28].mxu1 %vm752_vm2, %v1512_v41  ;;  %v2318_v41 = vld [vmem:[%s3103_s18 + $0x1] ss:$0 sm:$0xff] }
 0xa0a   : > { %2489 = vmatprep.mubr.msk.bf16.mxu1 %vm2633_vm0, %v2632_v1 }
 0xa6c   : > { %v1623_v42 = vpop.xlane.xlu0 %1622 }
 0xa6d   : > { %2614 = vrcp.f32 %v1623_v42 }
 0xa74   : > { %v1739_v43 = vpop.xlane.xlu1 %1738 }
 0xa75   : > { %2616 = vrcp.f32 %v1739_v43  ;;  %v2319_v43 = vld [vmem:[%s3104_s19 + $0x1] ss:$0 sm:$0xff] }
 0xa77   : > { %v2615_v44 = vpop.eup %2614 }
 0xa78   : > { %v1625_v46 = vmul.f32 %v2615_v44, %v2607_v27  ;;  %v1744_v49 = vpop.permute.xlu1 %1743 }
 0xa79   : > { %v1749_v51 = vsel %vm818_vm4, %v1744_v49, 0  ;;  %v2320_v49 = vld [vmem:[%s3100_s15] ss:$0 sm:$0xff] }
 0xa7a   : > { %v1626_v26 = vpack.c.bf16 %v1625_v46, %v1625_v46 }
 0xa7c   : > { %v1855_v45 = vpop.xlane.xlu0 %1854  ;;  %v1860_v53 = vpop.permute.xlu1 %1859 }
 0xa7d   : > { %2618 = vrcp.f32 %v1855_v45  ;;  %v1865_v56 = vsel %vm818_vm4, %v1860_v53, 0 }
 0xa7f   : > { %v2617_v50 = vpop.eup %2616 }
 0xa80   : > { %v1628_v47 = vpop.permute.xlu0 %1627  ;;  %v1741_v52 = vmul.f32 %v2617_v50, %v2609_v32 }
 0xa81   : > { %v1633_v48 = vsel %vm818_vm4, %v1628_v47, 0  ;;  %v2584_v47 = vld [vmem:[%s3101_s16 + $0x10] sm:$0xff]  }
 0xa82   : > { %2488 = vmatpush3.bf16.msra.mxu1 %v1633_v48  ;;  %v1742_v54 = vpack.c.bf16 %v1741_v52, %v1741_v52  ;;  %v2585_v48 = vld [vmem:[%s3101_s16 + $0x18] sm:$0xff]  }
 0xa83   : > { %2499 = vmatprep.subr.bf16.mxu1 %v2632_v1 }
 0xa85   : > { %2490 = vmatmul.mubr.msk.bf16.vlgmr.msra.gmra.mrb[32].mxu1 %vm752_vm2, %v1626_v26 }
 0xa86   : > { %2500 = vmatpush3.bf16.msra.mxu1 %v1749_v51  ;;  %2501 = vmatprep.mubr.msk.bf16.mxu1 %vm2633_vm0, %v2632_v1 }
 0xa87   : > { %2511 = vmatprep.subr.bf16.mxu1 %v2632_v1  ;;  %v2619_v55 = vpop.eup %2618 }
 0xa88   : > { %v1857_v57 = vmul.f32 %v2619_v55, %v2611_v34  ;;  %v2580_v34 = vld [vmem:[%s3099_s14] sm:$0xff]  }
 0xa8a   : > { %v1858_v58 = vpack.c.bf16 %v1857_v57, %v1857_v57 }
 0xa8d   : > { %2502 = vmatmul.mubr.msk.bf16.vlgmr.msra.gmra.mrb[36].mxu1 %vm752_vm2, %v1742_v54 }
 0xa8e   : > { %2512 = vmatpush3.bf16.msra.mxu1 %v1865_v56  ;;  %2513 = vmatprep.mubr.msk.bf16.mxu1 %vm2633_vm0, %v2632_v1 }
 0xa8f   : > { %2525 = vmatprep.subr.bf16.mxu1 %v2632_v1 }
 0xa95   : > { %2514 = vmatmul.mubr.msk.bf16.vlgmr.msra.gmra.mrb[40].mxu1 %vm752_vm2, %v1858_v58 }
 0xa96   : > { %2529 = vmatprep.mubr.msk.bf16.mxu1 %vm2633_vm0, %v2632_v1  ;;  %2526 = vmatpush3.bf16.msra.mxu1 %v2580_v34 }
 0xa97   : > { %2527 = vmatprep.subr.bf16.mxu1 %v2632_v1 }
 0xa9a   : > { %2528 = vmatpush3.bf16.msra.mxu1 %v2581_v35 }
 0xadc   : > { %v1556_v59 = vpop.f32.mrb[28].mxu1 }
 0xadd   : > { %1562 = vst.msk [vmem:[#allocation2] sm:$0xff] %vm752_vm2, %v1556_v59  ;;  %v2479_v60 = vpop.f32.mrb[29].mxu1 }
 0xade   : > { %v1559_v61 = vpop.f32.mrb[30].mxu1 }
 0xadf   : > { %v2480_v62 = vpop.f32.mrb[31].mxu1 }
 0xb58   : > { %v1669_v63 = vpop.f32.mrb[32].mxu1 }
 0xb59   : > { %1676 = vrot.lane.b32.xlu0 %v1669_v63, %s3128_s0  ;;  %v2491_v0 = vpop.f32.mrb[33].mxu1 }
 0xb5a   : > { %v1672_v2 = vpop.f32.mrb[34].mxu1 }
 0xb5b   : > { %v2492_v4 = vpop.f32.mrb[35].mxu1 }
 0xb60   : > { %v1785_v3 = vpop.f32.mrb[36].mxu1 }
 0xb61   : > { %1792 = vrot.lane.b32.xlu1 %v1785_v3, %s3129_s3  ;;  %v2503_v7 = vpop.f32.mrb[37].mxu1 }
 0xb62   : > { %v1788_v8 = vpop.f32.mrb[38].mxu1 }
 0xb63   : > { %v2504_v9 = vpop.f32.mrb[39].mxu1 }
 0xb64   : > { %v2330_v9 = vld [vmem:[%s3103_s18 + $0x2] ss:$0 sm:$0xff] }
 0xb68   : > { %v1901_v10 = vpop.f32.mrb[40].mxu1 }
 0xb69   : > { %1908 = vrot.lane.b32.xlu0 %v1901_v10, %s3130_s28  ;;  %v2515_v12 = vpop.f32.mrb[41].mxu1 }
 0xb6a   : > { %v1904_v13 = vpop.f32.mrb[42].mxu1  ;;  %v2331_v12 = vld [vmem:[%s3104_s19 + $0x2] ss:$0 sm:$0xff] }
 0xb6b   : > { %v2516_v14 = vpop.f32.mrb[43].mxu1 }
 0xbcb   : > { %v1677_v15 = vpop.permute.xlu0 %1676 }
 0xbcc   : > { %1679 = vst.msk [vmem:[#allocation2] sm:$0xff] %vm979_vm5, %v1677_v15 }
 0xbd3   : > { %v1793_v16 = vpop.permute.xlu1 %1792 }
 0xbd4   : > { %1795 = vst.msk [vmem:[#allocation2] sm:$0xff] %vm1096_vm6, %v1793_v16 }
 0xbdb   : > { %v1909_v17 = vpop.permute.xlu0 %1908 }
 0xbdc   : > { %1911 = vst.msk [vmem:[#allocation2] sm:$0xff] %vm1213_vm7, %v1909_v17 }
 0xbe3   : > { %v1912_v18 = vld [vmem:[#allocation2] sm:$0xff] }
 0xbe4   : > { %v1913_v19 = vpack.c.bf16 %v1912_v18, %v1912_v18 }
 0xbe6   : > { %2522 = vmatmul.mubr.msk.bf16.vlgmr.msra.gmra.mrb[36].mxu0 %vm702_vm1, %v1913_v19 }
 0xbe7   : > { %2541 = vmatprep.mubr.msk.bf16.mxu0 %vm2633_vm0, %v2632_v1 }
 0xcb9   : > { %v1974_v21 = vpop.f32.mrb[36].mxu0 }
 0xcba   : > { %v1975_v22 = vadd.f32 %v2314_v20, %v1974_v21  ;;  %v2523_v23 = vpop.f32.mrb[37].mxu0 }
 0xcbb   : > { %v1977_v24 = vpop.f32.mrb[38].mxu0 }
 0xcbc   : > { %v2524_v25 = vpop.f32.mrb[39].mxu0  ;;  %v1980_v27 = vadd.f32 %v1975_v22, %v2921_v11  ;;  %v2582_v11 = vld [vmem:[%s3101_s16] sm:$0xff]  }
 0xcbd   : > { %2534 = vmatpush3.bf16.msra.mxu0 %v2582_v11 }
 0xcbe   : > { %v1983_v28 = vsel %vm702_vm1, %v1980_v27, 0.0  ;;  %2535 = vmatprep.subr.bf16.mxu0 %v2632_v1 }
 0xcbf   : > { %1984 = vadd.xlane.f32.xlu1 %v1983_v28 }
 0xcc1   : > { %2536 = vmatpush3.bf16.msra.mxu0 %v2583_v36 }
 0xcc2   : > { %2537 = vmatprep.subr.bf16.mxu0 %v2632_v1 }
 0xcc5   : > { %2538 = vmatpush3.bf16.msra.mxu0 %v2584_v47 }
 0xcc6   : > { %2539 = vmatprep.subr.bf16.mxu0 %v2632_v1  ;;  %v2324_v1 = vld [vmem:[%s3102_s17] ss:$0 sm:$0xff] }
 0xcc9   : > { %2540 = vmatpush3.bf16.msra.mxu0 %v2585_v48 }
 0xd4c   : > { %v1985_v29 = vpop.xlane.xlu1 %1984 }
 0xd4d   : > { %v1986_v30 = vmul.f32 0.03125, %v1985_v29 }
 0xd4f   : > { %v1987_v31 = vsub.f32 %v1980_v27, %v1986_v30 }
 0xd51   : > { %v1988_v32 = vmul.f32 %v1987_v31, %v1987_v31 }
 0xd53   : > { %v1989_v33 = vsel %vm702_vm1, %v1988_v32, 0.0 }
 0xd54   : > { %1990 = vadd.xlane.f32.xlu0 %v1989_v33 }
 0xde1   : > { %v1991_v37 = vpop.xlane.xlu0 %1990 }
 0xde2   : > { %v1992_v38 = vmul.f32 0.03125, %v1991_v37 }
 0xde4   : > { %v1993_v39 = vadd.f32 1e-05, %v1992_v38 }
 0xde6   : > { %2620 = vrsqrt.f32 %v1993_v39 }
 0xdf0   : > { %v2621_v40 = vpop.eup %2620 }
 0xdf1   : > { %v1995_v42 = vmul.f32 %v2621_v40, %v1987_v31 }
 0xdf3   : > { %v2000_v44 = vmul.f32 %v2318_v41, %v1995_v42 }
 0xdf5   : > { %v2005_v45 = vadd.f32 %v2319_v43, %v2000_v44 }
 0xdf7   : > { %v2006_v46 = vpack.c.bf16 %v2005_v45, %v2005_v45 }
 0xdf9   : > { %2530 = vmatmul.mubr.msk.bf16.vlgmr.msra.gmra.mrb[44].mxu1 %vm702_vm1, %v2006_v46 }
 0xecc   : > { %v2067_v26 = vpop.f32.mrb[44].mxu1 }
 0xecd   : > { %v2068_v50 = vadd.f32 %v2320_v49, %v2067_v26  ;;  %v2531_v51 = vpop.f32.mrb[45].mxu1 }
 0xece   : > { %v2070_v52 = vpop.f32.mrb[46].mxu1 }
 0xecf   : > { %v2073_v53 = vmax.f32 %v2068_v50, 0.0  ;;  %v2532_v54 = vpop.f32.mrb[47].mxu1 }
 0xed1   : > { %v2074_v55 = vpack.c.bf16 %v2073_v53, %v2073_v53 }
 0xed3   : > { %2542 = vmatmul.mubr.msk.bf16.vlgmr.msra.gmra.mrb[40].mxu0 %vm2114_vm10, %v2074_v55 }
 0xfa6   : > { %v2152_v56 = vpop.f32.mrb[40].mxu0 }
 0xfa7   : > { %v2153_v57 = vadd.f32 %v2324_v1, %v2152_v56  ;;  %v2543_v58 = vpop.f32.mrb[41].mxu0 }
 0xfa8   : > { %v2155_v59 = vpop.f32.mrb[42].mxu0 }
 0xfa9   : > { %v2544_v60 = vpop.f32.mrb[43].mxu0  ;;  %v2158_v61 = vadd.f32 %v2153_v57, %v2005_v45 }
 0xfab   : > { %v2161_v62 = vsel %vm702_vm1, %v2158_v61, 0.0 }
 0xfac   : > { %2162 = vadd.xlane.f32.xlu0 %v2161_v62 }
0x1039   : > { %v2163_v63 = vpop.xlane.xlu0 %2162 }
0x103a   : > { %v2164_v0 = vmul.f32 0.03125, %v2163_v63 }
0x103c   : > { %v2165_v2 = vsub.f32 %v2158_v61, %v2164_v0 }
0x103e   : > { %v2166_v4 = vmul.f32 %v2165_v2, %v2165_v2 }
0x1040   : > { %v2167_v5 = vsel %vm702_vm1, %v2166_v4, 0.0 }
0x1041   : > { %2168 = vadd.xlane.f32.xlu1 %v2167_v5 }
0x10ce   : > { %v2169_v6 = vpop.xlane.xlu1 %2168 }
0x10cf   : > { %v2170_v3 = vmul.f32 0.03125, %v2169_v6 }
0x10d1   : > { %v2171_v7 = vadd.f32 1e-05, %v2170_v3 }
0x10d3   : > { %2622 = vrsqrt.f32 %v2171_v7 }
0x10dd   : > { %v2623_v8 = vpop.eup %2622 }
0x10de   : > { %v2173_v10 = vmul.f32 %v2623_v8, %v2165_v2 }
0x10e0   : > { %v2178_v13 = vmul.f32 %v2330_v9, %v2173_v10 }
0x10e2   : > { %v2183_v14 = vadd.f32 %v2331_v12, %v2178_v13 }
0x10e4   : > { %2184 = vst.msk [vmem:[%s672_s30] sm:$0xff] %vm702_vm1, %v2183_v14 }
0x10e5 PF: > { %s30_s1 = sadd.s32 1, %s2630_s1  }
0x10e6   : > { %p27_p4 = scmp.ge.s32.totalorder %s30_s1, 4  }
0x10e8   :  { %29 = sbr.rel (!%p27_p4) target bundleno = 6 (0x6), region = 139 }

// kernel: decoder_forward.4
= control target key start
LH: loop header
LB: loop body
LE: loop exit
PB: predicated region body
PF: predicated region fallthrough
CT: control target
= control target key end

     0   :  { %s3391_s0 = inlined_call_operand.vmem [shape: f32[2,8,32], index: 0, kind: input, shape index: {}]   ;;  %s3392_s1 = inlined_call_operand.vmem [shape: f32[2,8,32], index: 1, kind: input, shape index: {}]   ;;  %s3393_s2 = inlined_call_operand.vmem [shape: f32[2,1,8,8], index: 2, kind: input, shape index: {}]   ;;  %s3394_s3 = inlined_call_operand.vmem [shape: f32[2,1,1,8], index: 3, kind: input, shape index: {}]   ;;  %s3395_s4 = inlined_call_operand.vmem [shape: bf16[32,96], index: 4, kind: input, shape index: {}]   ;;  %s3396_s5 = inlined_call_operand.vmem [shape: f32[1,96], index: 5, kind: input, shape index: {}]   ;;  %s3397_s6 = inlined_call_operand.vmem [shape: bf16[32,32], index: 6, kind: input, shape index: {}]   ;;  %s3398_s7 = inlined_call_operand.vmem [shape: f32[1,32], index: 7, kind: input, shape index: {}]   ;;  %s3399_s8 = inlined_call_operand.vmem [shape: bf16[32,32], index: 8, kind: input, shape index: {}]   ;;  %s3400_s9 = inlined_call_operand.vmem [shape: f32[1,32], index: 9, kind: input, shape index: {}]   ;;  %s3401_s10 = inlined_call_operand.vmem [shape: bf16[32,64], index: 10, kind: input, shape index: {}]   ;;  %s3402_s11 = inlined_call_operand.vmem [shape: f32[1,64], index: 11, kind: input, shape index: {}]   ;;  %s3403_s12 = inlined_call_operand.vmem [shape: bf16[32,32], index: 12, kind: input, shape index: {}]   ;;  %s3404_s13 = inlined_call_operand.vmem [shape: f32[1,32], index: 13, kind: input, shape index: {}]   ;;  %s3405_s14 = inlined_call_operand.vmem [shape: bf16[32,64], index: 14, kind: input, shape index: {}]   ;;  %s3406_s15 = inlined_call_operand.vmem [shape: f32[1,64], index: 15, kind: input, shape index: {}]   ;;  %s3407_s16 = inlined_call_operand.vmem [shape: bf16[64,32], index: 16, kind: input, shape index: {}]   ;;  %s3408_s17 = inlined_call_operand.vmem [shape: f32[1,32], index: 17, kind: input, shape index: {}]   ;;  %s3409_s18 = inlined_call_operand.vmem [shape: f32[3,32], index: 18, kind: input, shape index: {}]   ;;  %s3410_s19 = inlined_call_operand.vmem [shape: f32[3,32], index: 19, kind: input, shape index: {}]   ;;  %s3411_s20 = inlined_call_operand.vmem [shape: f32[2,8,32], index: 20, kind: output, shape index: {0}]   ;;  %s3412_s21 = inlined_call_operand.hbm [shape: f32[2,4,8,8], index: 21, kind: output, shape index: {1}]  }
   0x1   :  { %3433 = sst [smem:[#allocation9_spill]] %s3391_s0 }
   0x2   :  { %3434 = sst [smem:[#allocation10_spill]] %s3392_s1 }
   0x3   :  { %3435 = sst [smem:[#allocation11_spill]] %s3393_s2 }
   0x4   :  { %3436 = sst [smem:[#allocation12_spill]] %s3394_s3 }
   0x5   :  { %3437 = sst [smem:[#allocation13_spill]] %s3395_s4 }
   0x6   :  { %3438 = sst [smem:[#allocation14_spill]] %s3396_s5 }
   0x7   :  { %3439 = sst [smem:[#allocation15_spill]] %s3397_s6 }
   0x8   :  { %3440 = sst [smem:[#allocation16_spill]] %s3398_s7 }
   0x9   :  { %3441 = sst [smem:[#allocation17_spill]] %s3399_s8 }
   0xa   :  { %27 = vsyncpa [#allocation4], 0 }
   0xb   :  { %29 = vsyncpa [#allocation4 + $0x1], 0  ;;  %s2955_s2 = smov 0   ;;  %s2957_s25 = smov 0  }
   0xc   :  { %s2959_s26 = smov 0   ;;  %s2961_s27 = smov 0  }
   0xd LB: > { %3442 = sst [smem:[#allocation6_spill]] %s2820_s26  ;;  %s2976_s3 = sadd.s32 4294967295, %s2824_s27   ;;  %s2824_s27 = sphi %s2961_s27, %s3467_s27   ;;  %s2820_s26 = sphi %s2959_s26, %s3469_s26   ;;  %s2816_s25 = sphi %s2957_s25, %s3471_s25   ;;  %s2812_s2 = sphi %s2955_s2, %s3470_s2  }
   0xe   : > { %s2370_s28 = sadd.s32 4294967294, %s2824_s27   ;;  %s2980_s29 = sadd.s32 1, %s2824_s27  }
   0xf   : > { %3443 = sst [smem:[#allocation7_spill]] %s2980_s29  ;;  %s508_s0 = sadd.s32 1, %s2820_s26 }
  0x10   : > { %s505_s4 = ssub.s32 %s2824_s27, %s2980_s29  ;;  %p518_p0 = scmp.ne.s32.totalorder %s2820_s26, %s2816_s25 }
  0x11   : > { %p506_p1 = scmp.eq.s32.totalorder %s505_s4, 0  ;;  %p519_p2 = scmp.eq.s32.totalorder %s2976_s3, 1 }
  0x12   : > { %p524_p3 = scmp.ne.s32.totalorder %s2816_s25, %s2812_s2  ;;  %p525_p4 = scmp.eq.s32.totalorder %s2370_s28, 1 }
  0x13   : > { %s2991_s30 = scalar_select %p506_p1, %s2820_s26, %s508_s0  }
  0x14   : > { %p2993_p5 = por %p519_p2, %p518_p0  ;;  %p2997_p6 = por %p525_p4, %p524_p3 }
  0x15   : > { %3444 = sst [smem:[#allocation8_spill]] %s2991_s30  ;;  %p2373_p7 = scmp.ge.s32.totalorder %s2824_s27, 1 }
  0x16   : > { %p618_p8 = scmp.lt.s32.totalorder %s2824_s27, 3 }
  0x18   : > { %p619_p9 = pnand %p2373_p7, %p618_p8 }
  0x19   : > { %s3447_s24 = sld [smem:[#allocation13_spill]] (!%p619_p9)  ;;  %v2826_v1 = vmov (!%p619_p9), 0.0   ;;  %vm2827_vm0 = vmmov (!%p619_p9), 0   ;;  %p692_p10 = scmp.lt.s32.totalorder (!%p619_p9), %s2976_s3, 1  ;;  %vm740_vm1 = vcmask (!%p619_p9), 261120   ;;  %vm790_vm2 = vcmask (!%p619_p9), 64512  }
  0x1a   : > { %622 = sbr.rel (%p619_p9) target bundleno = 4341 (0x10f5), region = 100  ;;  %2495 = vmatprep.subr.bf16.mxu1 (!%p619_p9), %v2826_v1  ;;  %2509 = vmatprep.subr.bf16.mxu0 (!%p619_p9), %v2826_v1  ;;  %s3448_s0 = sld [smem:[#allocation9_spill]] (!%p619_p9)  ;;  %vm856_vm4 = vcmask (!%p619_p9), 1043456   ;;  %vm1017_vm5 = vcmask (!%p619_p9), 130112   ;;  %vm1134_vm6 = vcmask (!%p619_p9), 195712   ;;  %vm1251_vm7 = vcmask (!%p619_p9), 261312  }
  0x1b   : > { %2499 = vmatprep.mubr.msk.bf16.mxu1 (!%p619_p9), %vm2827_vm0, %v2826_v1  ;;  %2511 = vmatprep.mubr.msk.bf16.mxu0 (!%p619_p9), %vm2827_vm0, %v2826_v1  ;;  %s3449_s29 = sld [smem:[#allocation14_spill]] (!%p619_p9)  ;;  %s3430_s1 = smov (!%p619_p9), 120   ;;  %vm2159_vm10 = vcmask (!%p619_p9), 523264  }
  0x1c   : > { %s3418_s28 = smov (!%p619_p9), 88   ;;  %s3420_s26 = smov (!%p619_p9), 80  }
  0x1d   : > { %s3419_s30 = smov (!%p619_p9), 72   ;;  %s3451_s6 = sld [smem:[#allocation15_spill]] (!%p619_p9) }
  0x1e   : > { %s3452_s7 = sld [smem:[#allocation16_spill]] (!%p619_p9)  ;;  %s3454_s8 = sld [smem:[#allocation17_spill]] (!%p619_p9) }
  0x1f   : > { %v2708_v0 = vld [vmem:[%s3447_s24] sm:$0xff] (!%p619_p9)   ;;  %v2709_v2 = vld [vmem:[%s3447_s24 + $0x8] sm:$0xff] (!%p619_p9)  }
  0x20   : > { %2496 = vmatpush3.bf16.msra.mxu1 (!%p619_p9), %v2708_v0 }
  0x21   : > { %2497 = vmatprep.subr.bf16.mxu1 %v2826_v1  ;;  %s3018_s4 = scalar_select %p692_p10, %s2976_s3, 1  ;;  %v2379_v5 = vld [vmem:[%s3449_s29] ss:$0 sm:$0xff] }
  0x22   : > { %s3424_s29 = smov 112  }
  0x23   : > { %s3021_s23 = sshll.u32 %s3018_s4, 3 }
  0x24   : > { %2498 = vmatpush3.bf16.msra.mxu1 %v2709_v2  ;;  %s695_s24 = scalar_lea.vmem %s3448_s0, %s3021_s23  ;;  %s3422_s0 = smov 104  }
  0x25   : > { %2503 = vmatprep.subr.bf16.mxu1 %v2826_v1  ;;  %v3028_v3 = vld [vmem:[%s695_s24] sm:$0xff]  ;;  %s3421_s24 = smov 96  }
  0x26   : > { %v716_v4 = vpack.c.bf16 %v3028_v3, %v3028_v3 }
  0x28   : > { %2500 = vmatmul.mubr.msk.bf16.vlgmr.msra.gmra.mrb[0].mxu1 %vm740_vm1, %v716_v4 }
  0x29   : > { %2505 = vmatprep.mubr.msk.bf16.mxu1 %vm2827_vm0, %v2826_v1 }
  0xfb   : > { %v778_v6 = vpop.f32.mrb[0].mxu1 }
  0xfc   : > { %v779_v7 = vadd.f32 %v2379_v5, %v778_v6  ;;  %v2501_v8 = vpop.f32.mrb[1].mxu1 }
  0xfd   : > { %v781_v9 = vpop.f32.mrb[2].mxu1 }
  0xfe   : > { %v784_v10 = vmul.f32 0.35355338, %v779_v7  ;;  %v3038_v11 = vpack.c.bf16 %v779_v7, %v779_v7  ;;  %v2502_v12 = vpop.f32.mrb[3].mxu1 }
 0x100   : > { %v785_v13 = vpack.c.bf16 %v784_v10, %v784_v10  ;;  %788 = vrot.lane.b32.xlu0 %v3038_v11, %s3421_s24 }
 0x102   : > { %902 = vrot.lane.b32.xlu1 %v785_v13, %s3430_s1  ;;  %s3453_s1 = sld [smem:[#allocation10_spill]] }
 0x104   : > { %904 = vrot.lane.b32.xlu0 %v3038_v11, %s3418_s28  ;;  %s2836_s28 = smov 64  }
 0x106   : > { %1021 = vrot.lane.b32.xlu1 %v3038_v11, %s3420_s26  ;;  %s3450_s26 = sld [smem:[#allocation11_spill]] }
 0x108   : > { %1019 = vrot.lane.b32.xlu0 %v785_v13, %s3424_s29  ;;  %s3427_s29 = smov 16  }
 0x10a   : > { %1138 = vrot.lane.b32.xlu1 %v3038_v11, %s3419_s30  ;;  %s2838_s30 = smov 48  }
 0x10c   : > { %1136 = vrot.lane.b32.xlu0 %v785_v13, %s3422_s0  ;;  %s703_s24 = scalar_lea.vmem %s3450_s26, %s3021_s23  ;;  %s2837_s26 = smov 40  }
 0x10d   : > { %v714_v25 = vld [vmem:[%s703_s24] sm:$0xff]  ;;  %s2835_s24 = smov 56   ;;  %s3458_s0 = sld [smem:[#allocation12_spill]] }
 0x10e   : > { %vm837_vm3 = vcmp.eq.f32.partialorder %v714_v25, 0.0 }
 0x172   : > { %v789_v14 = vpop.permute.xlu0 %788 }
 0x173   : > { %v795_v15 = vsel %vm790_vm2, %v789_v14, 0 }
 0x174   : > { %2504 = vmatpush3.bf16.xpose.msra.mxu1 %v795_v15  ;;  %v903_v17 = vpop.permute.xlu1 %902 }
 0x175   : > { %2515 = vmatprep.subr.bf16.mxu1 %v2826_v1 }
 0x176   : > { %v905_v16 = vpop.permute.xlu0 %904 }
 0x177   : > { %v910_v18 = vsel %vm790_vm2, %v905_v16, 0 }
 0x178   : > { %v1022_v19 = vpop.permute.xlu1 %1021 }
 0x179   : > { %v1027_v20 = vsel %vm790_vm2, %v1022_v19, 0 }
 0x17a   : > { %v1020_v22 = vpop.permute.xlu0 %1019 }
 0x17b   : > { %2506 = vmatmul.mubr.msk.bf16.vlgmr.msra.gmra.mrb[4].mxu1 %vm790_vm2, %v785_v13 }
 0x17c   : > { %2516 = vmatpush3.bf16.xpose.msra.mxu1 %v910_v18  ;;  %2517 = vmatprep.mubr.msk.bf16.mxu1 %vm2827_vm0, %v2826_v1  ;;  %v1139_v21 = vpop.permute.xlu1 %1138 }
 0x17d   : > { %2527 = vmatprep.subr.bf16.mxu1 %v2826_v1  ;;  %v1144_v23 = vsel %vm790_vm2, %v1139_v21, 0 }
 0x17e   : > { %v1137_v24 = vpop.permute.xlu0 %1136 }
 0x183   : > { %2518 = vmatmul.mubr.msk.bf16.vlgmr.msra.gmra.mrb[8].mxu1 %vm790_vm2, %v903_v17 }
 0x184   : > { %2528 = vmatpush3.bf16.xpose.msra.mxu1 %v1027_v20  ;;  %2529 = vmatprep.mubr.msk.bf16.mxu1 %vm2827_vm0, %v2826_v1 }
 0x185   : > { %2539 = vmatprep.subr.bf16.mxu1 %v2826_v1 }
 0x18b   : > { %2530 = vmatmul.mubr.msk.bf16.vlgmr.msra.gmra.mrb[12].mxu1 %vm790_vm2, %v1020_v22 }
 0x18c   : > { %2540 = vmatpush3.bf16.xpose.msra.mxu1 %v1144_v23  ;;  %2541 = vmatprep.mubr.msk.bf16.mxu1 %vm2827_vm0, %v2826_v1 }
 0x18d   : > { %2551 = vmatprep.subr.bf16.mxu1 %v2826_v1 }
 0x193   : > { %2542 = vmatmul.mubr.msk.bf16.vlgmr.msra.gmra.mrb[16].mxu1 %vm790_vm2, %v1137_v24 }
 0x194   : > { %2555 = vmatprep.mubr.msk.bf16.mxu1 %vm2827_vm0, %v2826_v1 }
 0x24e   : > { %v831_v26 = vpop.f32.mrb[4].mxu1 }
 0x24f   : > { %v838_v27 = vsel %vm837_vm3, -1e+10, %v831_v26  ;;  %v2507_v28 = vpop.f32.mrb[5].mxu1 }
 0x250   : > { %v834_v29 = vpop.f32.mrb[6].mxu1  ;;  %v839_v30 = vsel %vm790_vm2, %v838_v27, -inf }
 0x251   : > { %840 = vmax.xlane.f32.xlu1 %v839_v30  ;;  %v2508_v31 = vpop.f32.mrb[7].mxu1 }
 0x256   : > { %v946_v32 = vpop.f32.mrb[8].mxu1 }
 0x257   : > { %v952_v33 = vsel %vm837_vm3, -1e+10, %v946_v32  ;;  %v2519_v34 = vpop.f32.mrb[9].mxu1 }
 0x258   : > { %v949_v35 = vpop.f32.mrb[10].mxu1  ;;  %v953_v36 = vsel %vm790_vm2, %v952_v33, -inf }
 0x259   : > { %954 = vmax.xlane.f32.xlu0 %v953_v36  ;;  %v2520_v37 = vpop.f32.mrb[11].mxu1 }
 0x25e   : > { %v1063_v38 = vpop.f32.mrb[12].mxu1 }
 0x25f   : > { %v1069_v39 = vsel %vm837_vm3, -1e+10, %v1063_v38  ;;  %v2531_v40 = vpop.f32.mrb[13].mxu1 }
 0x260   : > { %v1066_v41 = vpop.f32.mrb[14].mxu1  ;;  %v1070_v42 = vsel %vm790_vm2, %v1069_v39, -inf  ;;  %v2710_v40 = vld [vmem:[%s3451_s6] sm:$0xff]  }
 0x261   : > { %1071 = vmax.xlane.f32.xlu0 %v1070_v42  ;;  %v2532_v43 = vpop.f32.mrb[15].mxu1  ;;  %2552 = vmatpush3.bf16.msra.mxu1 %v2710_v40  ;;  %v2711_v41 = vld [vmem:[%s3451_s6 + $0x8] sm:$0xff]   ;;  %s699_s6 = scalar_lea.vmem %s3453_s1, %s3021_s23  ;;  %s3432_s1 = sand.u32 1, %s2816_s25  }
 0x262   : > { %2553 = vmatprep.subr.bf16.mxu1 %v2826_v1 }
 0x265   : > { %2554 = vmatpush3.bf16.msra.mxu1 %v2711_v41 }
 0x266   : > { %v1180_v44 = vpop.f32.mrb[16].mxu1  ;;  %2567 = vmatprep.subr.bf16.mxu1 %v2826_v1 }
 0x267   : > { %v1186_v45 = vsel %vm837_vm3, -1e+10, %v1180_v44  ;;  %v2543_v46 = vpop.f32.mrb[17].mxu1 }
 0x268   : > { %v1183_v47 = vpop.f32.mrb[18].mxu1  ;;  %v1187_v48 = vsel %vm790_vm2, %v1186_v45, -inf }
 0x269   : > { %1188 = vmax.xlane.f32.xlu1 %v1187_v48  ;;  %v2544_v49 = vpop.f32.mrb[19].mxu1 }
 0x2de   : > { %v841_v50 = vpop.xlane.xlu1 %840 }
 0x2df   : > { %v842_v51 = vsub.f32 %v838_v27, %v841_v50 }
 0x2e1   : > { %v843_v52 = vmul.f32 1.442695, %v842_v51 }
 0x2e3   : > { %2724 = vpow2.f32 %v843_v52 }
 0x2e6   : > { %v955_v53 = vpop.xlane.xlu0 %954 }
 0x2e7   : > { %v956_v54 = vsub.f32 %v952_v33, %v955_v53 }
 0x2e9   : > { %v957_v55 = vmul.f32 1.442695, %v956_v54 }
 0x2eb   : > { %2726 = vpow2.f32 %v957_v55  ;;  %v2391_v55 = vld [vmem:[%s3452_s7] ss:$0 sm:$0xff]  ;;  %s2439_s7 = sshll.u32 %s2976_s3, 9  ;;  %s2843_s3 = smov [#allocation3]  }
 0x2ed   : > { %v2725_v56 = vpop.eup %2724 }
 0x2ee   : > { %v1072_v57 = vpop.xlane.xlu0 %1071  ;;  %v845_v58 = vsel %vm790_vm2, %v2725_v56, 0.0 }
 0x2ef   : > { %v1073_v59 = vsub.f32 %v1069_v39, %v1072_v57  ;;  %846 = vadd.xlane.f32.xlu0 %v845_v58 }
 0x2f1   : > { %v1074_v60 = vmul.f32 1.442695, %v1073_v59 }
 0x2f3   : > { %2728 = vpow2.f32 %v1074_v60 }
 0x2f5   : > { %v2727_v61 = vpop.eup %2726 }
 0x2f6   : > { %v959_v62 = vsel %vm790_vm2, %v2727_v61, 0.0  ;;  %v1189_v2 = vpop.xlane.xlu1 %1188 }
 0x2f7   : > { %960 = vadd.xlane.f32.xlu1 %v959_v62  ;;  %v1190_v4 = vsub.f32 %v1186_v45, %v1189_v2 }
 0x2f9   : > { %v1191_v5 = vmul.f32 1.442695, %v1190_v4 }
 0x2fb   : > { %2730 = vpow2.f32 %v1191_v5 }
 0x2fd   : > { %v2729_v63 = vpop.eup %2728 }
 0x2fe   : > { %v1076_v0 = vsel %vm790_vm2, %v2729_v63, 0.0 }
 0x2ff   : > { %1077 = vadd.xlane.f32.xlu0 %v1076_v0 }
 0x305   : > { %v2731_v6 = vpop.eup %2730 }
 0x306   : > { %v1193_v7 = vsel %vm790_vm2, %v2731_v6, 0.0 }
 0x308   : > { %965 = vrot.lane.b32.xlu1 %v3038_v11, %s2835_s24  ;;  %s3428_s24 = smov 8  }
 0x315   : > { %851 = vrot.lane.b32.xlu0 %v3038_v11, %s2836_s28  ;;  %s3426_s28 = smov 24  }
 0x319   : > { %1199 = vrot.lane.b32.xlu0 %v3038_v11, %s2837_s26  ;;  %s3462_s26 = smov 88  }
 0x32c   : > { %1194 = vadd.xlane.f32.xlu1 %v1193_v7  ;;  %v713_v7 = vld [vmem:[%s699_s6] sm:$0xff]  ;;  %s3457_s6 = smov 104  }
 0x33d   : > { %1082 = vrot.lane.b32.xlu1 %v3038_v11, %s2838_s30 }
 0x37c   : > { %v847_v8 = vpop.xlane.xlu0 %846 }
 0x37d   : > { %2732 = vrcp.f32 %v847_v8  ;;  %v1415_v8 = vpack.c.bf16 %v713_v7, %v713_v7 }
 0x384   : > { %v961_v9 = vpop.xlane.xlu1 %960 }
 0x385   : > { %2734 = vrcp.f32 %v961_v9  ;;  %v2714_v9 = vld [vmem:[%s3454_s8] sm:$0xff]  }
 0x387   : > { %v2733_v10 = vpop.eup %2732 }
 0x388   : > { %v849_v13 = vmul.f32 %v2733_v10, %v2725_v56  ;;  %v966_v16 = vpop.permute.xlu1 %965  ;;  %v2715_v10 = vld [vmem:[%s3454_s8 + $0x8] sm:$0xff]  }
 0x389   : > { %v971_v19 = vsel %vm856_vm4, %v966_v16, 0  ;;  %v2395_v16 = vld [vmem:[%s3409_s18] ss:$0 sm:$0xff] }
 0x38a   : > { %v850_v17 = vpack.c.bf16 %v849_v13, %v849_v13 }
 0x38c   : > { %v1078_v12 = vpop.xlane.xlu0 %1077 }
 0x38d   : > { %2736 = vrcp.f32 %v1078_v12 }
 0x38f   : > { %v2735_v18 = vpop.eup %2734 }
 0x390   : > { %v852_v14 = vpop.permute.xlu0 %851  ;;  %v963_v11 = vmul.f32 %v2735_v18, %v2727_v61  ;;  %v2396_v18 = vld [vmem:[%s3410_s19] ss:$0 sm:$0xff] }
 0x391   : > { %v858_v15 = vsel %vm856_vm4, %v852_v14, 0 }
 0x392   : > { %2510 = vmatpush3.bf16.msra.mxu0 %v858_v15  ;;  %v964_v20 = vpack.c.bf16 %v963_v11, %v963_v11 }
 0x393   : > { %2521 = vmatprep.subr.bf16.mxu0 %v2826_v1 }
 0x394   : > { %v1200_v26 = vpop.permute.xlu0 %1199 }
 0x395   : > { %2512 = vmatmul.mubr.msk.bf16.vlgmr.msra.gmra.mrb[0].mxu0 %vm790_vm2, %v850_v17  ;;  %v1205_v28 = vsel %vm856_vm4, %v1200_v26, 0 }
 0x396   : > { %2522 = vmatpush3.bf16.msra.mxu0 %v971_v19  ;;  %2523 = vmatprep.mubr.msk.bf16.mxu0 %vm2827_vm0, %v2826_v1 }
 0x397   : > { %2533 = vmatprep.subr.bf16.mxu0 %v2826_v1  ;;  %v2737_v21 = vpop.eup %2736 }
 0x398   : > { %v1080_v23 = vmul.f32 %v2737_v21, %v2729_v63  ;;  %v2401_v21 = vld [vmem:[%s3402_s11] ss:$0 sm:$0xff] }
 0x39a   : > { %v1081_v27 = vpack.c.bf16 %v1080_v23, %v1080_v23 }
 0x39d   : > { %2524 = vmatmul.mubr.msk.bf16.vlgmr.msra.gmra.mrb[4].mxu0 %vm790_vm2, %v964_v20 }
 0x39e   : > { %2535 = vmatprep.mubr.msk.bf16.mxu0 %vm2827_vm0, %v2826_v1 }
 0x3b9   : > { %v1195_v22 = vpop.xlane.xlu1 %1194 }
 0x3ba   : > { %2738 = vrcp.f32 %v1195_v22 }
 0x3bd   : > { %v1083_v24 = vpop.permute.xlu1 %1082 }
 0x3be   : > { %v1088_v25 = vsel %vm856_vm4, %v1083_v24, 0 }
 0x3bf   : > { %2534 = vmatpush3.bf16.msra.mxu0 %v1088_v25 }
 0x3c0   : > { %2545 = vmatprep.subr.bf16.mxu0 %v2826_v1 }
 0x3c2   : > { %2536 = vmatmul.mubr.msk.bf16.vlgmr.msra.gmra.mrb[8].mxu0 %vm790_vm2, %v1081_v27 }
 0x3c3   : > { %2546 = vmatpush3.bf16.msra.mxu0 %v1205_v28  ;;  %2547 = vmatprep.mubr.msk.bf16.mxu0 %vm2827_vm0, %v2826_v1 }
 0x3c4   : > { %v2739_v29 = vpop.eup %2738  ;;  %2559 = vmatprep.subr.bf16.mxu0 %v2826_v1 }
 0x3c5   : > { %v1197_v30 = vmul.f32 %v2739_v29, %v2731_v6  ;;  %v2712_v6 = vld [vmem:[%s3401_s10] sm:$0xff]  }
 0x3c6   : > { %v2397_v29 = vld [vmem:[%s3400_s9] ss:$0 sm:$0xff] }
 0x3c7   : > { %v1198_v31 = vpack.c.bf16 %v1197_v30, %v1197_v30 }
 0x3ca   : > { %2548 = vmatmul.mubr.msk.bf16.vlgmr.msra.gmra.mrb[12].mxu0 %vm790_vm2, %v1198_v31 }
 0x3cb   : > { %2563 = vmatprep.mubr.msk.bf16.mxu0 %vm2827_vm0, %v2826_v1  ;;  %2560 = vmatpush3.bf16.msra.mxu0 %v2714_v9 }
 0x3cc   : > { %2561 = vmatprep.subr.bf16.mxu0 %v2826_v1 }
 0x3cf   : > { %2562 = vmatpush3.bf16.msra.mxu0 %v2715_v10 }
 0x3d0   : > { %2575 = vmatprep.subr.bf16.mxu0 %v2826_v1 }
 0x468   : > { %v894_v32 = vpop.f32.mrb[0].mxu0 }
 0x469   : > { %900 = vst.msk [vmem:[#allocation2] sm:$0xff] %vm790_vm2, %v894_v32  ;;  %v2513_v33 = vpop.f32.mrb[1].mxu0 }
 0x46a   : > { %v897_v34 = vpop.f32.mrb[2].mxu0 }
 0x46b   : > { %v2514_v35 = vpop.f32.mrb[3].mxu0 }
 0x470   : > { %v1007_v36 = vpop.f32.mrb[4].mxu0 }
 0x471   : > { %1014 = vrot.lane.b32.xlu1 %v1007_v36, %s3428_s24  ;;  %v2525_v37 = vpop.f32.mrb[5].mxu0  ;;  %s2374_s24 = sshll.u32 %s3432_s1, 5 }
 0x472   : > { %v1010_v38 = vpop.f32.mrb[6].mxu0  ;;  %s3238_s30 = scalar_lea.vmem [#allocation3], %s2374_s24  ;;  %s3464_s24 = smov 16  }
 0x473   : > { %v2526_v39 = vpop.f32.mrb[7].mxu0  ;;  %s2251_s1 = sshll.u32 %s3238_s30, 4  ;;  %s3334_s1 = int_to_ptr.vmem [resolvable:$true] %s2251_s1 }
 0x495   : > { %v1124_v42 = vpop.f32.mrb[8].mxu0 }
 0x496   : > { %1131 = vrot.lane.b32.xlu0 %v1124_v42, %s3427_s29  ;;  %v2537_v43 = vpop.f32.mrb[9].mxu0  ;;  %s3456_s29 = smov 112  }
 0x497   : > { %v1127_v44 = vpop.f32.mrb[10].mxu0 }
 0x498   : > { %v2538_v45 = vpop.f32.mrb[11].mxu0 }
 0x49d   : > { %v1241_v46 = vpop.f32.mrb[12].mxu0 }
 0x49e   : > { %1248 = vrot.lane.b32.xlu1 %v1241_v46, %s3426_s28  ;;  %v2549_v47 = vpop.f32.mrb[13].mxu0  ;;  %s3455_s28 = smov 120   ;;  %v1533_v46 = vlaneseq }
 0x49f   : > { %v1244_v48 = vpop.f32.mrb[14].mxu0 }
 0x4a0   : > { %v2550_v49 = vpop.f32.mrb[15].mxu0  ;;  %v1534_v48 = vshrl.u32 %v1533_v46, 7 }
 0x4a2   : > { %v1535_v49 = vsub.s32 0, %v1534_v48 }
 0x4e3   : > { %v1015_v50 = vpop.permute.xlu1 %1014 }
 0x4e4   : > { %1018 = vst.msk [vmem:[#allocation2] sm:$0xff] %vm1017_vm5, %v1015_v50  ;;  %v2842_v50 = vmov 0  }
 0x508   : > { %v1132_v51 = vpop.permute.xlu0 %1131 }
 0x509   : > { %1135 = vst.msk [vmem:[#allocation2] sm:$0xff] %vm1134_vm6, %v1132_v51 }
 0x510   : > { %v1249_v52 = vpop.permute.xlu1 %1248 }
 0x511   : > { %1252 = vst.msk [vmem:[#allocation2] sm:$0xff] %vm1251_vm7, %v1249_v52 }
 0x518   : > { %v1253_v53 = vld [vmem:[#allocation2] sm:$0xff] }
 0x519   : > { %v1254_v54 = vpack.c.bf16 %v1253_v53, %v1253_v53 }
 0x51b   : > { %2556 = vmatmul.mubr.msk.bf16.vlgmr.msra.gmra.mrb[20].mxu1 %vm740_vm1, %v1254_v54 }
 0x51c   : > { %2571 = vmatprep.mubr.msk.bf16.mxu1 %vm2827_vm0, %v2826_v1  ;;  %2568 = vmatpush3.bf16.msra.mxu1 %v2712_v6 }
 0x51d   : > { %2569 = vmatprep.subr.bf16.mxu1 %v2826_v1 }
 0x5ee   : > { %v1315_v56 = vpop.f32.mrb[20].mxu1 }
 0x5ef   : > { %v1316_v57 = vadd.f32 %v2391_v55, %v1315_v56  ;;  %v2557_v58 = vpop.f32.mrb[21].mxu1 }
 0x5f0   : > { %v1318_v59 = vpop.f32.mrb[22].mxu1 }
 0x5f1   : > { %v2558_v60 = vpop.f32.mrb[23].mxu1  ;;  %v1321_v61 = vadd.f32 %v1316_v57, %v3028_v3  ;;  %v2713_v3 = vld [vmem:[%s3401_s10 + $0x8] sm:$0xff]  }
 0x5f2   : > { %2570 = vmatpush3.bf16.msra.mxu1 %v2713_v3 }
 0x5f3   : > { %v1324_v62 = vsel %vm740_vm1, %v1321_v61, 0.0  ;;  %2581 = vmatprep.subr.bf16.mxu1 %v2826_v1 }
 0x5f4   : > { %1325 = vadd.xlane.f32.xlu0 %v1324_v62 }
 0x5f5   : > { %2572 = vmatmul.mubr.msk.bf16.vlgmr.msra.gmra.mrb[24].mxu1 %vm740_vm1, %v1415_v8 }
 0x5f6   : > { %2583 = vmatprep.mubr.msk.bf16.mxu1 %vm2827_vm0, %v2826_v1 }
 0x681   : > { %v1326_v63 = vpop.xlane.xlu0 %1325 }
 0x682   : > { %v1328_v0 = vmul.f32 0.03125, %v1326_v63 }
 0x684   : > { %v1329_v2 = vsub.f32 %v1321_v61, %v1328_v0 }
 0x686   : > { %v1330_v4 = vmul.f32 %v1329_v2, %v1329_v2 }
 0x688   : > { %v1331_v5 = vsel %vm740_vm1, %v1330_v4, 0.0 }
 0x689   : > { %1332 = vadd.xlane.f32.xlu1 %v1331_v5 }
 0x6c8   : > { %v1476_v22 = vpop.f32.mrb[24].mxu1 }
 0x6c9   : > { %v1477_v23 = vadd.f32 %v2401_v21, %v1476_v22  ;;  %v2573_v24 = vpop.f32.mrb[25].mxu1 }
 0x6ca   : > { %v1479_v25 = vpop.f32.mrb[26].mxu1 }
 0x6cb   : > { %v3174_v26 = vpack.c.bf16 %v1477_v23, %v1477_v23  ;;  %v2574_v27 = vpop.f32.mrb[27].mxu1 }
 0x6cd   : > { %1605 = vrot.lane.b32.xlu0 %v3174_v26, %s3455_s28  ;;  %v1489_v28 = vsel %vm790_vm2, %v3174_v26, 0 }
 0x6d1   : > { %1723 = vrot.lane.b32.xlu0 %v3174_v26, %s3456_s29 }
 0x6d5   : > { %1841 = vrot.lane.b32.xlu0 %v3174_v26, %s3457_s6 }
 0x716   : > { %v1333_v12 = vpop.xlane.xlu1 %1332 }
 0x717   : > { %v1334_v13 = vmul.f32 0.03125, %v1333_v12 }
 0x719   : > { %v1335_v14 = vadd.f32 1e-05, %v1334_v13 }
 0x71b   : > { %2740 = vrsqrt.f32 %v1335_v14 }
 0x725   : > { %v2741_v15 = vpop.eup %2740 }
 0x726   : > { %v1337_v17 = vmul.f32 %v2741_v15, %v1329_v2 }
 0x728   : > { %v1342_v19 = vmul.f32 %v2395_v16, %v1337_v17 }
 0x72a   : > { %v3164_v11 = vadd.f32 %v2396_v18, %v1342_v19 }
 0x72c   : > { %v1348_v20 = vpack.c.bf16 %v3164_v11, %v3164_v11 }
 0x72e   : > { %2564 = vmatmul.mubr.msk.bf16.vlgmr.msra.gmra.mrb[16].mxu0 %vm740_vm1, %v1348_v20 }
 0x72f   : > { %2577 = vmatprep.mubr.msk.bf16.mxu0 %vm2827_vm0, %v2826_v1  ;;  %2576 = vmatpush3.bf16.xpose.msra.mxu0 %v1489_v28 }
 0x730   : > { %2587 = vmatprep.subr.bf16.mxu0 %v2826_v1 }
 0x73f   : > { %v1606_v36 = vpop.permute.xlu0 %1605 }
 0x740   : > { %v1611_v38 = vsel %vm790_vm2, %v1606_v36, 0 }
 0x743   : > { %v1724_v39 = vpop.permute.xlu0 %1723 }
 0x744   : > { %v1729_v41 = vsel %vm790_vm2, %v1724_v39, 0 }
 0x747   : > { %v1842_v42 = vpop.permute.xlu0 %1841 }
 0x748   : > { %v1847_v44 = vsel %vm790_vm2, %v1842_v42, 0 }
 0x801   : > { %v1409_v30 = vpop.f32.mrb[16].mxu0 }
 0x802   : > { %v1410_v31 = vadd.f32 %v2397_v29, %v1409_v30  ;;  %v2565_v32 = vpop.f32.mrb[17].mxu0 }
 0x803   : > { %v1412_v33 = vpop.f32.mrb[18].mxu0 }
 0x804   : > { %v1482_v34 = vmul.f32 0.35355338, %v1410_v31  ;;  %v2566_v35 = vpop.f32.mrb[19].mxu0 }
 0x806   : > { %v1483_v37 = vpack.c.bf16 %v1482_v34, %v1482_v34 }
 0x808   : > { %1603 = vrot.lane.b32.xlu1 %v1483_v37, %s3455_s28  ;;  %2578 = vmatmul.mubr.msk.bf16.vlgmr.msra.gmra.mrb[20].mxu0 %vm790_vm2, %v1483_v37  ;;  %s706_s28 = scalar_lea.vmem %s3458_s0, %s3018_s4  ;;  %s3459_s4 = smov 96  }
 0x809   : > { %2588 = vmatpush3.bf16.xpose.msra.mxu0 %v1611_v38  ;;  %2589 = vmatprep.mubr.msk.bf16.mxu0 %vm2827_vm0, %v2826_v1  ;;  %v715_v47 = vld [vmem:[%s706_s28] sm:$0x1]  ;;  %s3463_s0 = smov 8  }
 0x80a   : > { %2599 = vmatprep.subr.bf16.mxu0 %v2826_v1  ;;  %vm1531_vm8 = vcmp.eq.f32.partialorder %v715_v47, 0.0 }
 0x80b   : > { %v1532_v51 = vsel %vm1531_vm8, 1, %v2842_v50 }
 0x80c   : > { %1721 = vrot.lane.b32.xlu1 %v1483_v37, %s3456_s29  ;;  %v1536_v52 = vrot.slane %v1532_v51, %v1535_v49  ;;  %s3460_s29 = smov 80  }
 0x80e   : > { %vm1537_vm9 = vcmp.eq.s32.totalorder %v1536_v52, 1 }
 0x810   : > { %1839 = vrot.lane.b32.xlu1 %v1483_v37, %s3457_s6  ;;  %s3461_s6 = smov 72  }
 0x87a   : > { %v1604_v40 = vpop.permute.xlu1 %1603 }
 0x87b   : > { %2590 = vmatmul.mubr.msk.bf16.vlgmr.msra.gmra.mrb[24].mxu0 %vm790_vm2, %v1604_v40 }
 0x87c   : > { %2600 = vmatpush3.bf16.xpose.msra.mxu0 %v1729_v41  ;;  %2601 = vmatprep.mubr.msk.bf16.mxu0 %vm2827_vm0, %v2826_v1 }
 0x87d   : > { %2611 = vmatprep.subr.bf16.mxu0 %v2826_v1 }
 0x87e   : > { %v1722_v43 = vpop.permute.xlu1 %1721 }
 0x882   : > { %v1840_v45 = vpop.permute.xlu1 %1839 }
 0x883   : > { %2602 = vmatmul.mubr.msk.bf16.vlgmr.msra.gmra.mrb[28].mxu0 %vm790_vm2, %v1722_v43 }
 0x884   : > { %2612 = vmatpush3.bf16.xpose.msra.mxu0 %v1847_v44  ;;  %2613 = vmatprep.mubr.msk.bf16.mxu0 %vm2827_vm0, %v2826_v1 }
 0x885   : > { %2623 = vmatprep.subr.bf16.mxu0 %v2826_v1 }
 0x88b   : > { %2614 = vmatmul.mubr.msk.bf16.vlgmr.msra.gmra.mrb[32].mxu0 %vm790_vm2, %v1840_v45 }
 0x88c   : > { %2627 = vmatprep.mubr.msk.bf16.mxu0 %vm2827_vm0, %v2826_v1 }
 0x8db   : > { %v1525_v53 = vpop.f32.mrb[20].mxu0 }
 0x8dc   : > { %v1538_v54 = vsel %vm1537_vm9, -1e+10, %v1525_v53  ;;  %v2579_v55 = vpop.f32.mrb[21].mxu0 }
 0x8dd   : > { %v1528_v56 = vpop.f32.mrb[22].mxu0  ;;  %v1539_v57 = vsel %vm790_vm2, %v1538_v54, -inf }
 0x8de   : > { %1540 = vmax.xlane.f32.xlu0 %v1539_v57  ;;  %v2580_v58 = vpop.f32.mrb[23].mxu0 }
 0x94e   : > { %v1647_v59 = vpop.f32.mrb[24].mxu0 }
 0x94f   : > { %v1653_v60 = vsel %vm1537_vm9, -1e+10, %v1647_v59  ;;  %v2591_v61 = vpop.f32.mrb[25].mxu0 }
 0x950   : > { %v1650_v62 = vpop.f32.mrb[26].mxu0  ;;  %v1654_v63 = vsel %vm790_vm2, %v1653_v60, -inf }
 0x951   : > { %1655 = vmax.xlane.f32.xlu1 %v1654_v63  ;;  %v2592_v0 = vpop.f32.mrb[27].mxu0 }
 0x956   : > { %v1765_v2 = vpop.f32.mrb[28].mxu0 }
 0x957   : > { %v1771_v4 = vsel %vm1537_vm9, -1e+10, %v1765_v2  ;;  %v2603_v5 = vpop.f32.mrb[29].mxu0 }
 0x958   : > { %v1768_v6 = vpop.f32.mrb[30].mxu0  ;;  %v1772_v3 = vsel %vm790_vm2, %v1771_v4, -inf  ;;  %v2716_v5 = vld [vmem:[%s3403_s12] sm:$0xff]  }
 0x959   : > { %1773 = vmax.xlane.f32.xlu0 %v1772_v3  ;;  %v2604_v7 = vpop.f32.mrb[31].mxu0  ;;  %2624 = vmatpush3.bf16.msra.mxu0 %v2716_v5  ;;  %v2717_v6 = vld [vmem:[%s3403_s12 + $0x8] sm:$0xff]  }
 0x95a   : > { %2625 = vmatprep.subr.bf16.mxu0 %v2826_v1 }
 0x95d   : > { %2626 = vmatpush3.bf16.msra.mxu0 %v2717_v6 }
 0x95e   : > { %v1883_v8 = vpop.f32.mrb[32].mxu0  ;;  %2639 = vmatprep.subr.bf16.mxu0 %v2826_v1 }
 0x95f   : > { %v1889_v9 = vsel %vm1537_vm9, -1e+10, %v1883_v8  ;;  %v2615_v10 = vpop.f32.mrb[33].mxu0 }
 0x960   : > { %v1886_v12 = vpop.f32.mrb[34].mxu0  ;;  %v1890_v13 = vsel %vm790_vm2, %v1889_v9, -inf }
 0x961   : > { %1891 = vmax.xlane.f32.xlu0 %v1890_v13  ;;  %v2616_v14 = vpop.f32.mrb[35].mxu0 }
 0x96b   : > { %v1541_v15 = vpop.xlane.xlu0 %1540 }
 0x96c   : > { %v1542_v16 = vsub.f32 %v1538_v54, %v1541_v15 }
 0x96e   : > { %v1543_v17 = vmul.f32 1.442695, %v1542_v16 }
 0x970   : > { %2742 = vpow2.f32 %v1543_v17 }
 0x97a   : > { %v2743_v18 = vpop.eup %2742 }
 0x97b   : > { %v1545_v19 = vsel %vm790_vm2, %v2743_v18, 0.0 }
 0x97c   : > { %1546 = vadd.xlane.f32.xlu1 %v1545_v19 }
 0x98d   : > { %1552 = vrot.lane.b32.xlu1 %v3174_v26, %s3459_s4 }
 0x9de   : > { %v1656_v20 = vpop.xlane.xlu1 %1655 }
 0x9df   : > { %v1657_v21 = vsub.f32 %v1653_v60, %v1656_v20  ;;  %v2416_v20 = vld [vmem:[%s3404_s13] ss:$0 sm:$0xff] }
 0x9e1   : > { %v1658_v22 = vmul.f32 1.442695, %v1657_v21 }
 0x9e3   : > { %2744 = vpow2.f32 %v1658_v22 }
 0x9e6   : > { %v1774_v23 = vpop.xlane.xlu0 %1773 }
 0x9e7   : > { %v1775_v24 = vsub.f32 %v1771_v4, %v1774_v23 }
 0x9e9   : > { %v1776_v25 = vmul.f32 1.442695, %v1775_v24 }
 0x9eb   : > { %2746 = vpow2.f32 %v1776_v25 }
 0x9ed   : > { %v2745_v27 = vpop.eup %2744 }
 0x9ee   : > { %v1892_v28 = vpop.xlane.xlu0 %1891  ;;  %v1660_v29 = vsel %vm790_vm2, %v2745_v27, 0.0 }
 0x9ef   : > { %v1893_v30 = vsub.f32 %v1889_v9, %v1892_v28  ;;  %1661 = vadd.xlane.f32.xlu0 %v1660_v29 }
 0x9f1   : > { %v1894_v31 = vmul.f32 1.442695, %v1893_v30 }
 0x9f3   : > { %2748 = vpow2.f32 %v1894_v31 }
 0x9f5   : > { %v2747_v32 = vpop.eup %2746 }
 0x9f6   : > { %v1778_v33 = vsel %vm790_vm2, %v2747_v32, 0.0 }
 0x9f7   : > { %1779 = vadd.xlane.f32.xlu1 %v1778_v33 }
 0x9fd   : > { %v2749_v34 = vpop.eup %2748 }
 0x9fe   : > { %v1896_v35 = vsel %vm790_vm2, %v2749_v34, 0.0 }
 0x9ff   : > { %1897 = vadd.xlane.f32.xlu0 %v1896_v35  ;;  %v2719_v35 = vld [vmem:[%s3405_s14 + $0x8] sm:$0xff]  }
 0xa08   : > { %1784 = vrot.lane.b32.xlu1 %v3174_v26, %s3460_s29  ;;  %s3332_s29 = scalar_lea.hbm %s3412_s21, %s2439_s7 }
 0xa09   : > { %v1547_v36 = vpop.xlane.xlu1 %1546 }
 0xa0a   : > { %2750 = vrcp.f32 %v1547_v36  ;;  %v2721_v36 = vld [vmem:[%s3407_s16 + $0x8] sm:$0xff]  }
 0xa0c   : > { %1902 = vrot.lane.b32.xlu1 %v3174_v26, %s3461_s6  ;;  %s3466_s6 = sand.u32 1, %s2816_s25  }
 0xa0d   : > { %v1553_v37 = vpop.permute.xlu1 %1552 }
 0xa0e   : > { %v1558_v38 = vsel %vm856_vm4, %v1553_v37, 0 }
 0xa0f   : > { %2582 = vmatpush3.bf16.msra.mxu1 %v1558_v38 }
 0xa10   : > { %2593 = vmatprep.subr.bf16.mxu1 %v2826_v1 }
 0xa14   : > { %v2751_v39 = vpop.eup %2750 }
 0xa15   : > { %v1549_v40 = vmul.f32 %v2751_v39, %v2743_v18  ;;  %1666 = vrot.lane.b32.xlu0 %v3174_v26, %s3462_s26  ;;  %s3465_s26 = smov 24  }
 0xa17   : > { %1601 = vst.msk [vmem:[%s3238_s30] sm:$0xff] %vm790_vm2, %v1549_v40  ;;  %v1550_v41 = vpack.c.bf16 %v1549_v40, %v1549_v40 }
 0xa19   : > { %2584 = vmatmul.mubr.msk.bf16.vlgmr.msra.gmra.mrb[28].mxu1 %vm790_vm2, %v1550_v41  ;;  %v2420_v41 = vld [vmem:[%s3409_s18 + $0x1] ss:$0 sm:$0xff] }
 0xa1a   : > { %2595 = vmatprep.mubr.msk.bf16.mxu1 %vm2827_vm0, %v2826_v1 }
 0xa7c   : > { %v1662_v42 = vpop.xlane.xlu0 %1661 }
 0xa7d   : > { %2752 = vrcp.f32 %v1662_v42 }
 0xa84   : > { %v1780_v43 = vpop.xlane.xlu1 %1779 }
 0xa85   : > { %2754 = vrcp.f32 %v1780_v43  ;;  %v2421_v43 = vld [vmem:[%s3410_s19 + $0x1] ss:$0 sm:$0xff] }
 0xa87   : > { %v2753_v44 = vpop.eup %2752 }
 0xa88   : > { %v1664_v45 = vmul.f32 %v2753_v44, %v2745_v27  ;;  %v1785_v50 = vpop.permute.xlu1 %1784 }
 0xa89   : > { %v1790_v52 = vsel %vm856_vm4, %v1785_v50, 0 }
 0xa8a   : > { %2409 = vst.msk [vmem:[%s3238_s30 + $0x8] sm:$0xff] %vm790_vm2, %v1664_v45  ;;  %v1665_v51 = vpack.c.bf16 %v1664_v45, %v1664_v45 }
 0xa8c   : > { %v1898_v26 = vpop.xlane.xlu0 %1897  ;;  %v1903_v55 = vpop.permute.xlu1 %1902 }
 0xa8d   : > { %2756 = vrcp.f32 %v1898_v26  ;;  %v1908_v57 = vsel %vm856_vm4, %v1903_v55, 0 }
 0xa8f   : > { %v2755_v46 = vpop.eup %2754 }
 0xa90   : > { %v1782_v47 = vmul.f32 %v2755_v46, %v2747_v32  ;;  %v1667_v48 = vpop.permute.xlu0 %1666  ;;  %v2722_v46 = vld [vmem:[%s3407_s16 + $0x10] sm:$0xff]  }
 0xa91   : > { %v1672_v49 = vsel %vm856_vm4, %v1667_v48, 0  ;;  %v2422_v48 = vld [vmem:[%s3406_s15] ss:$0 sm:$0xff] }
 0xa92   : > { %2412 = vst.msk [vmem:[%s3238_s30 + $0x10] sm:$0xff] %vm790_vm2, %v1782_v47  ;;  %2594 = vmatpush3.bf16.msra.mxu1 %v1672_v49  ;;  %v1783_v56 = vpack.c.bf16 %v1782_v47, %v1782_v47  ;;  %v2723_v47 = vld [vmem:[%s3407_s16 + $0x18] sm:$0xff]  }
 0xa93   : > { %2605 = vmatprep.subr.bf16.mxu1 %v2826_v1 }
 0xa95   : > { %2596 = vmatmul.mubr.msk.bf16.vlgmr.msra.gmra.mrb[32].mxu1 %vm790_vm2, %v1665_v51 }
 0xa96   : > { %2606 = vmatpush3.bf16.msra.mxu1 %v1790_v52  ;;  %2607 = vmatprep.mubr.msk.bf16.mxu1 %vm2827_vm0, %v2826_v1 }
 0xa97   : > { %v2757_v53 = vpop.eup %2756  ;;  %2617 = vmatprep.subr.bf16.mxu1 %v2826_v1 }
 0xa98   : > { %v1900_v54 = vmul.f32 %v2757_v53, %v2749_v34  ;;  %v2718_v34 = vld [vmem:[%s3405_s14] sm:$0xff]  }
 0xa9a   : > { %2415 = vst.msk [vmem:[%s3238_s30 + $0x18] sm:$0xff] %vm790_vm2, %v1900_v54  ;;  %v1901_v58 = vpack.c.bf16 %v1900_v54, %v1900_v54  ;;  %s2766_s30 = sshll.u32 %s2843_s3, 4  ;;  %s2767_s30 = int_to_ptr.vmem [resolvable:$false] %s2766_s30 }
 0xa9b   : > { %s2768_s8 = scalar_lea.vmem %s2767_s30, 1024  ;;  %p2769_p0 = scmp.lt.s32.totalorder %s3334_s1, %s2767_s30 }
 0xa9d   : > { %2608 = vmatmul.mubr.msk.bf16.vlgmr.msra.gmra.mrb[36].mxu1 %vm790_vm2, %v1783_v56 }
 0xa9e   : > { %2618 = vmatpush3.bf16.msra.mxu1 %v1908_v57  ;;  %2619 = vmatprep.mubr.msk.bf16.mxu1 %vm2827_vm0, %v2826_v1 }
 0xa9f   : > { %2631 = vmatprep.subr.bf16.mxu1 %v2826_v1 }
 0xaa5   : > { %2620 = vmatmul.mubr.msk.bf16.vlgmr.msra.gmra.mrb[40].mxu1 %vm790_vm2, %v1901_v58 }
 0xaa6   : > { %2635 = vmatprep.mubr.msk.bf16.mxu1 %vm2827_vm0, %v2826_v1  ;;  %2632 = vmatpush3.bf16.msra.mxu1 %v2718_v34 }
 0xaa7   : > { %2633 = vmatprep.subr.bf16.mxu1 %v2826_v1 }
 0xaaa   : > { %2634 = vmatpush3.bf16.msra.mxu1 %v2719_v35 }
 0xaec   : > { %v1594_v59 = vpop.f32.mrb[28].mxu1 }
 0xaed   : > { %1600 = vst.msk [vmem:[#allocation2] sm:$0xff] %vm790_vm2, %v1594_v59  ;;  %v2585_v60 = vpop.f32.mrb[29].mxu1 }
 0xaee   : > { %v1597_v61 = vpop.f32.mrb[30].mxu1 }
 0xaef   : > { %v2586_v62 = vpop.f32.mrb[31].mxu1 }
 0xb68   : > { %v1708_v63 = vpop.f32.mrb[32].mxu1 }
 0xb69   : > { %1715 = vrot.lane.b32.xlu0 %v1708_v63, %s3463_s0  ;;  %v2597_v0 = vpop.f32.mrb[33].mxu1 }
 0xb6a   : > { %v1711_v2 = vpop.f32.mrb[34].mxu1 }
 0xb6b   : > { %v2598_v4 = vpop.f32.mrb[35].mxu1 }
 0xb70   : > { %v1826_v3 = vpop.f32.mrb[36].mxu1 }
 0xb71   : > { %1833 = vrot.lane.b32.xlu1 %v1826_v3, %s3464_s24  ;;  %v2609_v7 = vpop.f32.mrb[37].mxu1  ;;  %s3338_s24 = scalar_lea.sflag [#allocation4], %s3466_s6 }
 0xb72   : > { %v1829_v8 = vpop.f32.mrb[38].mxu1 }
 0xb73   : > { %v2610_v9 = vpop.f32.mrb[39].mxu1 }
 0xb78   : > { %v1944_v10 = vpop.f32.mrb[40].mxu1 }
 0xb79   : > { %1951 = vrot.lane.b32.xlu0 %v1944_v10, %s3465_s26  ;;  %v2621_v12 = vpop.f32.mrb[41].mxu1  ;;  %s2762_s26 = scalar_lea.vmem %s3334_s1, 512 }
 0xb7a   : > { %v1947_v13 = vpop.f32.mrb[42].mxu1  ;;  %p2763_p11 = scmp.ne.s32.totalorder %s3334_s1, %s2762_s26  ;;  %p2770_p1 = scmp.lt.s32.totalorder %s2768_s8, %s2762_s26 }
 0xb7b   : > { %v2622_v14 = vpop.f32.mrb[43].mxu1 }
 0xb7c   : > { %p2764_p12 = pnand %p2763_p11, %p2993_p5  ;;  %p2771_p2 = por %p2770_p1, %p2769_p0 }
 0xb7e   : > { %p2765_p13 = pneg %p2764_p12 }
 0xb80   : > { %p2772_p3 = pnand %p2771_p2, %p2765_p13 }
 0xbdb   : > { %v1716_v15 = vpop.permute.xlu0 %1715 }
 0xbdc   : > { %1718 = vst.msk [vmem:[#allocation2] sm:$0xff] %vm1017_vm5, %v1716_v15 }
 0xbe3   : > { %v1834_v16 = vpop.permute.xlu1 %1833 }
 0xbe4   : > { %1836 = vst.msk [vmem:[#allocation2] sm:$0xff] %vm1134_vm6, %v1834_v16 }
 0xbeb   : > { %v1952_v17 = vpop.permute.xlu0 %1951 }
 0xbec   : > { %1954 = vst.msk [vmem:[#allocation2] sm:$0xff] %vm1251_vm7, %v1952_v17 }
 0xbf3   : > { %v1957_v18 = vld [vmem:[#allocation2] sm:$0xff] }
 0xbf4   : > { %v1958_v19 = vpack.c.bf16 %v1957_v18, %v1957_v18 }
 0xbf6   : > { %2628 = vmatmul.mubr.msk.bf16.vlgmr.msra.gmra.mrb[36].mxu0 %vm740_vm1, %v1958_v19 }
 0xbf7   : > { %2647 = vmatprep.mubr.msk.bf16.mxu0 %vm2827_vm0, %v2826_v1 }
 0xcc9   : > { %v2019_v21 = vpop.f32.mrb[36].mxu0 }
 0xcca   : > { %v2020_v22 = vadd.f32 %v2416_v20, %v2019_v21  ;;  %v2629_v23 = vpop.f32.mrb[37].mxu0 }
 0xccb   : > { %v2022_v24 = vpop.f32.mrb[38].mxu0 }
 0xccc   : > { %v2630_v25 = vpop.f32.mrb[39].mxu0  ;;  %v2025_v27 = vadd.f32 %v2020_v22, %v3164_v11  ;;  %v2720_v11 = vld [vmem:[%s3407_s16] sm:$0xff]  }
 0xccd   : > { %2640 = vmatpush3.bf16.msra.mxu0 %v2720_v11 }
 0xcce   : > { %v2028_v28 = vsel %vm740_vm1, %v2025_v27, 0.0  ;;  %2641 = vmatprep.subr.bf16.mxu0 %v2826_v1 }
 0xccf   : > { %2029 = vadd.xlane.f32.xlu1 %v2028_v28 }
 0xcd1   : > { %2642 = vmatpush3.bf16.msra.mxu0 %v2721_v36 }
 0xcd2   : > { %2643 = vmatprep.subr.bf16.mxu0 %v2826_v1 }
 0xcd5   : > { %2644 = vmatpush3.bf16.msra.mxu0 %v2722_v46 }
 0xcd6   : > { %2645 = vmatprep.subr.bf16.mxu0 %v2826_v1  ;;  %v2426_v1 = vld [vmem:[%s3408_s17] ss:$0 sm:$0xff] }
 0xcd9   : > { %2646 = vmatpush3.bf16.msra.mxu0 %v2723_v47 }
 0xd5c   : > { %v2030_v29 = vpop.xlane.xlu1 %2029 }
 0xd5d   : > { %v2031_v30 = vmul.f32 0.03125, %v2030_v29 }
 0xd5f   : > { %v2032_v31 = vsub.f32 %v2025_v27, %v2031_v30 }
 0xd61   : > { %v2033_v32 = vmul.f32 %v2032_v31, %v2032_v31 }
 0xd63   : > { %v2034_v33 = vsel %vm740_vm1, %v2033_v32, 0.0 }
 0xd64   : > { %2035 = vadd.xlane.f32.xlu0 %v2034_v33 }
 0xdf1   : > { %v2036_v37 = vpop.xlane.xlu0 %2035 }
 0xdf2   : > { %v2037_v38 = vmul.f32 0.03125, %v2036_v37 }
 0xdf4   : > { %v2038_v39 = vadd.f32 1e-05, %v2037_v38 }
 0xdf6   : > { %2758 = vrsqrt.f32 %v2038_v39 }
 0xe00   : > { %v2759_v40 = vpop.eup %2758 }
 0xe01   : > { %v2040_v42 = vmul.f32 %v2759_v40, %v2032_v31 }
 0xe03   : > { %v2045_v44 = vmul.f32 %v2420_v41, %v2040_v42 }
 0xe05   : > { %v2050_v45 = vadd.f32 %v2421_v43, %v2045_v44 }
 0xe07   : > { %v2051_v26 = vpack.c.bf16 %v2050_v45, %v2050_v45 }
 0xe09   : > { %2636 = vmatmul.mubr.msk.bf16.vlgmr.msra.gmra.mrb[44].mxu1 %vm740_vm1, %v2051_v26 }
 0xedc   : > { %v2112_v49 = vpop.f32.mrb[44].mxu1 }
 0xedd   : > { %v2113_v50 = vadd.f32 %v2422_v48, %v2112_v49  ;;  %v2637_v51 = vpop.f32.mrb[45].mxu1 }
 0xede   : > { %v2115_v52 = vpop.f32.mrb[46].mxu1 }
 0xedf   : > { %v2118_v53 = vmax.f32 %v2113_v50, 0.0  ;;  %v2638_v54 = vpop.f32.mrb[47].mxu1 }
 0xee1   : > { %v2119_v55 = vpack.c.bf16 %v2118_v53, %v2118_v53 }
 0xee3   : > { %2648 = vmatmul.mubr.msk.bf16.vlgmr.msra.gmra.mrb[40].mxu0 %vm2159_vm10, %v2119_v55 }
 0xfb6   : > { %v2197_v56 = vpop.f32.mrb[40].mxu0 }
 0xfb7   : > { %v2198_v57 = vadd.f32 %v2426_v1, %v2197_v56  ;;  %v2649_v58 = vpop.f32.mrb[41].mxu0 }
 0xfb8   : > { %v2200_v59 = vpop.f32.mrb[42].mxu0 }
 0xfb9   : > { %v2650_v60 = vpop.f32.mrb[43].mxu0  ;;  %v2203_v61 = vadd.f32 %v2198_v57, %v2050_v45 }
 0xfbb   : > { %v2206_v62 = vsel %vm740_vm1, %v2203_v61, 0.0 }
 0xfbc   : > { %2207 = vadd.xlane.f32.xlu0 %v2206_v62 }
0x1049   : > { %v2208_v63 = vpop.xlane.xlu0 %2207 }
0x104a   : > { %v2209_v0 = vmul.f32 0.03125, %v2208_v63 }
0x104c   : > { %v2210_v2 = vsub.f32 %v2203_v61, %v2209_v0 }
0x104e   : > { %v2211_v4 = vmul.f32 %v2210_v2, %v2210_v2 }
0x1050   : > { %v2212_v5 = vsel %vm740_vm1, %v2211_v4, 0.0 }
0x1051   : > { %2213 = vadd.xlane.f32.xlu1 %v2212_v5 }
0x1052   : > { %2775 = shalt.err (!%p2772_p3)
}
0x1053   : > { %s2776_s7 = scalar_lea.hbm %s3332_s29, 512  ;;  %s2780_s6 = scalar_lea.hbm %s3412_s21, 1024 }
0x1054   : > { %p2777_p4 = scmp.ne.s32.totalorder %s3332_s29, %s2776_s7  ;;  %p2781_p9 = scmp.lt.u32.totalorder %s3332_s29, %s3412_s21 }
0x1055   : > { %p2782_p10 = scmp.lt.u32.totalorder %s2780_s6, %s2776_s7  ;;  %p2784_p12 = scmp.lt.u32.totalorder %s2776_s7, %s3332_s29 }
0x1056   : > { %p2778_p7 = pnand %p2777_p4, %p2993_p5 }
0x1057   : > { %p2783_p11 = por %p2782_p10, %p2781_p9 }
0x1058   : > { %p2779_p8 = pneg %p2778_p7 }
0x1059   : > { %p2785_p13 = por %p2784_p12, %p2783_p11 }
0x105b   : > { %p2786_p0 = pnand %p2785_p13, %p2779_p8 }
0x105d   : > { %2789 = shalt.err (!%p2786_p0)
}
0x105e   : > { %s2844_s8 = smov 128   ;;  %v2432_v9 = vld [vmem:[%s3409_s18 + $0x2] ss:$0 sm:$0xff]  ;;  %s710_s3 = scalar_lea.vmem %s3411_s20, %s3021_s23 }
0x105f   : > { %2651 = dma.vmem_to_hbm [thread:$0]  (%p2993_p5), %s3334_s1, 512, %s3332_s29, %s3338_s24, %s2844_s8, %s2844_s8, %s3463_s0  }
0x1060   : > { %v2433_v12 = vld [vmem:[%s3410_s19 + $0x2] ss:$0 sm:$0xff] }
0x10de   : > { %v2214_v6 = vpop.xlane.xlu1 %2213 }
0x10df   : > { %v2215_v3 = vmul.f32 0.03125, %v2214_v6 }
0x10e1   : > { %v2216_v7 = vadd.f32 1e-05, %v2215_v3 }
0x10e3   : > { %2760 = vrsqrt.f32 %v2216_v7 }
0x10ed   : > { %v2761_v8 = vpop.eup %2760 }
0x10ee   : > { %v2218_v10 = vmul.f32 %v2761_v8, %v2210_v2 }
0x10f0   : > { %v2223_v13 = vmul.f32 %v2432_v9, %v2218_v10 }
0x10f2   : > { %v2228_v14 = vadd.f32 %v2433_v12, %v2223_v13 }
0x10f4   : > { %2229 = vst.msk [vmem:[%s710_s3] sm:$0xff] %vm740_vm1, %v2228_v14 }
0x10f5 PF: > { %p2657_p5 = scmp.ge.s32.totalorder %s2824_s27, 2  ;;  %s2273_s0 = sand.u32 1, %s2812_s2  }
0x10f6   : > { %s2274_s1 = scalar_lea.sflag [#allocation4], %s2273_s0 }
0x10f7   : > { %p2654_p1 = pnand %p2657_p5, %p2997_p6 }
0x10f9   : > { %2807 = dma.done.wait (!%p2654_p1), %s2274_s1, 512  }
0x10fa   : > { %2809 = vsyncadd (!%p2654_p1), %s2274_s1, 4294966784  ;;  %s3467_s27 = sld [smem:[#allocation7_spill]]  ;;  %s3468_s29 = sld [smem:[#allocation6_spill]] }
0x10fb   : > { %s3469_s26 = sld [smem:[#allocation8_spill]]  ;;  %s3470_s2 = smov %s2816_s25 }
0x1100   : > { %p32_p2 = scmp.ge.s32.totalorder %s3467_s27, 4   ;;  %s3471_s25 = smov %s3468_s29 }
0x1102   :  { %34 = sbr.rel (!%p32_p2) target bundleno = 13 (0xd), region = 159 }
0x1109   :  { %2279 = vsyncpa [#allocation4], 1 }
0x110a   :  { %2281 = vsyncpa [#allocation4 + $0x1], 1 }

</bundles_post_ra>
